<compile_context>
chip_gen: v6e
topology: v6e:2x2x1
jax: 0.10.0
libtpu: 0.0.40
codegen_flags: <defaults>
</compile_context>

<pallas_src>
import functools

import jax
import jax.numpy as jnp
from jax import lax
from jax.experimental import pallas as pl
from jax.experimental.pallas import tpu as pltpu


def _mish_fast(v):
    # mish(x) = x*tanh(softplus(x)) = x * u/(u+2),  u = e^x * (e^x + 2).
    # Written as x*(1 - 2/(u+2)) so u -> inf yields x (no inf/inf NaN); the exp
    # is clamped since mish(x) == x to f32 precision for x > ~20 anyway.
    e = jnp.exp(jnp.minimum(v, 40.0))
    u = e * (e + 2.0)
    d = u + 2.0
    r = pl.reciprocal(d, approx=True)       # EUP slot
    r = r * (2.0 - d * r)                   # one Newton step -> ~f32-accurate 1/d
    return v * (1.0 - 2.0 * r)


def _mish_exact(v):
    # torch semantics: x * tanh(softplus(x)) with numerically stable softplus
    sp = jnp.maximum(v, 0.0) + jnp.log1p(jnp.exp(-jnp.abs(v)))
    return v * jnp.tanh(sp)


# ----------------------------------------------------------------------------
# Fused kernel: CBM(1x1) -> haloed hidden slab -> CBM(3x3) -> +residual
# ----------------------------------------------------------------------------
def _residual_unit_kernel(x_ref, xt_ref, xb_ref, w1_ref, b1_ref, w2p_ref, b2_ref,
                          o_ref, *, w_true, mm_dtype):
    # x_ref  : (1, TH, Wp, Cin)  current row tile of the (W-padded) input
    # xt_ref : (1, 1,  Wp, Cin)  row just above the tile (clamped at image top)
    # xb_ref : (1, 1,  Wp, Cin)  row just below the tile (clamped at bottom)
    # w1_ref : (Cin, Chid)       mm_dtype, BN folded
    # b1_ref : (1, Chid)         f32
    # w2p_ref: (3, Chid, 3*Cout) mm_dtype, BN folded, dx packed into lanes
    # b2_ref : (1, Cout)         f32
    # o_ref  : (1, TH, Wp, Cin)
    t = pl.program_id(1)
    n_t = pl.num_programs(1)
    _, TH, Wp, Cin = x_ref.shape
    Chid = w1_ref.shape[1]
    Cout = o_ref.shape[3]

    b1 = b1_ref[...][0]                      # (Chid,)  f32
    b2 = b2_ref[...][0]                      # (Cout,)  f32

    # ---- CBM block 1: one matmul + one Mish pass over tile + halo rows ------
    xs = jnp.concatenate([xt_ref[0], x_ref[0], xb_ref[0]], axis=0)   # (TH+2,Wp,Cin)
    xs2 = xs.reshape((TH + 2) * Wp, Cin).astype(mm_dtype)
    h = jnp.dot(xs2, w1_ref[...], preferred_element_type=jnp.float32) + b1
    h3 = _mish_fast(h).reshape(TH + 2, Wp, Chid)                     # f32

    # Zero the hidden halo rows at the image borders (that IS conv2's 'same'
    # zero padding) and any padded columns (1x1 conv of zero input -> mish(b1)
    # which is NOT zero).  Tiny broadcast masks, single select over the slab.
    rr = lax.broadcasted_iota(jnp.int32, (TH + 2, 1, 1), 0)
    keep = jnp.logical_and(jnp.logical_or(t > 0, rr > 0),
                           jnp.logical_or(t < n_t - 1, rr < TH + 1))
    if Wp != w_true:                                                 # static
        cc = lax.broadcasted_iota(jnp.int32, (1, Wp, 1), 1)
        keep = jnp.logical_and(keep, cc < w_true)
    hs2 = jnp.where(keep, h3, 0.0).astype(mm_dtype).reshape((TH + 2) * Wp, Chid)

    # ---- CBM block 2: 3x3 conv = 3 matmuls (one per dy), dx packed into N ----
    acc = jnp.dot(hs2[0:TH * Wp], w2p_ref[0],
                  preferred_element_type=jnp.float32)                # (TH*Wp, 3*Cout)
    for dy in (1, 2):                                                # dy*Wp is 8-aligned
        acc = acc + jnp.dot(hs2[dy * Wp:dy * Wp + TH * Wp], w2p_ref[dy],
                            preferred_element_type=jnp.float32)
    c3 = acc.reshape(TH, Wp, 3 * Cout)
    # Lane slices: free when Cout % 128 == 0, otherwise a (correct) relayout.
    c_lft = c3[:, :, 0 * Cout:1 * Cout]       # needs h[.., x-1]
    c_mid = c3[:, :, 1 * Cout:2 * Cout]       # uses  h[.., x  ]
    c_rgt = c3[:, :, 2 * Cout:3 * Cout]       # needs h[.., x+1]

    # Column shifts via XLU roll + small broadcast masks; single accumulator.
    col = lax.broadcasted_iota(jnp.int32, (1, Wp, 1), 1)
    # roll(v, s)[x] = v[(x - s) mod Wp]; border columns are zero (conv padding).
    y = c_mid + b2
    y = y + jnp.where(col > 0, pltpu.roll(c_lft, shift=1, axis=1), 0.0)
    y = y + jnp.where(col < w_true - 1,
                      pltpu.roll(c_rgt, shift=Wp - 1, axis=1), 0.0)

    o_ref[0] = (_mish_fast(y) + x_ref[0].astype(jnp.float32)).astype(o_ref.dtype)


# ----------------------------------------------------------------------------
# Wrappers
# ----------------------------------------------------------------------------
def _largest_divisor_at_most(n, target):
    t = max(1, min(int(target), n))
    while n % t:
        t -= 1
    return t


def _vmem_capacity_bytes():
    try:
        return int(pltpu.get_tpu_info().vmem_capacity_bytes)
    except Exception:
        return 64 * 1024 * 1024      # conservative (v7x per-TensorCore VMEM)


def _auto_row_tile(H, Wp, Cin, Chid, x_itemsize, mm_itemsize, vmem_limit_bytes):
    """Largest row tile whose per-step footprint fits ~half the VMEM limit."""
    per_row = Wp * (
        4 * Cin * x_itemsize             # double-buffered input + output tiles
        + Chid * (mm_itemsize + 4)       # hidden slab (mm dtype) + f32 pre-mish temp
        + 3 * Cin * 4                    # packed (left|mid|right) f32 accumulator
        + 2 * Cin * 4)                   # f32 combine / Mish temporaries
    budget = vmem_limit_bytes // 2       # headroom for weights + compiler scratch
    return int(max(1, min(H, 256, budget // max(per_row, 1))))


def residual_unit_forward_nhwc(x_nhwc, params, *, row_tile=None,
                               mm_dtype=jnp.bfloat16):
    """Fused ResidualUnit forward on an NHWC tensor (N, H, W, Cin)."""
    w1, b1, w2, b2 = params
    N, H, W, Cin = x_nhwc.shape
    Chid = w1.shape[1]
    Cout = w2.shape[3]

    # Pad W to a multiple of 8 (sublane alignment for the in-kernel flatten and
    # pltpu.roll); the kernel zeroes the padded hidden columns and masks the
    # column shifts against the true width W.
    Wp = -(-W // 8) * 8
    x_in = x_nhwc if Wp == W else jnp.pad(
        x_nhwc, ((0, 0), (0, 0), (0, Wp - W), (0, 0)))

    # Matmul-input weights: cast once here (halves weight DMA for bf16) and pack
    # dx into lanes: w2p[dy, i, dx*Cout + o] = w2[dy, dx, i, o].
    w1m = w1.astype(mm_dtype)
    w2p = jnp.transpose(w2, (0, 2, 1, 3)).reshape(3, Chid, 3 * Cout).astype(mm_dtype)

    # Generation-aware VMEM budget (96 MiB on 128 MiB chips, 48 MiB on v7x).
    vmem_limit = (3 * _vmem_capacity_bytes()) // 4
    auto_th = _auto_row_tile(H, Wp, Cin, Chid,
                             jnp.dtype(x_nhwc.dtype).itemsize,
                             jnp.dtype(mm_dtype).itemsize, vmem_limit)
    TH = _largest_divisor_at_most(H, row_tile if row_tile is not None else auto_th)
    n_t = H // TH

    kernel = functools.partial(_residual_unit_kernel, w_true=W, mm_dtype=mm_dtype)

    out = pl.pallas_call(
        kernel,
        out_shape=jax.ShapeDtypeStruct((N, H, Wp, Cin), x_nhwc.dtype),
        grid=(N, n_t),
        in_specs=[
            # current row tile
            pl.BlockSpec((1, TH, Wp, Cin), lambda n, t: (n, t, 0, 0)),
            # 1-row halo blocks (block index == row index), clamped at borders;
            # the kernel zeroes the resulting HIDDEN halo rows there.
            pl.BlockSpec((1, 1, Wp, Cin),
                         lambda n, t: (n, jnp.maximum(t * TH - 1, 0), 0, 0)),
            pl.BlockSpec((1, 1, Wp, Cin),
                         lambda n, t: (n, jnp.minimum(t * TH + TH, H - 1), 0, 0)),
            pl.BlockSpec((Cin, Chid), lambda n, t: (0, 0)),
            pl.BlockSpec((1, Chid), lambda n, t: (0, 0)),
            pl.BlockSpec((3, Chid, 3 * Cout), lambda n, t: (0, 0, 0)),
            pl.BlockSpec((1, Cout), lambda n, t: (0, 0)),
        ],
        out_specs=pl.BlockSpec((1, TH, Wp, Cin), lambda n, t: (n, t, 0, 0)),
        compiler_params=pltpu.CompilerParams(
            dimension_semantics=("parallel", "parallel"),
            vmem_limit_bytes=int(vmem_limit)),
    )(x_in, x_in, x_in, w1m, b1, w2p, b2)

    return out if Wp == W else out[:, :, :W, :]


def residual_unit_forward(x_nchw, params, *, row_tile=None, mm_dtype=jnp.bfloat16):
    """PyTorch-layout wrapper: (N, Cin, H, W) -> (N, Cin, H, W).

    The transposes only exist to match the torch module's NCHW signature; in a
    full network keep NHWC end-to-end and call residual_unit_forward_nhwc.
    """
    x = jnp.transpose(x_nchw, (0, 2, 3, 1))
    y = residual_unit_forward_nhwc(x, params, row_tile=row_tile, mm_dtype=mm_dtype)
    return jnp.transpose(y, (0, 3, 1, 2))


# ----------------------------------------------------------------------------
# Deterministic parameter init (conv weights + folded inference-mode BatchNorm)
# ----------------------------------------------------------------------------
def init_params(key, in_channels, hidden_channels):
    eps = 1e-5
    ks = jax.random.split(key, 10)

    # conv1: torch weight (Chid, Cin, 1, 1) -> NHWC matmul weight (Cin, Chid)
    w1 = 0.1 * jax.random.normal(ks[0], (in_channels, hidden_channels), jnp.float32)
    g1 = 1.0 + 0.1 * jax.random.normal(ks[1], (hidden_channels,), jnp.float32)
    beta1 = 0.1 * jax.random.normal(ks[2], (hidden_channels,), jnp.float32)
    mu1 = 0.1 * jax.random.normal(ks[3], (hidden_channels,), jnp.float32)
    var1 = jax.nn.softplus(jax.random.normal(ks[4], (hidden_channels,), jnp.float32)) + 0.5
    s1 = g1 / jnp.sqrt(var1 + eps)
    w1f = w1 * s1[None, :]
    b1f = (beta1 - mu1 * s1)[None, :]                        # (1, Chid)

    # conv2: torch weight (Cin, Chid, 3, 3) -> HWIO (3, 3, Chid, Cin)
    w2 = 0.1 * jax.random.normal(ks[5], (3, 3, hidden_channels, in_channels), jnp.float32)
    g2 = 1.0 + 0.1 * jax.random.normal(ks[6], (in_channels,), jnp.float32)
    beta2 = 0.1 * jax.random.normal(ks[7], (in_channels,), jnp.float32)
    mu2 = 0.1 * jax.random.normal(ks[8], (in_channels,), jnp.float32)
    var2 = jax.nn.softplus(jax.random.normal(ks[9], (in_channels,), jnp.float32)) + 0.5
    s2 = g2 / jnp.sqrt(var2 + eps)
    w2f = w2 * s2[None, None, None, :]
    b2f = (beta2 - mu2 * s2)[None, :]                        # (1, Cin)

    return w1f, b1f, w2f, b2f


# ----------------------------------------------------------------------------
# Pure-JAX reference (independent of the kernel) for validation
# ----------------------------------------------------------------------------
def _reference(x_nchw, params):
    w1, b1, w2, b2 = params
    x = jnp.transpose(x_nchw, (0, 2, 3, 1))
    Cin, Chid = w1.shape
    h = lax.conv_general_dilated(
        x, w1.reshape(1, 1, Cin, Chid), (1, 1), 'SAME',
        dimension_numbers=('NHWC', 'HWIO', 'NHWC'))
    h = _mish_exact(h + b1[0])
    y = lax.conv_general_dilated(
        h, w2, (1, 1), 'SAME',
        dimension_numbers=('NHWC', 'HWIO', 'NHWC'))
    y = _mish_exact(y + b2[0])
    return jnp.transpose(x + y, (0, 3, 1, 2))


if __name__ == "__main__":
    N, Cin, H, W = 2, 4, 16, 16
    Chid = 8

    key = jax.random.PRNGKey(0)
    k_x, k_p, k_x2 = jax.random.split(key, 3)
    x = jax.random.normal(k_x, (N, Cin, H, W), jnp.float32)
    params = init_params(k_p, Cin, Chid)

    ref = _reference(x, params)

    # Default path: bf16 MXU inputs, auto (VMEM-budget) row tile.
    out_bf16 = jax.jit(residual_unit_forward)(x, params)
    jax.block_until_ready(out_bf16)
    assert out_bf16.shape == (N, Cin, H, W)
    assert bool(jnp.allclose(out_bf16, ref, atol=3e-2, rtol=3e-2)), "mismatch (bf16)"

    # Exact f32 MXU path with a forced small row tile (exercises the 1-row halo).
    out_f32 = jax.jit(functools.partial(residual_unit_forward, row_tile=8,
                                        mm_dtype=jnp.float32))(x, params)
    jax.block_until_ready(out_f32)
    assert bool(jnp.allclose(out_f32, ref, atol=2e-3, rtol=2e-3)), "mismatch (f32)"

    # Non-multiple-of-8 width (exercises W padding + hidden pad-column masking).
    x2 = jax.random.normal(k_x2, (N, Cin, H, 13), jnp.float32)
    ref2 = _reference(x2, params)
    out_w13 = jax.jit(functools.partial(residual_unit_forward, row_tile=8,
                                        mm_dtype=jnp.float32))(x2, params)
    jax.block_until_ready(out_w13)
    assert out_w13.shape == (N, Cin, H, 13)
    assert bool(jnp.allclose(out_w13, ref2, atol=2e-3, rtol=2e-3)), "mismatch (W=13)"

    print("KERNEL_OK")
</pallas_src>

<mosaic_0001>
module attributes {stable_mosaic.version = 11 : i64} {
  func.func @_residual_unit_kernel(%arg0: i32, %arg1: i32, %arg2: memref<1x16x16x4xf32, #tpu.memory_space<vmem>>, %arg3: memref<1x1x16x4xf32, #tpu.memory_space<vmem>>, %arg4: memref<1x1x16x4xf32, #tpu.memory_space<vmem>>, %arg5: memref<4x8xbf16, #tpu.memory_space<vmem>>, %arg6: memref<1x8xf32, #tpu.memory_space<vmem>>, %arg7: memref<3x8x12xbf16, #tpu.memory_space<vmem>>, %arg8: memref<1x4xf32, #tpu.memory_space<vmem>>, %arg9: memref<1x16x16x4xf32, #tpu.memory_space<vmem>>) attributes {dimension_semantics = [#tpu.dimension_semantics<parallel>, #tpu.dimension_semantics<parallel>], iteration_bounds = array<i64: 2, 1>, scalar_prefetch = 0 : i64, scratch_operands = 0 : i64, tpu.core_type = #tpu.core_type<tc>, window_params = [{transform_indices = @transform_0, window_bounds = array<i64: 1, 16, 16, 4>}, {transform_indices = @transform_1, window_bounds = array<i64: 1, 1, 16, 4>}, {transform_indices = @transform_2, window_bounds = array<i64: 1, 1, 16, 4>}, {pipeline_mode = #tpu.pipeline_mode<synchronous>, transform_indices = @transform_3, window_bounds = array<i64: 4, 8>}, {pipeline_mode = #tpu.pipeline_mode<synchronous>, transform_indices = @transform_4, window_bounds = array<i64: 1, 8>}, {pipeline_mode = #tpu.pipeline_mode<synchronous>, transform_indices = @transform_5, window_bounds = array<i64: 3, 8, 12>}, {pipeline_mode = #tpu.pipeline_mode<synchronous>, transform_indices = @transform_6, window_bounds = array<i64: 1, 4>}, {transform_indices = @transform_7, window_bounds = array<i64: 1, 16, 16, 4>}]} {
    %c0 = arith.constant 0 : index
    %c0_0 = arith.constant 0 : index
    %0 = vector.load %arg6[%c0, %c0_0] : memref<1x8xf32, #tpu.memory_space<vmem>>, vector<1x8xf32>
    %1 = vector.shape_cast %0 : vector<1x8xf32> to vector<8xf32>
    %c0_1 = arith.constant 0 : index
    %c0_2 = arith.constant 0 : index
    %2 = vector.load %arg8[%c0_1, %c0_2] : memref<1x4xf32, #tpu.memory_space<vmem>>, vector<1x4xf32>
    %3 = vector.shape_cast %2 : vector<1x4xf32> to vector<4xf32>
    %c0_3 = arith.constant 0 : index
    %c0_4 = arith.constant 0 : index
    %c0_5 = arith.constant 0 : index
    %c0_6 = arith.constant 0 : index
    %4 = vector.load %arg3[%c0_3, %c0_4, %c0_5, %c0_6] : memref<1x1x16x4xf32, #tpu.memory_space<vmem>>, vector<1x1x16x4xf32>
    %5 = vector.shape_cast %4 : vector<1x1x16x4xf32> to vector<1x16x4xf32>
    %c0_7 = arith.constant 0 : index
    %c0_8 = arith.constant 0 : index
    %c0_9 = arith.constant 0 : index
    %c0_10 = arith.constant 0 : index
    %6 = vector.load %arg2[%c0_7, %c0_8, %c0_9, %c0_10] : memref<1x16x16x4xf32, #tpu.memory_space<vmem>>, vector<1x16x16x4xf32>
    %7 = vector.shape_cast %6 : vector<1x16x16x4xf32> to vector<16x16x4xf32>
    %c0_11 = arith.constant 0 : index
    %c0_12 = arith.constant 0 : index
    %c0_13 = arith.constant 0 : index
    %c0_14 = arith.constant 0 : index
    %8 = vector.load %arg4[%c0_11, %c0_12, %c0_13, %c0_14] : memref<1x1x16x4xf32, #tpu.memory_space<vmem>>, vector<1x1x16x4xf32>
    %9 = vector.shape_cast %8 : vector<1x1x16x4xf32> to vector<1x16x4xf32>
    %10 = tpu.concatenate %5, %7, %9 in 0 : vector<1x16x4xf32>, vector<16x16x4xf32>, vector<1x16x4xf32> -> vector<18x16x4xf32>
    %11 = vector.shape_cast %10 : vector<18x16x4xf32> to vector<288x4xf32>
    %12 = arith.truncf %11 : vector<288x4xf32> to vector<288x4xbf16>
    %c0_15 = arith.constant 0 : index
    %c0_16 = arith.constant 0 : index
    %13 = vector.load %arg5[%c0_15, %c0_16] : memref<4x8xbf16, #tpu.memory_space<vmem>>, vector<4x8xbf16>
    %cst = arith.constant dense<0.000000e+00> : vector<288x8xf32>
    %14 = tpu.matmul %12, %13, %cst {dimension_numbers = #tpu.dot_dimension_numbers<[1], [0], [0], [1], [0, 0, 1, 1], [], []>} : vector<288x4xbf16>, vector<4x8xbf16>, vector<288x8xf32> -> vector<288x8xf32>
    %15 = vector.shape_cast %1 : vector<8xf32> to vector<1x8xf32>
    %16 = vector.broadcast %15 : vector<1x8xf32> to vector<288x8xf32>
    %17 = arith.addf %14, %16 : vector<288x8xf32>
    %cst_17 = arith.constant 4.000000e+01 : f32
    %18 = vector.broadcast %cst_17 : f32 to vector<288x8xf32>
    %19 = arith.minimumf %17, %18 : vector<288x8xf32>
    %20 = math.exp %19 : vector<288x8xf32>
    %cst_18 = arith.constant 2.000000e+00 : f32
    %21 = vector.broadcast %cst_18 : f32 to vector<288x8xf32>
    %22 = arith.addf %20, %21 : vector<288x8xf32>
    %23 = arith.mulf %20, %22 : vector<288x8xf32>
    %cst_19 = arith.constant 2.000000e+00 : f32
    %24 = vector.broadcast %cst_19 : f32 to vector<288x8xf32>
    %25 = arith.addf %23, %24 : vector<288x8xf32>
    %26 = tpu.reciprocal %25 {approx = true} : vector<288x8xf32> -> vector<288x8xf32>
    %27 = arith.mulf %25, %26 : vector<288x8xf32>
    %cst_20 = arith.constant 2.000000e+00 : f32
    %28 = vector.broadcast %cst_20 : f32 to vector<288x8xf32>
    %29 = arith.subf %28, %27 : vector<288x8xf32>
    %30 = arith.mulf %26, %29 : vector<288x8xf32>
    %cst_21 = arith.constant 2.000000e+00 : f32
    %31 = vector.broadcast %cst_21 : f32 to vector<288x8xf32>
    %32 = arith.mulf %31, %30 : vector<288x8xf32>
    %cst_22 = arith.constant 1.000000e+00 : f32
    %33 = vector.broadcast %cst_22 : f32 to vector<288x8xf32>
    %34 = arith.subf %33, %32 : vector<288x8xf32>
    %35 = arith.mulf %17, %34 : vector<288x8xf32>
    %36 = vector.shape_cast %35 : vector<288x8xf32> to vector<18x16x8xf32>
    %37 = tpu.iota {dimensions = array<i32: 0>} : vector<18x1x1xi32>
    %c0_i32 = arith.constant 0 : i32
    %38 = arith.cmpi sgt, %arg1, %c0_i32 : i32
    %c0_i32_23 = arith.constant 0 : i32
    %39 = vector.broadcast %c0_i32_23 : i32 to vector<18x1x1xi32>
    %40 = arith.cmpi sgt, %37, %39 : vector<18x1x1xi32>
    %41 = vector.broadcast %38 : i1 to vector<18x1x1xi1>
    %42 = arith.ori %41, %40 : vector<18x1x1xi1>
    %c0_i32_24 = arith.constant 0 : i32
    %43 = arith.cmpi slt, %arg1, %c0_i32_24 : i32
    %c17_i32 = arith.constant 17 : i32
    %44 = vector.broadcast %c17_i32 : i32 to vector<18x1x1xi32>
    %45 = arith.cmpi slt, %37, %44 : vector<18x1x1xi32>
    %46 = vector.broadcast %43 : i1 to vector<18x1x1xi1>
    %47 = arith.ori %46, %45 : vector<18x1x1xi1>
    %48 = arith.andi %42, %47 : vector<18x1x1xi1>
    %cst_25 = arith.constant 0.000000e+00 : f32
    %49 = vector.shape_cast %48 : vector<18x1x1xi1> to vector<18x1x1xi1>
    %50 = vector.broadcast %49 : vector<18x1x1xi1> to vector<18x16x8xi1>
    %51 = vector.broadcast %cst_25 : f32 to vector<18x16x8xf32>
    %52 = arith.select %50, %36, %51 : vector<18x16x8xi1>, vector<18x16x8xf32>
    %53 = arith.truncf %52 : vector<18x16x8xf32> to vector<18x16x8xbf16>
    %54 = vector.shape_cast %53 : vector<18x16x8xbf16> to vector<288x8xbf16>
    %55 = vector.extract_strided_slice %54 {offsets = [0, 0], sizes = [256, 8], strides = [1, 1]} : vector<288x8xbf16> to vector<256x8xbf16>
    %c0_26 = arith.constant 0 : index
    %c0_27 = arith.constant 0 : index
    %c0_28 = arith.constant 0 : index
    %56 = vector.load %arg7[%c0_26, %c0_27, %c0_28] : memref<3x8x12xbf16, #tpu.memory_space<vmem>>, vector<1x8x12xbf16>
    %57 = vector.shape_cast %56 : vector<1x8x12xbf16> to vector<8x12xbf16>
    %cst_29 = arith.constant dense<0.000000e+00> : vector<256x12xf32>
    %58 = tpu.matmul %55, %57, %cst_29 {dimension_numbers = #tpu.dot_dimension_numbers<[1], [0], [0], [1], [0, 0, 1, 1], [], []>} : vector<256x8xbf16>, vector<8x12xbf16>, vector<256x12xf32> -> vector<256x12xf32>
    %59 = vector.extract_strided_slice %54 {offsets = [16, 0], sizes = [256, 8], strides = [1, 1]} : vector<288x8xbf16> to vector<256x8xbf16>
    %c1 = arith.constant 1 : index
    %c0_30 = arith.constant 0 : index
    %c0_31 = arith.constant 0 : index
    %60 = vector.load %arg7[%c1, %c0_30, %c0_31] : memref<3x8x12xbf16, #tpu.memory_space<vmem>>, vector<1x8x12xbf16>
    %61 = vector.shape_cast %60 : vector<1x8x12xbf16> to vector<8x12xbf16>
    %cst_32 = arith.constant dense<0.000000e+00> : vector<256x12xf32>
    %62 = tpu.matmul %59, %61, %cst_32 {dimension_numbers = #tpu.dot_dimension_numbers<[1], [0], [0], [1], [0, 0, 1, 1], [], []>} : vector<256x8xbf16>, vector<8x12xbf16>, vector<256x12xf32> -> vector<256x12xf32>
    %63 = arith.addf %58, %62 : vector<256x12xf32>
    %64 = vector.extract_strided_slice %54 {offsets = [32, 0], sizes = [256, 8], strides = [1, 1]} : vector<288x8xbf16> to vector<256x8xbf16>
    %c2 = arith.constant 2 : index
    %c0_33 = arith.constant 0 : index
    %c0_34 = arith.constant 0 : index
    %65 = vector.load %arg7[%c2, %c0_33, %c0_34] : memref<3x8x12xbf16, #tpu.memory_space<vmem>>, vector<1x8x12xbf16>
    %66 = vector.shape_cast %65 : vector<1x8x12xbf16> to vector<8x12xbf16>
    %cst_35 = arith.constant dense<0.000000e+00> : vector<256x12xf32>
    %67 = tpu.matmul %64, %66, %cst_35 {dimension_numbers = #tpu.dot_dimension_numbers<[1], [0], [0], [1], [0, 0, 1, 1], [], []>} : vector<256x8xbf16>, vector<8x12xbf16>, vector<256x12xf32> -> vector<256x12xf32>
    %68 = arith.addf %63, %67 : vector<256x12xf32>
    %69 = vector.shape_cast %68 : vector<256x12xf32> to vector<16x16x12xf32>
    %70 = vector.extract_strided_slice %69 {offsets = [0, 0, 0], sizes = [16, 16, 4], strides = [1, 1, 1]} : vector<16x16x12xf32> to vector<16x16x4xf32>
    %71 = vector.extract_strided_slice %69 {offsets = [0, 0, 4], sizes = [16, 16, 4], strides = [1, 1, 1]} : vector<16x16x12xf32> to vector<16x16x4xf32>
    %72 = vector.extract_strided_slice %69 {offsets = [0, 0, 8], sizes = [16, 16, 4], strides = [1, 1, 1]} : vector<16x16x12xf32> to vector<16x16x4xf32>
    %73 = tpu.iota {dimensions = array<i32: 1>} : vector<1x16x1xi32>
    %74 = vector.shape_cast %3 : vector<4xf32> to vector<1x1x4xf32>
    %75 = vector.broadcast %74 : vector<1x1x4xf32> to vector<16x16x4xf32>
    %76 = arith.addf %71, %75 : vector<16x16x4xf32>
    %c0_i32_36 = arith.constant 0 : i32
    %77 = vector.broadcast %c0_i32_36 : i32 to vector<1x16x1xi32>
    %78 = arith.cmpi sgt, %73, %77 : vector<1x16x1xi32>
    %c1_i32 = arith.constant 1 : i32
    %79 = tpu.dynamic_rotate %70 by %c1_i32 dim 1 : vector<16x16x4xf32>, i32 -> vector<16x16x4xf32>
    %cst_37 = arith.constant 0.000000e+00 : f32
    %80 = vector.shape_cast %78 : vector<1x16x1xi1> to vector<1x16x1xi1>
    %81 = vector.broadcast %80 : vector<1x16x1xi1> to vector<16x16x4xi1>
    %82 = vector.broadcast %cst_37 : f32 to vector<16x16x4xf32>
    %83 = arith.select %81, %79, %82 : vector<16x16x4xi1>, vector<16x16x4xf32>
    %84 = arith.addf %76, %83 : vector<16x16x4xf32>
    %c15_i32 = arith.constant 15 : i32
    %85 = vector.broadcast %c15_i32 : i32 to vector<1x16x1xi32>
    %86 = arith.cmpi slt, %73, %85 : vector<1x16x1xi32>
    %c15_i32_38 = arith.constant 15 : i32
    %87 = tpu.dynamic_rotate %72 by %c15_i32_38 dim 1 : vector<16x16x4xf32>, i32 -> vector<16x16x4xf32>
    %cst_39 = arith.constant 0.000000e+00 : f32
    %88 = vector.shape_cast %86 : vector<1x16x1xi1> to vector<1x16x1xi1>
    %89 = vector.broadcast %88 : vector<1x16x1xi1> to vector<16x16x4xi1>
    %90 = vector.broadcast %cst_39 : f32 to vector<16x16x4xf32>
    %91 = arith.select %89, %87, %90 : vector<16x16x4xi1>, vector<16x16x4xf32>
    %92 = arith.addf %84, %91 : vector<16x16x4xf32>
    %cst_40 = arith.constant 4.000000e+01 : f32
    %93 = vector.broadcast %cst_40 : f32 to vector<16x16x4xf32>
    %94 = arith.minimumf %92, %93 : vector<16x16x4xf32>
    %95 = math.exp %94 : vector<16x16x4xf32>
    %cst_41 = arith.constant 2.000000e+00 : f32
    %96 = vector.broadcast %cst_41 : f32 to vector<16x16x4xf32>
    %97 = arith.addf %95, %96 : vector<16x16x4xf32>
    %98 = arith.mulf %95, %97 : vector<16x16x4xf32>
    %cst_42 = arith.constant 2.000000e+00 : f32
    %99 = vector.broadcast %cst_42 : f32 to vector<16x16x4xf32>
    %100 = arith.addf %98, %99 : vector<16x16x4xf32>
    %101 = tpu.reciprocal %100 {approx = true} : vector<16x16x4xf32> -> vector<16x16x4xf32>
    %102 = arith.mulf %100, %101 : vector<16x16x4xf32>
    %cst_43 = arith.constant 2.000000e+00 : f32
    %103 = vector.broadcast %cst_43 : f32 to vector<16x16x4xf32>
    %104 = arith.subf %103, %102 : vector<16x16x4xf32>
    %105 = arith.mulf %101, %104 : vector<16x16x4xf32>
    %cst_44 = arith.constant 2.000000e+00 : f32
    %106 = vector.broadcast %cst_44 : f32 to vector<16x16x4xf32>
    %107 = arith.mulf %106, %105 : vector<16x16x4xf32>
    %cst_45 = arith.constant 1.000000e+00 : f32
    %108 = vector.broadcast %cst_45 : f32 to vector<16x16x4xf32>
    %109 = arith.subf %108, %107 : vector<16x16x4xf32>
    %110 = arith.mulf %92, %109 : vector<16x16x4xf32>
    %c0_46 = arith.constant 0 : index
    %c0_47 = arith.constant 0 : index
    %c0_48 = arith.constant 0 : index
    %c0_49 = arith.constant 0 : index
    %111 = vector.load %arg2[%c0_46, %c0_47, %c0_48, %c0_49] : memref<1x16x16x4xf32, #tpu.memory_space<vmem>>, vector<1x16x16x4xf32>
    %112 = vector.shape_cast %111 : vector<1x16x16x4xf32> to vector<16x16x4xf32>
    %113 = arith.addf %110, %112 : vector<16x16x4xf32>
    %c0_50 = arith.constant 0 : index
    %c0_51 = arith.constant 0 : index
    %c0_52 = arith.constant 0 : index
    %c0_53 = arith.constant 0 : index
    %114 = vector.load %arg9[%c0_50, %c0_51, %c0_52, %c0_53] : memref<1x16x16x4xf32, #tpu.memory_space<vmem>>, vector<1x16x16x4xf32>
    %115 = vector.shape_cast %114 : vector<1x16x16x4xf32> to vector<16x16x4xf32>
    %116 = vector.shape_cast %113 : vector<16x16x4xf32> to vector<1x16x16x4xf32>
    tpu.vector_store %arg9[%c0_50, %c0_51, %c0_52, %c0_53], %116 {strides = array<i32>} : memref<1x16x16x4xf32, #tpu.memory_space<vmem>>, vector<1x16x16x4xf32>,
    return
  }
  func.func @transform_0(%arg0: i32, %arg1: i32) -> (i32, i32, i32, i32) {
    %c0_i32 = arith.constant 0 : i32
    %c0_i32_0 = arith.constant 0 : i32
    %c0_i32_1 = arith.constant 0 : i32
    return %arg0, %arg1, %c0_i32, %c0_i32_0 : i32, i32, i32, i32
  }
  func.func @transform_1(%arg0: i32, %arg1: i32) -> (i32, i32, i32, i32) {
    %c16_i32 = arith.constant 16 : i32
    %0 = arith.muli %arg1, %c16_i32 : i32
    %c1_i32 = arith.constant 1 : i32
    %1 = arith.subi %0, %c1_i32 : i32
    %c0_i32 = arith.constant 0 : i32
    %2 = arith.maxsi %1, %c0_i32 : i32
    %c0_i32_0 = arith.constant 0 : i32
    %c0_i32_1 = arith.constant 0 : i32
    %c0_i32_2 = arith.constant 0 : i32
    return %arg0, %2, %c0_i32_0, %c0_i32_1 : i32, i32, i32, i32
  }
  func.func @transform_2(%arg0: i32, %arg1: i32) -> (i32, i32, i32, i32) {
    %c16_i32 = arith.constant 16 : i32
    %0 = arith.muli %arg1, %c16_i32 : i32
    %c16_i32_0 = arith.constant 16 : i32
    %1 = arith.addi %0, %c16_i32_0 : i32
    %c15_i32 = arith.constant 15 : i32
    %2 = arith.minsi %1, %c15_i32 : i32
    %c0_i32 = arith.constant 0 : i32
    %c0_i32_1 = arith.constant 0 : i32
    %c0_i32_2 = arith.constant 0 : i32
    return %arg0, %2, %c0_i32, %c0_i32_1 : i32, i32, i32, i32
  }
  func.func @transform_3(%arg0: i32, %arg1: i32) -> (i32, i32) {
    %c0_i32 = arith.constant 0 : i32
    %c0_i32_0 = arith.constant 0 : i32
    %c0_i32_1 = arith.constant 0 : i32
    return %c0_i32, %c0_i32_0 : i32, i32
  }
  func.func @transform_4(%arg0: i32, %arg1: i32) -> (i32, i32) {
    %c0_i32 = arith.constant 0 : i32
    %c0_i32_0 = arith.constant 0 : i32
    %c0_i32_1 = arith.constant 0 : i32
    return %c0_i32, %c0_i32_0 : i32, i32
  }
  func.func @transform_5(%arg0: i32, %arg1: i32) -> (i32, i32, i32) {
    %c0_i32 = arith.constant 0 : i32
    %c0_i32_0 = arith.constant 0 : i32
    %c0_i32_1 = arith.constant 0 : i32
    %c0_i32_2 = arith.constant 0 : i32
    return %c0_i32, %c0_i32_0, %c0_i32_1 : i32, i32, i32
  }
  func.func @transform_6(%arg0: i32, %arg1: i32) -> (i32, i32) {
    %c0_i32 = arith.constant 0 : i32
    %c0_i32_0 = arith.constant 0 : i32
    %c0_i32_1 = arith.constant 0 : i32
    return %c0_i32, %c0_i32_0 : i32, i32
  }
  func.func @transform_7(%arg0: i32, %arg1: i32) -> (i32, i32, i32, i32) {
    %c0_i32 = arith.constant 0 : i32
    %c0_i32_0 = arith.constant 0 : i32
    %c0_i32_1 = arith.constant 0 : i32
    return %arg0, %arg1, %c0_i32, %c0_i32_0 : i32, i32, i32, i32
  }
}

</mosaic_0001>

<bundles_post_ra>
// kernel: residual_unit_forward.1
= control target key start
LH: loop header
LB: loop body
LE: loop exit
PB: predicated region body
PF: predicated region fallthrough
CT: control target
= control target key end

     0   :  { %s4120_s24 = smov 0   ;;  %s4122_s25 = smov 0   ;;  %s5943_s0 = inlined_call_operand.vmem [shape: f32[2,16,16,4], index: 0, kind: input, shape index: {}, may-alias: {0,1,2}]   ;;  %s5944_s1 = inlined_call_operand.vmem [shape: f32[2,16,16,4], index: 1, kind: input, shape index: {}, may-alias: {0,1,2}]   ;;  %s5945_s2 = inlined_call_operand.vmem [shape: f32[2,16,16,4], index: 2, kind: input, shape index: {}, may-alias: {0,1,2}]   ;;  %s5946_s3 = inlined_call_operand.vmem [shape: bf16[4,8], index: 3, kind: input, shape index: {}]   ;;  %s5947_s4 = inlined_call_operand.vmem [shape: f32[1,8], index: 4, kind: input, shape index: {}]   ;;  %s5948_s5 = inlined_call_operand.vmem [shape: bf16[3,8,12], index: 5, kind: input, shape index: {}]   ;;  %s5949_s6 = inlined_call_operand.vmem [shape: f32[1,4], index: 6, kind: input, shape index: {}]   ;;  %s5950_s7 = inlined_call_operand.vmem [shape: f32[2,16,16,4], index: 7, kind: output, shape index: {}]  }
   0x1   :  { %s4124_s26 = smov 0  }
   0x2 LB: > { %s29_s27 = sadd.s32 1, %s4070_s25  ;;  %p3441_p0 = scmp.ge.s32.totalorder %s4074_s26, 1  ;;  %s4074_s26 = sphi %s4124_s26, %s17_s26   ;;  %s4070_s25 = sphi %s4122_s25, %s6022_s25   ;;  %s4066_s24 = sphi %s4120_s24, %s6021_s24  }
   0x3   : > { %p31_p1 = scmp.ge.s32.totalorder %s29_s27, 2  ;;  %p323_p2 = scmp.lt.s32.totalorder %s4074_s26, 3 }
   0x5   : > { %s6024_s27 = smov (%p31_p1, %s29_s27), 0  ;;  %p324_p3 = pnand %p3441_p0, %p323_p2 }
   0x7   : > { %327 = sbr.rel (%p324_p3) target bundleno = 1105 (0x451), region = 48 }
   0xc   : > { %v504_v0 = vld [vmem:[%s5946_s3] sm:$0x3]  ;;  %vm566_vm0 = vcmask 1041408   ;;  %p392_p4 = scmp.lt.s32.totalorder %s4066_s24, 1  ;;  %vm511_vm1 = vcmask 31744   ;;  %vm1333_vm2 = vcmask 1043456  }
   0xd   : > { %3736 = vmatprep.subr.msk.bf16.mxu0 %vm566_vm0, %v504_v0  ;;  %v568_v1 = vsel %vm566_vm0, %v504_v0, 0  ;;  %v3469_v56 = vld [vmem:[%s5948_s5 + $0x4] sm:$0xf]  ;;  %v3501_v57 = vld [vmem:[%s5948_s5 + $0x8] sm:$0xf]  ;;  %vm1284_vm3 = vcmask 64512  }
   0xe   : > { %3597 = vmatpush3.bf16.msra.mxu0 %v568_v1  ;;  %s6026_s24 = smov (!%p392_p4, %s4066_s24), 1  ;;  %3737 = vmatprep.subr.msk.bf16.mxu1 %vm1333_vm2, %v3469_v56  ;;  %v1335_v58 = vsel %vm1333_vm2, %v3469_v56, 0  ;;  %v1671_v59 = vsel %vm1333_vm2, %v3501_v57, 0  ;;  %v4232_v60 = vld [vmem:[%s5947_s4] ss:$0 sm:$0xff]  ;;  %s4076_s9 = smov 4  }
   0xf   : > { %s4141_s30 = sshll.u32 %s6026_s24, 8  ;;  %3739 = vmatprep.subr.msk.bf16.mxu0 %vm1333_vm2, %v3501_v57  ;;  %3635 = vmatpush3.bf16.msra.mxu1 %v1335_v58  ;;  %s4078_s11 = smov 120  }
  0x10   : > { %s4147_s10 = scalar_lea.vmem %s5943_s0, %s4141_s30  ;;  %s414_s13 = scalar_lea.vmem %s5944_s1, %s4141_s30 }
  0x11   : > { %v450_v2 = vld [vmem:[%s414_s13] sm:$0xff]  ;;  %v451_v3 = vld [vmem:[%s414_s13 + $0x8] sm:$0xff]  ;;  %v4160_v7 = vld [vmem:[%s4147_s10 + $0x10] sm:$0xff]  ;;  %s3523_s14 = sadd.s32 240, %s4141_s30 }
  0x12   : > { %v4154_v4 = vld [vmem:[%s4147_s10] sm:$0xff]  ;;  %v486_v5 = vpack.c.bf16 %v451_v3, %v450_v2  ;;  %v4157_v6 = vld [vmem:[%s4147_s10 + $0x8] sm:$0xff]  ;;  %5969 = vst [vmem:[#allocation4_spill] sm:$0xff] %v4160_v7  ;;  %v455_v8 = vld [vmem:[%s4147_s10 + $0x18] sm:$0xff]  ;;  %s431_s17 = scalar_lea.vmem %s5945_s2, %s3523_s14  ;;  %s5864_s14 = scalar_lea.vmem %s5950_s7, %s4141_s30 }
  0x13   : > { %5967 = vst [vmem:[#allocation2_spill] sm:$0xff] %v4154_v4  ;;  %5968 = vst [vmem:[#allocation3_spill] sm:$0xff] %v4157_v6  ;;  %v487_v9 = vpack.c.bf16 %v4157_v6, %v4154_v4  ;;  %v488_v10 = vpack.c.bf16 %v455_v8, %v4160_v7  ;;  %v4170_v11 = vld [vmem:[%s4147_s10 + $0x20] sm:$0xff]  ;;  %v457_v12 = vld [vmem:[%s4147_s10 + $0x28] sm:$0xff] }
  0x14   : > { %3598 = vmatprep.mubr.msk.bf16.mxu0 %vm511_vm1, %v486_v5  ;;  %5970 = vst [vmem:[#allocation5_spill] sm:$0xff] %v4170_v11  ;;  %v458_v13 = vld [vmem:[%s4147_s10 + $0x30] sm:$0xff]  ;;  %v459_v14 = vld [vmem:[%s4147_s10 + $0x38] sm:$0xff]  ;;  %v489_v15 = vpack.c.bf16 %v457_v12, %v4170_v11  ;;  %v460_v17 = vld [vmem:[%s4147_s10 + $0x40] sm:$0xff] }
  0x15   : > { %3599 = vmatmul.mubr.msk.bf16.vlgmr.msra.gmra.mxu0 %vm511_vm1, %v487_v9  ;;  %v490_v16 = vpack.c.bf16 %v459_v14, %v458_v13  ;;  %v461_v18 = vld [vmem:[%s4147_s10 + $0x48] sm:$0xff]  ;;  %v462_v19 = vld [vmem:[%s4147_s10 + $0x50] sm:$0xff]  ;;  %v463_v20 = vld [vmem:[%s4147_s10 + $0x58] sm:$0xff] }
  0x16   : > { %3602 = vmatprep.mubr.msk.bf16.mxu0 %vm511_vm1, %v488_v10  ;;  %v491_v21 = vpack.c.bf16 %v461_v18, %v460_v17  ;;  %v492_v22 = vpack.c.bf16 %v463_v20, %v462_v19  ;;  %v464_v23 = vld [vmem:[%s4147_s10 + $0x60] sm:$0xff]  ;;  %v465_v24 = vld [vmem:[%s4147_s10 + $0x68] sm:$0xff]  ;;  %v466_v25 = vld [vmem:[%s4147_s10 + $0x70] sm:$0xff]  ;;  %3703 = vmatpush3.bf16.msra.mxu0 %v1671_v59 }
  0x17   : > { %v467_v26 = vld [vmem:[%s4147_s10 + $0x78] sm:$0xff]  ;;  %v493_v27 = vpack.c.bf16 %v465_v24, %v464_v23  ;;  %v468_v29 = vld [vmem:[%s4147_s10 + $0x80] sm:$0xff]  ;;  %v469_v30 = vld [vmem:[%s4147_s10 + $0x88] sm:$0xff] }
  0x18   : > { %v494_v28 = vpack.c.bf16 %v467_v26, %v466_v25  ;;  %v470_v31 = vld [vmem:[%s4147_s10 + $0x90] sm:$0xff]  ;;  %v471_v32 = vld [vmem:[%s4147_s10 + $0x98] sm:$0xff]  ;;  %v495_v33 = vpack.c.bf16 %v469_v30, %v468_v29  ;;  %v472_v35 = vld [vmem:[%s4147_s10 + $0xa0] sm:$0xff] }
  0x19   : > { %v496_v34 = vpack.c.bf16 %v471_v32, %v470_v31  ;;  %v473_v36 = vld [vmem:[%s4147_s10 + $0xa8] sm:$0xff]  ;;  %v474_v37 = vld [vmem:[%s4147_s10 + $0xb0] sm:$0xff]  ;;  %v475_v38 = vld [vmem:[%s4147_s10 + $0xb8] sm:$0xff] }
  0x1a   : > { %v497_v39 = vpack.c.bf16 %v473_v36, %v472_v35  ;;  %v498_v40 = vpack.c.bf16 %v475_v38, %v474_v37  ;;  %v476_v41 = vld [vmem:[%s4147_s10 + $0xc0] sm:$0xff]  ;;  %v477_v42 = vld [vmem:[%s4147_s10 + $0xc8] sm:$0xff]  ;;  %v478_v43 = vld [vmem:[%s4147_s10 + $0xd0] sm:$0xff] }
  0x1b   : > { %v479_v44 = vld [vmem:[%s4147_s10 + $0xd8] sm:$0xff]  ;;  %v499_v45 = vpack.c.bf16 %v477_v42, %v476_v41  ;;  %v480_v47 = vld [vmem:[%s4147_s10 + $0xe0] sm:$0xff]  ;;  %v481_v48 = vld [vmem:[%s4147_s10 + $0xe8] sm:$0xff] }
  0x1c   : > { %v500_v46 = vpack.c.bf16 %v479_v44, %v478_v43  ;;  %v482_v49 = vld [vmem:[%s4147_s10 + $0xf0] sm:$0xff]  ;;  %v483_v50 = vld [vmem:[%s4147_s10 + $0xf8] sm:$0xff]  ;;  %v501_v51 = vpack.c.bf16 %v481_v48, %v480_v47  ;;  %v484_v53 = vld [vmem:[%s431_s17] sm:$0xff] }
  0x1d   : > { %3603 = vmatmul.mubr.msk.bf16.gmra.mxu0 %vm511_vm1, %v489_v15  ;;  %v502_v52 = vpack.c.bf16 %v483_v50, %v482_v49  ;;  %v485_v54 = vld [vmem:[%s431_s17 + $0x8] sm:$0xff]  ;;  %v1281_v29 = vld [vmem:[%s5948_s5] sm:$0xf] }
  0x1e   : > { %3606 = vmatprep.mubr.msk.bf16.mxu0 %vm511_vm1, %v490_v16  ;;  %v503_v55 = vpack.c.bf16 %v485_v54, %v484_v53  ;;  %3738 = vmatprep.subr.msk.bf16.mxu1 %vm1333_vm2, %v1281_v29  ;;  %v4270_v35 = vsel %vm1333_vm2, %v1281_v29, 0 }
  0x25   : > { %3607 = vmatmul.mubr.msk.bf16.gmra.mxu0 %vm511_vm1, %v491_v21 }
  0x26   : > { %3610 = vmatprep.mubr.msk.bf16.mxu0 %vm511_vm1, %v492_v22 }
  0x2d   : > { %3611 = vmatmul.mubr.msk.bf16.gmra.mxu0 %vm511_vm1, %v493_v27 }
  0x2e   : > { %3614 = vmatprep.mubr.msk.bf16.mxu0 %vm511_vm1, %v494_v28 }
  0x35   : > { %3615 = vmatmul.mubr.msk.bf16.gmra.mxu0 %vm511_vm1, %v495_v33 }
  0x36   : > { %3618 = vmatprep.mubr.msk.bf16.mxu0 %vm511_vm1, %v496_v34 }
  0x3d   : > { %3619 = vmatmul.mubr.msk.bf16.gmra.mxu0 %vm511_vm1, %v497_v39 }
  0x3e   : > { %3622 = vmatprep.mubr.msk.bf16.mxu0 %vm511_vm1, %v498_v40 }
  0x45   : > { %3623 = vmatmul.mubr.msk.bf16.gmra.mxu0 %vm511_vm1, %v499_v45 }
  0x46   : > { %3626 = vmatprep.mubr.msk.bf16.mxu0 %vm511_vm1, %v500_v46 }
  0x4d   : > { %3627 = vmatmul.mubr.msk.bf16.gmra.mxu0 %vm511_vm1, %v501_v51 }
  0x4e   : > { %3630 = vmatprep.mubr.msk.bf16.mxu0 %vm511_vm1, %v502_v52 }
  0x55   : > { %3631 = vmatmul.mubr.msk.bf16.gmra.mxu0 %vm511_vm1, %v503_v55 }
  0xd5   : > { %v3600_v61 = vpop.f32.mrf.mxu0 }
  0xd6   : > { %v4235_v62 = vadd.f32 %v3600_v61, %v4232_v60 }
  0xd7   : > { %v604_v63 = vpop.f32.mrf.mxu0 }
  0xd8   : > { %v749_v0 = vmin.f32 %v4235_v62, 40.0 }
  0xd9   : > { %v3601_v1 = vpop.f32.mrf.mxu0 }
  0xda   : > { %v787_v2 = vmul.f32 1.442695, %v749_v0  ;;  %v4239_v3 = vadd.f32 %v3601_v1, %v4232_v60 }
  0xdb   : > { %v607_v5 = vpop.f32.mrf.mxu0 }
  0xdc   : > { %3768 = vpow2.f32 %v787_v2  ;;  %v750_v8 = vmin.f32 %v4239_v3, 40.0 }
  0xdd   : > { %v3604_v9 = vpop.f32.mrf.mxu0 }
  0xde   : > { %v789_v10 = vmul.f32 1.442695, %v750_v8  ;;  %v4243_v12 = vadd.f32 %v3604_v9, %v4232_v60 }
  0xdf   : > { %v620_v13 = vpop.f32.mrf.mxu0 }
  0xe0   : > { %3770 = vpow2.f32 %v789_v10  ;;  %v753_v14 = vmin.f32 %v4243_v12, 40.0  ;;  %v4247_v15 = vadd.f32 %v4232_v60, %v620_v13 }
  0xe1   : > { %v3605_v16 = vpop.f32.mrf.mxu0 }
  0xe2   : > { %v795_v17 = vmul.f32 1.442695, %v753_v14  ;;  %v751_v18 = vmin.f32 %v4247_v15, 40.0  ;;  %v4251_v19 = vadd.f32 %v3605_v16, %v4232_v60 }
  0xe3   : > { %v623_v20 = vpop.f32.mrf.mxu0 }
  0xe4   : > { %3772 = vpow2.f32 %v795_v17  ;;  %v791_v21 = vmul.f32 1.442695, %v751_v18  ;;  %v754_v22 = vmin.f32 %v4251_v19, 40.0  ;;  %v4255_v23 = vadd.f32 %v4232_v60, %v623_v20 }
  0xe5   : > { %v3608_v24 = vpop.f32.mrf.mxu0 }
  0xe6   : > { %3774 = vpow2.f32 %v791_v21  ;;  %v797_v25 = vmul.f32 1.442695, %v754_v22  ;;  %v752_v26 = vmin.f32 %v4255_v23, 40.0  ;;  %v4259_v27 = vadd.f32 %v3608_v24, %v4232_v60 }
  0xe7   : > { %v636_v28 = vpop.f32.mrf.mxu0 }
  0xe8   : > { %3776 = vpow2.f32 %v797_v25  ;;  %v793_v30 = vmul.f32 1.442695, %v752_v26  ;;  %v757_v31 = vmin.f32 %v4259_v27, 40.0  ;;  %v4266_v32 = vadd.f32 %v4232_v60, %v636_v28 }
  0xe9   : > { %v3769_v33 = vpop.eup %3768  ;;  %v3609_v34 = vpop.f32.mrf.mxu0 }
  0xea   : > { %v857_v36 = vadd.f32 2.0, %v3769_v33  ;;  %3778 = vpow2.f32 %v793_v30  ;;  %v803_v37 = vmul.f32 1.442695, %v757_v31  ;;  %v755_v38 = vmin.f32 %v4266_v32, 40.0 }
  0xeb   : > { %v4274_v39 = vadd.f32 %v3609_v34, %v4232_v60  ;;  %v639_v40 = vpop.f32.mrf.mxu0 }
  0xec   : > { %v893_v41 = vmul.f32 %v3769_v33, %v857_v36  ;;  %3780 = vpow2.f32 %v803_v37  ;;  %v799_v42 = vmul.f32 1.442695, %v755_v38  ;;  %v4277_v43 = vadd.f32 %v4232_v60, %v639_v40 }
  0xed   : > { %v3771_v44 = vpop.eup %3770  ;;  %v758_v45 = vmin.f32 %v4274_v39, 40.0  ;;  %v3612_v46 = vpop.f32.mrf.mxu0 }
  0xee   : > { %v4280_v47 = vadd.f32 2.0, %v893_v41  ;;  %v858_v48 = vadd.f32 2.0, %v3771_v44  ;;  %3782 = vpow2.f32 %v799_v42  ;;  %v756_v49 = vmin.f32 %v4277_v43, 40.0 }
  0xef   : > { %v805_v50 = vmul.f32 1.442695, %v758_v45  ;;  %v4284_v51 = vadd.f32 %v3612_v46, %v4232_v60  ;;  %v652_v52 = vpop.f32.mrf.mxu0 }
  0xf0   : > { %3784 = vrcp.f32 %v4280_v47  ;;  %v894_v53 = vmul.f32 %v3771_v44, %v858_v48  ;;  %v801_v54 = vmul.f32 1.442695, %v756_v49  ;;  %v4288_v55 = vadd.f32 %v4232_v60, %v652_v52 }
  0xf1   : > { %v3773_v56 = vpop.eup %3772  ;;  %3786 = vpow2.f32 %v805_v50  ;;  %v761_v57 = vmin.f32 %v4284_v51, 40.0  ;;  %v3613_v58 = vpop.f32.mrf.mxu0 }
  0xf2   : > { %v4291_v59 = vadd.f32 2.0, %v894_v53  ;;  %v861_v61 = vadd.f32 2.0, %v3773_v56  ;;  %3788 = vpow2.f32 %v801_v54  ;;  %v759_v63 = vmin.f32 %v4288_v55, 40.0 }
  0xf3   : > { %v3775_v0 = vpop.eup %3774  ;;  %v811_v1 = vmul.f32 1.442695, %v761_v57  ;;  %v4295_v2 = vadd.f32 %v3613_v58, %v4232_v60  ;;  %v655_v5 = vpop.f32.mrf.mxu0 }
  0xf4   : > { %3790 = vrcp.f32 %v4291_v59  ;;  %v897_v8 = vmul.f32 %v3773_v56, %v861_v61  ;;  %v859_v9 = vadd.f32 2.0, %v3775_v0  ;;  %v807_v10 = vmul.f32 1.442695, %v759_v63 }
  0xf5   : > { %v3777_v13 = vpop.eup %3776  ;;  %3792 = vpow2.f32 %v811_v1  ;;  %v762_v14 = vmin.f32 %v4295_v2, 40.0  ;;  %v4300_v16 = vadd.f32 %v4232_v60, %v655_v5  ;;  %v3616_v17 = vpop.f32.mrf.mxu0 }
  0xf6   : > { %v4302_v18 = vadd.f32 2.0, %v897_v8  ;;  %v895_v20 = vmul.f32 %v3775_v0, %v859_v9  ;;  %v862_v21 = vadd.f32 2.0, %v3777_v13  ;;  %3794 = vpow2.f32 %v807_v10 }
  0xf7   : > { %v3779_v22 = vpop.eup %3778  ;;  %v813_v24 = vmul.f32 1.442695, %v762_v14  ;;  %v760_v25 = vmin.f32 %v4300_v16, 40.0  ;;  %v4306_v26 = vadd.f32 %v3616_v17, %v4232_v60  ;;  %v668_v28 = vpop.f32.mrf.mxu0 }
  0xf8   : > { %3796 = vrcp.f32 %v4302_v18  ;;  %v4309_v29 = vadd.f32 2.0, %v895_v20  ;;  %v898_v30 = vmul.f32 %v3777_v13, %v862_v21  ;;  %v860_v31 = vadd.f32 2.0, %v3779_v22 }
  0xf9   : > { %v3781_v33 = vpop.eup %3780  ;;  %3798 = vpow2.f32 %v813_v24  ;;  %v809_v34 = vmul.f32 1.442695, %v760_v25  ;;  %v765_v36 = vmin.f32 %v4306_v26, 40.0  ;;  %v4313_v37 = vadd.f32 %v4232_v60, %v668_v28  ;;  %v3617_v38 = vpop.f32.mrf.mxu0 }
  0xfa   : > { %3800 = vrcp.f32 %v4309_v29  ;;  %v4316_v40 = vadd.f32 2.0, %v898_v30  ;;  %v896_v41 = vmul.f32 %v3779_v22, %v860_v31  ;;  %v865_v42 = vadd.f32 2.0, %v3781_v33 }
  0xfb   : > { %5971 = vst [vmem:[#allocation6_spill] sm:$0xff] %v4313_v37  ;;  %v3783_v44 = vpop.eup %3782  ;;  %3802 = vpow2.f32 %v809_v34  ;;  %v819_v45 = vmul.f32 1.442695, %v765_v36  ;;  %v763_v46 = vmin.f32 %v4313_v37, 40.0  ;;  %v4320_v48 = vadd.f32 %v3617_v38, %v4232_v60  ;;  %v671_v49 = vpop.f32.mrf.mxu0 }
  0xfc   : > { %3804 = vrcp.f32 %v4316_v40  ;;  %v4323_v50 = vadd.f32 2.0, %v896_v41  ;;  %v901_v52 = vmul.f32 %v3781_v33, %v865_v42  ;;  %v863_v53 = vadd.f32 2.0, %v3783_v44 }
  0xfd   : > { %v3785_v54 = vpop.eup %3784  ;;  %3806 = vpow2.f32 %v819_v45  ;;  %v815_v56 = vmul.f32 1.442695, %v763_v46  ;;  %v766_v57 = vmin.f32 %v4320_v48, 40.0  ;;  %v4327_v58 = vadd.f32 %v4232_v60, %v671_v49  ;;  %v3620_v61 = vpop.f32.mrf.mxu0 }
  0xfe   : > { %v3787_v63 = vpop.eup %3786  ;;  %v1001_v0 = vmul.f32 %v3785_v54, %v4280_v47  ;;  %3808 = vrcp.f32 %v4323_v50  ;;  %v4331_v1 = vadd.f32 2.0, %v901_v52  ;;  %v899_v5 = vmul.f32 %v3783_v44, %v863_v53 }
  0xff   : > { %5972 = vst [vmem:[#allocation7_spill] sm:$0xff] %v4327_v58  ;;  %v3789_v8 = vpop.eup %3788  ;;  %v866_v9 = vadd.f32 2.0, %v3787_v63  ;;  %3810 = vpow2.f32 %v815_v56  ;;  %v821_v10 = vmul.f32 1.442695, %v766_v57  ;;  %v764_v13 = vmin.f32 %v4327_v58, 40.0  ;;  %v684_v14 = vpop.f32.mrf.mxu0 }
 0x100   : > { %v1037_v17 = vsub.f32 2.0, %v1001_v0  ;;  %3812 = vrcp.f32 %v4331_v1  ;;  %v4335_v20 = vadd.f32 2.0, %v899_v5  ;;  %v864_v21 = vadd.f32 2.0, %v3789_v8 }
 0x101   : > { %v4337_v22 = vpop.eup %3790  ;;  %v902_v47 = vmul.f32 %v3787_v63, %v866_v9  ;;  %3814 = vpow2.f32 %v821_v10  ;;  %v817_v24 = vmul.f32 1.442695, %v764_v13  ;;  %v4340_v25 = vadd.f32 %v3620_v61, %v4232_v60  ;;  %v4342_v28 = vpop.f32.mrf.mxu0 }
 0x102   : > { %v3793_v30 = vpop.eup %3792  ;;  %3816 = vrcp.f32 %v4335_v20  ;;  %v900_v31 = vmul.f32 %v3789_v8, %v864_v21  ;;  %v1073_v34 = vmul.f32 %v3785_v54, %v1037_v17  ;;  %v4347_v36 = vmul.f32 %v4337_v22, %v4291_v59 }
 0x103   : > { %5973 = vst [vmem:[#allocation8_spill] sm:$0xff] %v4340_v25  ;;  %v3795_v33 = vpop.eup %3794  ;;  %v4349_v38 = vadd.f32 2.0, %v902_v47  ;;  %v869_v41 = vadd.f32 2.0, %v3793_v30  ;;  %v4351_v42 = vpop.f32.mrf.mxu0  ;;  %3818 = vpow2.f32 %v817_v24  ;;  %v769_v46 = vmin.f32 %v4340_v25, 40.0 }
 0x104   : > { %v4353_v44 = vadd.f32 2.0, %v900_v31  ;;  %v867_v45 = vadd.f32 2.0, %v3795_v33  ;;  %v4361_v57 = vmul.f32 2.0, %v1073_v34  ;;  %v1038_v9 = vsub.f32 2.0, %v4347_v36 }
 0x105   : > { %v3797_v49 = vpop.eup %3796  ;;  %3820 = vrcp.f32 %v4349_v38  ;;  %v905_v52 = vmul.f32 %v3793_v30, %v869_v41  ;;  %v4357_v53 = vpop.f32.mrf.mxu0  ;;  %v827_v17 = vmul.f32 1.442695, %v769_v46  ;;  %v4376_v36 = vadd.f32 %v4232_v60, %v684_v14 }
 0x106   : > { %v3799_v54 = vpop.eup %3798  ;;  %v1005_v59 = vmul.f32 %v3797_v49, %v4302_v18  ;;  %3822 = vrcp.f32 %v4353_v44  ;;  %v903_v63 = vmul.f32 %v3795_v33, %v867_v45 }
 0x107   : > { %v3801_v56 = vpop.eup %3800  ;;  %v4363_v61 = vadd.f32 2.0, %v905_v52  ;;  %v870_v0 = vadd.f32 2.0, %v3799_v54  ;;  %v4365_v5 = vpop.f32.mrf.mxu0 }
 0x108   : > { %v3803_v8 = vpop.eup %3802  ;;  %v1041_v10 = vsub.f32 2.0, %v1005_v59  ;;  %v1003_v13 = vmul.f32 %v3801_v56, %v4309_v29  ;;  %v4370_v18 = vadd.f32 2.0, %v903_v63 }
 0x109   : > { %v3805_v21 = vpop.eup %3804  ;;  %3824 = vrcp.f32 %v4363_v61  ;;  %v906_v47 = vmul.f32 %v3799_v54, %v870_v0  ;;  %v868_v24 = vadd.f32 2.0, %v3803_v8  ;;  %v4372_v30 = vpop.f32.mrf.mxu0 }
 0x10a   : > { %v3807_v31 = vpop.eup %3806  ;;  %v1077_v33 = vmul.f32 %v3797_v49, %v1041_v10  ;;  %v1039_v34 = vsub.f32 2.0, %v1003_v13  ;;  %v1006_v41 = vmul.f32 %v3805_v21, %v4316_v40  ;;  %3826 = vrcp.f32 %v4370_v18 }
 0x10b   : > { %v3809_v45 = vpop.eup %3808  ;;  %v4379_v29 = vadd.f32 2.0, %v906_v47  ;;  %v904_v46 = vmul.f32 %v3803_v8, %v868_v24  ;;  %v873_v52 = vadd.f32 2.0, %v3807_v31  ;;  %v4381_v59 = vpop.f32.mrf.mxu0 }
 0x10c   : > { %v3811_v54 = vpop.eup %3810  ;;  %v1113_v0 = vmul.f32 2.0, %v1077_v33  ;;  %v1075_v49 = vmul.f32 %v3801_v56, %v1039_v34  ;;  %v1042_v10 = vsub.f32 2.0, %v1006_v41  ;;  %v1004_v40 = vmul.f32 %v3809_v45, %v4323_v50 }
 0x10d   : > { %v3813_v13 = vpop.eup %3812  ;;  %3828 = vrcp.f32 %v4379_v29  ;;  %v4386_v14 = vadd.f32 2.0, %v904_v46  ;;  %v909_v25 = vmul.f32 %v3807_v31, %v873_v52  ;;  %v4388_v47 = vpop.f32.mrf.mxu0  ;;  %v871_v50 = vadd.f32 2.0, %v3811_v54 }
 0x10e   : > { %v3815_v8 = vpop.eup %3814  ;;  %v1111_v24 = vmul.f32 2.0, %v1075_v49  ;;  %v1078_v11 = vmul.f32 %v3805_v21, %v1042_v10  ;;  %v1009_v7 = vmul.f32 %v3813_v13, %v4331_v1  ;;  %3830 = vpow2.f32 %v827_v17 }
 0x10f   : > { %v3817_v63 = vpop.eup %3816  ;;  %v1040_v33 = vsub.f32 2.0, %v1004_v40  ;;  %3832 = vrcp.f32 %v4386_v14  ;;  %v4392_v56 = vadd.f32 2.0, %v909_v25  ;;  %v4394_v34 = vpop.f32.mrf.mxu0  ;;  %v1074_v41 = vmul.f32 %v4337_v22, %v1038_v9 }
 0x110   : > { %v1149_v31 = vsub.f32 1.0, %v1113_v0  ;;  %v1114_v46 = vmul.f32 2.0, %v1078_v11  ;;  %v1045_v52 = vsub.f32 2.0, %v1009_v7  ;;  %v3819_v6 = vpop.eup %3818  ;;  %v1007_v21 = vmul.f32 %v3817_v63, %v4335_v20 }
 0x111   : > { %v1076_v49 = vmul.f32 %v3809_v45, %v1040_v33  ;;  %3834 = vrcp.f32 %v4392_v56  ;;  %v907_v1 = vmul.f32 %v3811_v54, %v871_v50  ;;  %v4399_v17 = vpop.f32.mrf.mxu0  ;;  %v1147_v25 = vsub.f32 1.0, %v1111_v24 }
 0x112   : > { %v3821_v10 = vpop.eup %3820  ;;  %v1150_v40 = vsub.f32 1.0, %v1114_v46  ;;  %v1081_v58 = vmul.f32 %v3813_v13, %v1045_v52  ;;  %v874_v37 = vadd.f32 2.0, %v3815_v8  ;;  %v1043_v9 = vsub.f32 2.0, %v1007_v21 }
 0x113   : > { %v3823_v4 = vpop.eup %3822  ;;  %v1112_v22 = vmul.f32 2.0, %v1076_v49  ;;  %v1010_v7 = vmul.f32 %v3821_v10, %v4349_v38  ;;  %v4402_v11 = vadd.f32 2.0, %v907_v1  ;;  %v4404_v45 = vpop.f32.mrf.mxu0  ;;  %v1185_v49 = vmul.f32 %v1149_v31, %v4243_v12 }
 0x114   : > { %v1186_v20 = vmul.f32 %v1150_v40, %v4251_v19  ;;  %v1117_v54 = vmul.f32 2.0, %v1081_v58  ;;  %v1008_v0 = vmul.f32 %v3823_v4, %v4353_v44  ;;  %v910_v33 = vmul.f32 %v3815_v8, %v874_v37 }
 0x115   : > { %v1148_v24 = vsub.f32 1.0, %v1112_v22  ;;  %v1079_v50 = vmul.f32 %v3817_v63, %v1043_v9  ;;  %v1046_v13 = vsub.f32 2.0, %v1010_v7  ;;  %3836 = vrcp.f32 %v4402_v11  ;;  %v3632_v46 = vpop.f32.mrf.mxu0 }
 0x116   : > { %v3825_v52 = vpop.eup %3824  ;;  %v1183_v38 = vmul.f32 %v1147_v25, %v4247_v15  ;;  %v1044_v21 = vsub.f32 2.0, %v1008_v0  ;;  %v4411_v1 = vadd.f32 2.0, %v910_v33  ;;  %v1153_v8 = vsub.f32 1.0, %v1117_v54 }
 0x117   : > { %v1184_v19 = vmul.f32 %v1148_v24, %v4255_v23  ;;  %v1115_v58 = vmul.f32 2.0, %v1079_v50  ;;  %v1082_v40 = vmul.f32 %v3821_v10, %v1046_v13  ;;  %v1013_v37 = vmul.f32 %v3825_v52, %v4363_v61  ;;  %v4415_v44 = vpop.f32.mrf.mxu0  ;;  %v3827_v63 = vpop.eup %3826 }
 0x118   : > { %v1080_v22 = vmul.f32 %v3823_v4, %v1044_v21  ;;  %3838 = vrcp.f32 %v4411_v1  ;;  %v872_v9 = vadd.f32 2.0, %v3819_v6  ;;  %v4418_v12 = vpack.c.bf16 %v1186_v20, %v1185_v49 }
 0x119   : > { %v4420_v15 = vpack.c.bf16 %v1184_v19, %v1183_v38  ;;  %v1118_v31 = vmul.f32 2.0, %v1082_v40  ;;  %v1049_v25 = vsub.f32 2.0, %v1013_v37  ;;  %v3633_v7 = vpop.f32.mrf.mxu0  ;;  %v1151_v0 = vsub.f32 1.0, %v1115_v58 }
 0x11a   : > { %v3829_v23 = vpop.eup %3828  ;;  %v1116_v10 = vmul.f32 2.0, %v1080_v22  ;;  %v1011_v61 = vmul.f32 %v3827_v63, %v4370_v18  ;;  %v908_v33 = vmul.f32 %v3819_v6, %v872_v9  ;;  %v1110_v50 = vmul.f32 2.0, %v1074_v41 }
 0x11b   : > { %v3831_v24 = vpop.eup %3830  ;;  %v1154_v54 = vsub.f32 1.0, %v1118_v31  ;;  %v1085_v4 = vmul.f32 %v3825_v52, %v1049_v25  ;;  %v1014_v13 = vmul.f32 %v3829_v23, %v4379_v29  ;;  %3704 = vmatprep.mubr.msk.bf16.mxu0 %vm1284_vm3, %v4420_v15  ;;  %v1189_v46 = vmul.f32 %v1153_v8, %v4259_v27 }
 0x11c   : > { %v3833_v20 = vpop.eup %3832  ;;  %v1152_v49 = vsub.f32 1.0, %v1116_v10  ;;  %v1047_v38 = vsub.f32 2.0, %v1011_v61  ;;  %v4427_v21 = vadd.f32 2.0, %v908_v33  ;;  %3705 = vmatmul.mubr.msk.bf16.vlgmr.msra.gmra.mxu0 %vm1284_vm3, %v4418_v12  ;;  %v1187_v19 = vmul.f32 %v1151_v0, %v4266_v32 }
 0x11d   : > { %v1190_v6 = vmul.f32 %v1154_v54, %v4274_v39  ;;  %v1121_v18 = vmul.f32 2.0, %v1085_v4  ;;  %v1050_v41 = vsub.f32 2.0, %v1014_v13  ;;  %v1012_v52 = vmul.f32 %v3833_v20, %v4386_v14 }
 0x11e   : > { %v3835_v29 = vpop.eup %3834  ;;  %v1188_v58 = vmul.f32 %v1152_v49, %v4277_v43  ;;  %v1083_v40 = vmul.f32 %v3827_v63, %v1047_v38  ;;  %3840 = vrcp.f32 %v4427_v21  ;;  %v1146_v27 = vsub.f32 1.0, %v1110_v50 }
 0x11f   : > { %v1086_v37 = vmul.f32 %v3829_v23, %v1050_v41  ;;  %v1048_v8 = vsub.f32 2.0, %v1012_v52  ;;  %v877_v22 = vadd.f32 2.0, %v3831_v24  ;;  %v4436_v9 = vpack.c.bf16 %v1190_v6, %v1189_v46 }
 0x120   : > { %v4438_v31 = vpack.c.bf16 %v1188_v58, %v1187_v19  ;;  %v1119_v39 = vmul.f32 2.0, %v1083_v40  ;;  %v1017_v25 = vmul.f32 %v3835_v29, %v4392_v56  ;;  %v1157_v14 = vsub.f32 1.0, %v1121_v18 }
 0x121   : > { %v1122_v7 = vmul.f32 2.0, %v1086_v37  ;;  %v1084_v10 = vmul.f32 %v3833_v20, %v1048_v8  ;;  %v767_v32 = vmin.f32 %v4376_v36, 40.0  ;;  %v4444_v23 = vadd.f32 %v4342_v28, %v4232_v60 }
 0x122   : > { %v3837_v43 = vpop.eup %3836  ;;  %v1155_v63 = vsub.f32 1.0, %v1119_v39  ;;  %v1053_v0 = vsub.f32 2.0, %v1017_v25  ;;  %v4448_v61 = vadd.f32 %v4232_v60, %v4351_v42  ;;  %3708 = vmatprep.mubr.msk.bf16.mxu0 %vm1284_vm3, %v4438_v31  ;;  %v1182_v4 = vmul.f32 %v1146_v27, %v4239_v3 }
 0x123   : > { %v1158_v56 = vsub.f32 1.0, %v1122_v7  ;;  %v1120_v33 = vmul.f32 2.0, %v1084_v10  ;;  %v1015_v50 = vmul.f32 %v3837_v43, %v4402_v11  ;;  %v823_v54 = vmul.f32 1.442695, %v767_v32 }
 0x124   : > { %v1089_v13 = vmul.f32 %v3835_v29, %v1053_v0  ;;  %v770_v20 = vmin.f32 %v4444_v23, 40.0  ;;  %v768_v28 = vmin.f32 %v4448_v61, 40.0  ;;  %3709 = vmatmul.mubr.msk.bf16.gmra.mxu0 %vm1284_vm3, %v4436_v9  ;;  %v913_v38 = vmul.f32 %v3831_v24, %v877_v22 }
 0x125   : > { %v3839_v42 = vpop.eup %3838  ;;  %v1194_v46 = vmul.f32 %v1158_v56, %v4295_v2  ;;  %v1156_v49 = vsub.f32 1.0, %v1120_v33  ;;  %3842 = vpow2.f32 %v823_v54  ;;  %v1051_v6 = vsub.f32 2.0, %v1015_v50 }
 0x126   : > { %v1018_v11 = vmul.f32 %v3839_v42, %v4411_v1  ;;  %v829_v18 = vmul.f32 1.442695, %v770_v20  ;;  %v825_v41 = vmul.f32 1.442695, %v768_v28  ;;  %v1193_v3 = vmul.f32 %v1157_v14, %v4284_v51 }
 0x127   : > { %v1191_v52 = vmul.f32 %v1155_v63, %v4288_v55  ;;  %v1192_v29 = vmul.f32 %v1156_v49, %v4300_v16  ;;  %v4465_v19 = vadd.f32 %v4357_v53, %v4232_v60  ;;  %v1125_v58 = vmul.f32 2.0, %v1089_v13 }
 0x128   : > { %v1054_v2 = vsub.f32 2.0, %v1018_v11  ;;  %3844 = vpow2.f32 %v829_v18  ;;  %v4469_v24 = vadd.f32 %v4232_v60, %v4365_v5  ;;  %v4471_v1 = vpack.c.bf16 %v1194_v46, %v1193_v3 }
 0x129   : > { %v4473_v40 = vpack.c.bf16 %v1192_v29, %v1191_v52  ;;  %3846 = vpow2.f32 %v825_v41  ;;  %v773_v51 = vmin.f32 %v4465_v19, 40.0  ;;  %v1087_v55 = vmul.f32 %v3837_v43, %v1051_v6 }
 0x12a   : > { %v1090_v16 = vmul.f32 %v3839_v42, %v1054_v2  ;;  %v771_v27 = vmin.f32 %v4469_v24, 40.0  ;;  %v4479_v53 = vadd.f32 %v4372_v30, %v4232_v60  ;;  %v4481_v8 = vadd.f32 2.0, %v913_v38  ;;  %v3517_v38 = vld [vmem:[%s5949_s6] ss:$0 sm:$0xff] }
 0x12b   : > { %v3841_v37 = vpop.eup %3840  ;;  %v835_v5 = vmul.f32 1.442695, %v773_v51  ;;  %v4485_v22 = vadd.f32 %v4232_v60, %v4381_v59  ;;  %v4489_v39 = vadd.f32 %v4388_v47, %v4232_v60  ;;  %3712 = vmatprep.mubr.msk.bf16.mxu0 %vm1284_vm3, %v4473_v40  ;;  %v5974_v59 = vsub.f32 1.0, %v4361_v57  ;;  %1874 = vrot.lane.b32.xlu0 %v3517_v38, %s4076_s9  ;;  %v5976_v51 = vld [vmem:[#allocation6_spill] sm:$0xff] }
 0x12c   : > { %v1126_v25 = vmul.f32 2.0, %v1090_v16  ;;  %v1016_v14 = vmul.f32 %v3841_v37, %v4427_v21  ;;  %v831_v30 = vmul.f32 1.442695, %v771_v27  ;;  %v774_v7 = vmin.f32 %v4479_v53, 40.0  ;;  %3713 = vmatmul.mubr.msk.bf16.gmra.mxu0 %vm1284_vm3, %v4471_v1 }
 0x12d   : > { %v1181_v10 = vmul.f32 %v5974_v59, %v4235_v62  ;;  %3848 = vpow2.f32 %v835_v5  ;;  %v772_v47 = vmin.f32 %v4485_v22, 40.0  ;;  %v777_v32 = vmin.f32 %v4489_v39, 40.0 }
 0x12e   : > { %v1161_v43 = vsub.f32 1.0, %v1125_v58  ;;  %v1123_v63 = vmul.f32 2.0, %v1087_v55  ;;  %v1052_v0 = vsub.f32 2.0, %v1016_v14  ;;  %3850 = vpow2.f32 %v831_v30  ;;  %v5978_v14 = vld [vmem:[#allocation3_spill] sm:$0xff] }
 0x12f   : > { %v837_v21 = vmul.f32 1.442695, %v774_v7  ;;  %v833_v56 = vmul.f32 1.442695, %v772_v47  ;;  %v843_v33 = vmul.f32 1.442695, %v777_v32  ;;  %v4504_v50 = vadd.f32 %v4232_v60, %v4394_v34  ;;  %3013 = vrot.lane.b32.xlu0 %v5978_v14, %s4076_s9 }
 0x130   : > { %v1162_v54 = vsub.f32 1.0, %v1126_v25  ;;  %v1088_v13 = vmul.f32 %v3841_v37, %v1052_v0  ;;  %3852 = vrcp.f32 %v4481_v8  ;;  %v4507_v62 = vpack.c.bf16 %v1182_v4, %v1181_v10  ;;  %v735_v4 = vpop.f32.mrf.mxu0  ;;  %v5979_v32 = vld [vmem:[#allocation4_spill] sm:$0xff] }
 0x131   : > { %3854 = vpow2.f32 %v837_v21  ;;  %v775_v57 = vmin.f32 %v4504_v50, 40.0  ;;  %v4512_v20 = vadd.f32 %v4399_v17, %v4232_v60  ;;  %v4516_v28 = vadd.f32 %v4232_v60, %v4404_v45 }
 0x132   : > { %v3843_v42 = vpop.eup %3842  ;;  %v1197_v34 = vmul.f32 %v1161_v43, %v4306_v26  ;;  %v1159_v46 = vsub.f32 1.0, %v1123_v63  ;;  %v1124_v49 = vmul.f32 2.0, %v1088_v13  ;;  %3856 = vpow2.f32 %v833_v56  ;;  %3636 = vmatprep.mubr.msk.bf16.mxu1 %vm1284_vm3, %v4507_v62  ;;  %v4024_v13 = vld [vmem:[%s4147_s10 + $0x18] sm:$0xff] }
 0x133   : > { %v875_v17 = vadd.f32 2.0, %v3843_v42  ;;  %3858 = vpow2.f32 %v843_v33  ;;  %v839_v6 = vmul.f32 1.442695, %v775_v57  ;;  %v778_v45 = vmin.f32 %v4512_v20, 40.0  ;;  %3637 = vmatmul.mubr.msk.bf16.vlgmr.msra.gmra.mxu1 %vm1284_vm3, %v4420_v15  ;;  %3017 = vrot.lane.b32.xlu0 %v4024_v13, %s4076_s9 }
 0x134   : > { %v1198_v26 = vmul.f32 %v1162_v54, %v4320_v48  ;;  %v1160_v11 = vsub.f32 1.0, %v1124_v49  ;;  %v776_v18 = vmin.f32 %v4516_v28, 40.0  ;;  %v4532_v41 = vadd.f32 %v4232_v60, %v4415_v44  ;;  %3669 = vmatpush3.bf16.msra.mxu1 %v4270_v35  ;;  %3640 = vmatprep.mubr.msk.bf16.mxu1 %vm1284_vm3, %v4418_v12  ;;  %v5975_v48 = vld [vmem:[#allocation2_spill] sm:$0xff]  ;;  %v5977_v44 = vld [vmem:[#allocation7_spill] sm:$0xff] }
 0x135   : > { %v3845_v3 = vpop.eup %3844  ;;  %v911_v52 = vmul.f32 %v3843_v42, %v875_v17  ;;  %3860 = vpow2.f32 %v839_v6  ;;  %v845_v29 = vmul.f32 1.442695, %v778_v45  ;;  %v4538_v58 = vadd.f32 %v4232_v60, %v735_v4  ;;  %3011 = vrot.lane.b32.xlu1 %v5975_v48, %s4076_s9 }
 0x136   : > { %v3847_v2 = vpop.eup %3846  ;;  %v1195_v55 = vmul.f32 %v1159_v46, %v5976_v51  ;;  %v1196_v16 = vmul.f32 %v1160_v11, %v5977_v44  ;;  %v878_v27 = vadd.f32 2.0, %v3845_v3  ;;  %v841_v35 = vmul.f32 1.442695, %v776_v18  ;;  %v4025_v11 = vld [vmem:[%s4147_s10 + $0x28] sm:$0xff] }
 0x137   : > { %v4544_v37 = vadd.f32 2.0, %v911_v52  ;;  %v876_v5 = vadd.f32 2.0, %v3847_v2  ;;  %3862 = vpow2.f32 %v845_v29  ;;  %v779_v25 = vmin.f32 %v4532_v41, 40.0  ;;  %3021 = vrot.lane.b32.xlu0 %v4025_v11, %s4076_s9  ;;  %v4026_v52 = vld [vmem:[%s4147_s10 + $0x30] sm:$0xff] }
 0x138   : > { %v4549_v60 = vpack.c.bf16 %v1198_v26, %v1197_v34  ;;  %v4551_v30 = vpack.c.bf16 %v1196_v16, %v1195_v55  ;;  %v914_v7 = vmul.f32 %v3845_v3, %v878_v27  ;;  %3864 = vpow2.f32 %v841_v35  ;;  %v5980_v34 = vld [vmem:[#allocation5_spill] sm:$0xff] }
 0x139   : > { %3866 = vrcp.f32 %v4544_v37  ;;  %v912_v59 = vmul.f32 %v3847_v2, %v876_v5  ;;  %v847_v10 = vmul.f32 1.442695, %v779_v25  ;;  %v780_v47 = vmin.f32 %v4538_v58, 40.0  ;;  %3015 = vrot.lane.b32.xlu1 %v5979_v32, %s4076_s9  ;;  %v4027_v35 = vld [vmem:[%s4147_s10 + $0x38] sm:$0xff] }
 0x13a   : > { %v3849_v43 = vpop.eup %3848  ;;  %v4557_v63 = vadd.f32 2.0, %v914_v7  ;;  %3716 = vmatprep.mubr.msk.bf16.mxu0 %vm1284_vm3, %v4551_v30 }
 0x13b   : > { %v3851_v0 = vpop.eup %3850  ;;  %v4561_v21 = vadd.f32 2.0, %v912_v59  ;;  %v881_v56 = vadd.f32 2.0, %v3849_v43  ;;  %3868 = vpow2.f32 %v847_v10  ;;  %v849_v33 = vmul.f32 1.442695, %v780_v47  ;;  %3641 = vmatmul.mubr.msk.bf16.gmra.mxu1 %vm1284_vm3, %v4438_v31  ;;  %3717 = vmatmul.mubr.msk.bf16.gmra.mxu0 %vm1284_vm3, %v4549_v60 }
 0x13c   : > { %3870 = vrcp.f32 %v4557_v63  ;;  %v879_v54 = vadd.f32 2.0, %v3851_v0  ;;  %3644 = vmatprep.mubr.msk.bf16.mxu1 %vm1284_vm3, %v4436_v9  ;;  %3025 = vrot.lane.b32.xlu0 %v4027_v35, %s4076_s9 }
 0x13d   : > { %v3853_v57 = vpop.eup %3852  ;;  %3872 = vrcp.f32 %v4561_v21  ;;  %v917_v42 = vmul.f32 %v3849_v43, %v881_v56  ;;  %3019 = vrot.lane.b32.xlu1 %v5980_v34, %s4076_s9 }
 0x13e   : > { %v3855_v46 = vpop.eup %3854  ;;  %v915_v49 = vmul.f32 %v3851_v0, %v879_v54  ;;  %3874 = vpow2.f32 %v849_v33  ;;  %v1021_v48 = vmul.f32 %v3853_v57, %v4481_v8 }
 0x13f   : > { %v3857_v4 = vpop.eup %3856  ;;  %v4575_v38 = vadd.f32 2.0, %v917_v42  ;;  %v882_v17 = vadd.f32 2.0, %v3855_v46 }
 0x140   : > { %v3859_v6 = vpop.eup %3858  ;;  %v4577_v45 = vadd.f32 2.0, %v915_v49  ;;  %v880_v26 = vadd.f32 2.0, %v3857_v4  ;;  %v1057_v59 = vsub.f32 2.0, %v1021_v48 }
 0x141   : > { %3876 = vrcp.f32 %v4575_v38  ;;  %v918_v18 = vmul.f32 %v3855_v46, %v882_v17  ;;  %v885_v3 = vadd.f32 2.0, %v3859_v6  ;;  %3023 = vrot.lane.b32.xlu1 %v4026_v52, %s4076_s9 }
 0x142   : > { %v3861_v29 = vpop.eup %3860  ;;  %3878 = vrcp.f32 %v4577_v45  ;;  %v916_v2 = vmul.f32 %v3857_v4, %v880_v26  ;;  %v1093_v46 = vmul.f32 %v3853_v57, %v1057_v59 }
 0x143   : > { %v4586_v51 = vadd.f32 2.0, %v918_v18  ;;  %v921_v55 = vmul.f32 %v3859_v6, %v885_v3  ;;  %v883_v44 = vadd.f32 2.0, %v3861_v29  ;;  %3645 = vmatmul.mubr.msk.bf16.gmra.mxu1 %vm1284_vm3, %v4473_v40 }
 0x144   : > { %v3863_v16 = vpop.eup %3862  ;;  %v4590_v27 = vadd.f32 2.0, %v916_v2  ;;  %3648 = vmatprep.mubr.msk.bf16.mxu1 %vm1284_vm3, %v4471_v1 }
 0x145   : > { %v3865_v8 = vpop.eup %3864  ;;  %3880 = vrcp.f32 %v4586_v51  ;;  %v4597_v5 = vadd.f32 2.0, %v921_v55  ;;  %v919_v25 = vmul.f32 %v3861_v29, %v883_v44  ;;  %v886_v14 = vadd.f32 2.0, %v3863_v16 }
 0x146   : > { %v3867_v7 = vpop.eup %3866  ;;  %3882 = vrcp.f32 %v4590_v27  ;;  %v884_v10 = vadd.f32 2.0, %v3865_v8  ;;  %v1129_v29 = vmul.f32 2.0, %v1093_v46 }
 0x147   : > { %v1019_v47 = vmul.f32 %v3867_v7, %v4544_v37  ;;  %3884 = vrcp.f32 %v4597_v5  ;;  %v4602_v32 = vadd.f32 2.0, %v919_v25  ;;  %v922_v43 = vmul.f32 %v3863_v16, %v886_v14 }
 0x148   : > { %v3869_v0 = vpop.eup %3868  ;;  %v920_v56 = vmul.f32 %v3865_v8, %v884_v10  ;;  %v1165_v10 = vsub.f32 1.0, %v1129_v29 }
 0x149   : > { %v3871_v33 = vpop.eup %3870  ;;  %v1055_v54 = vsub.f32 2.0, %v1019_v47  ;;  %3886 = vrcp.f32 %v4602_v32  ;;  %v4605_v13 = vadd.f32 2.0, %v922_v43  ;;  %v887_v42 = vadd.f32 2.0, %v3869_v0 }
 0x14a   : > { %v3873_v34 = vpop.eup %3872  ;;  %v1022_v49 = vmul.f32 %v3871_v33, %v4557_v63  ;;  %v4608_v4 = vadd.f32 2.0, %v920_v56 }
 0x14b   : > { %v3875_v37 = vpop.eup %3874  ;;  %v1091_v17 = vmul.f32 %v3867_v7, %v1055_v54  ;;  %v1020_v6 = vmul.f32 %v3873_v34, %v4561_v21  ;;  %3888 = vrcp.f32 %v4605_v13  ;;  %v923_v26 = vmul.f32 %v3869_v0, %v887_v42  ;;  %3649 = vmatmul.mubr.msk.bf16.gmra.mxu1 %vm1284_vm3, %v4551_v30 }
 0x14c   : > { %v1058_v11 = vsub.f32 2.0, %v1022_v49  ;;  %3890 = vrcp.f32 %v4608_v4  ;;  %v888_v18 = vadd.f32 2.0, %v3875_v37  ;;  %3652 = vmatprep.mubr.msk.bf16.mxu1 %vm1284_vm3, %v4549_v60 }
 0x14d   : > { %v1127_v63 = vmul.f32 2.0, %v1091_v17  ;;  %v1056_v57 = vsub.f32 2.0, %v1020_v6  ;;  %v4617_v3 = vadd.f32 2.0, %v923_v26  ;;  %v5981_v26 = vld [vmem:[#allocation8_spill] sm:$0xff] }
 0x14e   : > { %v3877_v52 = vpop.eup %3876  ;;  %v1094_v21 = vmul.f32 %v3871_v33, %v1058_v11  ;;  %v924_v48 = vmul.f32 %v3875_v37, %v888_v18  ;;  %v1201_v11 = vmul.f32 %v1165_v10, %v5981_v26 }
 0x14f   : > { %v3879_v2 = vpop.eup %3878  ;;  %v1092_v55 = vmul.f32 %v3873_v34, %v1056_v57  ;;  %v1025_v44 = vmul.f32 %v3877_v52, %v4575_v38  ;;  %3892 = vrcp.f32 %v4617_v3  ;;  %v1163_v25 = vsub.f32 1.0, %v1127_v63 }
 0x150   : > { %v1130_v16 = vmul.f32 2.0, %v1094_v21  ;;  %v1023_v35 = vmul.f32 %v3879_v2, %v4577_v45  ;;  %v4622_v8 = vadd.f32 2.0, %v924_v48 }
 0x151   : > { %v1128_v14 = vmul.f32 2.0, %v1092_v55  ;;  %v1061_v7 = vsub.f32 2.0, %v1025_v44  ;;  %v1199_v46 = vmul.f32 %v1163_v25, %v4376_v36 }
 0x152   : > { %v3881_v59 = vpop.eup %3880  ;;  %v1166_v47 = vsub.f32 1.0, %v1130_v16  ;;  %v1059_v43 = vsub.f32 2.0, %v1023_v35  ;;  %3894 = vrcp.f32 %v4622_v8 }
 0x153   : > { %v3883_v0 = vpop.eup %3882  ;;  %v1164_v56 = vsub.f32 1.0, %v1128_v14  ;;  %v1097_v33 = vmul.f32 %v3877_v52, %v1061_v7  ;;  %v1026_v38 = vmul.f32 %v3881_v59, %v4586_v51 }
 0x154   : > { %v3885_v54 = vpop.eup %3884  ;;  %v1202_v42 = vmul.f32 %v1166_v47, %v4444_v23  ;;  %v1095_v45 = vmul.f32 %v3879_v2, %v1059_v43  ;;  %v1024_v34 = vmul.f32 %v3883_v0, %v4590_v27 }
 0x155   : > { %v1200_v49 = vmul.f32 %v1164_v56, %v4448_v61  ;;  %v1062_v37 = vsub.f32 2.0, %v1026_v38  ;;  %v1029_v17 = vmul.f32 %v3885_v54, %v4597_v5  ;;  %v1133_v51 = vmul.f32 2.0, %v1097_v33 }
 0x156   : > { %v3887_v6 = vpop.eup %3886  ;;  %v1131_v18 = vmul.f32 2.0, %v1095_v45  ;;  %v1060_v63 = vsub.f32 2.0, %v1024_v34  ;;  %v4634_v21 = vpack.c.bf16 %v1202_v42, %v1201_v11 }
 0x157   : > { %v4632_v57 = vpack.c.bf16 %v1200_v49, %v1199_v46  ;;  %v1098_v52 = vmul.f32 %v3881_v59, %v1062_v37  ;;  %v1065_v23 = vsub.f32 2.0, %v1029_v17  ;;  %v1027_v36 = vmul.f32 %v3887_v6, %v4602_v32 }
 0x158   : > { %v3889_v29 = vpop.eup %3888  ;;  %v1096_v27 = vmul.f32 %v3883_v0, %v1060_v63  ;;  %v1167_v2 = vsub.f32 1.0, %v1131_v18  ;;  %v1169_v32 = vsub.f32 1.0, %v1133_v51 }
 0x159   : > { %v3891_v61 = vpop.eup %3890  ;;  %v1134_v48 = vmul.f32 2.0, %v1098_v52  ;;  %v1030_v5 = vmul.f32 %v3889_v29, %v4605_v13  ;;  %3653 = vmatmul.mubr.msk.bf16.gmra.mxu1 %vm1284_vm3, %v4632_v57  ;;  %3720 = vmatprep.mubr.msk.bf16.mxu0 %vm1284_vm3, %v4632_v57  ;;  %v1063_v44 = vsub.f32 2.0, %v1027_v36  ;;  %v1101_v13 = vmul.f32 %v3885_v54, %v1065_v23 }
 0x15a   : > { %v1132_v55 = vmul.f32 2.0, %v1096_v27  ;;  %v1028_v16 = vmul.f32 %v3891_v61, %v4608_v4  ;;  %3656 = vmatprep.mubr.msk.bf16.mxu1 %vm1284_vm3, %v4634_v21  ;;  %3721 = vmatmul.mubr.msk.bf16.gmra.mxu0 %vm1284_vm3, %v4634_v21  ;;  %v1203_v4 = vmul.f32 %v1167_v2, %v4469_v24  ;;  %v1205_v45 = vmul.f32 %v1169_v32, %v4465_v19 }
 0x15b   : > { %v1170_v35 = vsub.f32 1.0, %v1134_v48  ;;  %v1066_v25 = vsub.f32 2.0, %v1030_v5  ;;  %v1099_v59 = vmul.f32 %v3887_v6, %v1063_v44  ;;  %v1137_v54 = vmul.f32 2.0, %v1101_v13 }
 0x15c   : > { %v3893_v14 = vpop.eup %3892  ;;  %v1168_v7 = vsub.f32 1.0, %v1132_v55  ;;  %v1064_v10 = vsub.f32 2.0, %v1028_v16 }
 0x15d   : > { %v1206_v47 = vmul.f32 %v1170_v35, %v4479_v53  ;;  %v1102_v43 = vmul.f32 %v3889_v29, %v1066_v25  ;;  %v1031_v0 = vmul.f32 %v3893_v14, %v4617_v3  ;;  %v1135_v33 = vmul.f32 2.0, %v1099_v59 }
 0x15e   : > { %v1204_v56 = vmul.f32 %v1168_v7, %v4485_v22  ;;  %v1100_v38 = vmul.f32 %v3891_v61, %v1064_v10  ;;  %v1173_v22 = vsub.f32 1.0, %v1137_v54 }
 0x15f   : > { %v3895_v42 = vpop.eup %3894  ;;  %v1138_v34 = vmul.f32 2.0, %v1102_v43  ;;  %v1067_v46 = vsub.f32 2.0, %v1031_v0  ;;  %v1171_v37 = vsub.f32 1.0, %v1135_v33  ;;  %v1276_v6 = vpack.c.bf16 %v1206_v47, %v1205_v45 }
 0x160   : > { %v1275_v49 = vpack.c.bf16 %v1204_v56, %v1203_v4  ;;  %v1136_v17 = vmul.f32 2.0, %v1100_v38  ;;  %v1032_v53 = vmul.f32 %v3895_v42, %v4622_v8  ;;  %v1209_v27 = vmul.f32 %v1173_v22, %v4489_v39 }
 0x161   : > { %v1174_v26 = vsub.f32 1.0, %v1138_v34  ;;  %v1103_v3 = vmul.f32 %v3893_v14, %v1067_v46  ;;  %v1207_v19 = vmul.f32 %v1171_v37, %v4504_v50  ;;  %v4077_v39 = vmov 0.0|0.0  }
 0x162   : > { %v1172_v11 = vsub.f32 1.0, %v1136_v17  ;;  %v1068_v24 = vsub.f32 2.0, %v1032_v53  ;;  %3657 = vmatmul.mubr.msk.bf16.gmra.mxu1 %vm1284_vm3, %v1275_v49  ;;  %3724 = vmatprep.mubr.msk.bf16.mxu0 %vm1284_vm3, %v1275_v49 }
 0x163   : > { %v1139_v18 = vmul.f32 2.0, %v1103_v3  ;;  %3660 = vmatprep.mubr.msk.bf16.mxu1 %vm1284_vm3, %v1276_v6  ;;  %3725 = vmatmul.mubr.msk.bf16.gmra.mxu0 %vm1284_vm3, %v1276_v6  ;;  %v1210_v51 = vmul.f32 %v1174_v26, %v4512_v20 }
 0x164   : > { %v1208_v63 = vmul.f32 %v1172_v11, %v4516_v28  ;;  %v1104_v8 = vmul.f32 %v3895_v42, %v1068_v24 }
 0x165   : > { %v1175_v23 = vsub.f32 1.0, %v1139_v18  ;;  %v1278_v61 = vpack.c.bf16 %v1210_v51, %v1209_v27  ;;  %v1866_v18 = vlaneseq }
 0x166   : > { %v1277_v52 = vpack.c.bf16 %v1208_v63, %v1207_v19  ;;  %v1140_v29 = vmul.f32 2.0, %v1104_v8 }
 0x167   : > { %v1211_v48 = vmul.f32 %v1175_v23, %v4532_v41 }
 0x168   : > { %v1176_v36 = vsub.f32 1.0, %v1140_v29  ;;  %3728 = vmatprep.mubr.msk.bf16.mxu0 %vm1284_vm3, %v1277_v52  ;;  %v4779_v29 = vshrl.u32 %v1866_v18, 7 }
 0x16a   : > { %v1212_v5 = vmul.f32 %v1176_v36, %v4538_v58  ;;  %3661 = vmatmul.mubr.msk.bf16.gmra.mxu1 %vm1284_vm3, %v1277_v52  ;;  %vm1943_vm4 = vcmp.lt.s32.totalorder %v4779_v29, 1  ;;  %vm1909_vm5 = vcmp.gt.s32.totalorder %v4779_v29, 0  ;;  %vm2334_vm6 = vcmp.lt.s32.totalorder %v4779_v29, 7 }
 0x16b   : > { %3664 = vmatprep.mubr.msk.bf16.mxu1 %vm1284_vm3, %v1278_v61  ;;  %3729 = vmatmul.mubr.msk.bf16.gmra.mxu0 %vm1284_vm3, %v1278_v61 }
 0x16c   : > { %v1279_v50 = vpack.c.bf16 %v1212_v5, %v1211_v48 }
 0x16e   : > { %3732 = vmatprep.mubr.msk.bf16.mxu0 %vm1284_vm3, %v1279_v50 }
 0x172   : > { %3665 = vmatmul.mubr.msk.bf16.gmra.mxu1 %vm1284_vm3, %v1279_v50 }
 0x173   : > { %3670 = vmatprep.mubr.bf16.mxu1 %v4077_v39  ;;  %3733 = vmatmul.mubr.bf16.gmra.mxu0 %v4077_v39 }
 0x17a   : > { %3671 = vmatmul.mubr.msk.bf16.vlgmr.msra.gmra.mxu1 %vm1284_vm3, %v4507_v62 }
 0x17b   : > { %3674 = vmatprep.mubr.msk.bf16.mxu1 %vm1284_vm3, %v4420_v15 }
 0x182   : > { %3675 = vmatmul.mubr.msk.bf16.gmra.mxu1 %vm1284_vm3, %v4418_v12 }
 0x183   : > { %3678 = vmatprep.mubr.msk.bf16.mxu1 %vm1284_vm3, %v4438_v31 }
 0x18a   : > { %3679 = vmatmul.mubr.msk.bf16.gmra.mxu1 %vm1284_vm3, %v4436_v9 }
 0x18b   : > { %3682 = vmatprep.mubr.msk.bf16.mxu1 %vm1284_vm3, %v4473_v40 }
 0x192   : > { %3683 = vmatmul.mubr.msk.bf16.gmra.mxu1 %vm1284_vm3, %v4471_v1 }
 0x193   : > { %3686 = vmatprep.mubr.msk.bf16.mxu1 %vm1284_vm3, %v4551_v30 }
 0x19a   : > { %3687 = vmatmul.mubr.msk.bf16.gmra.mxu1 %vm1284_vm3, %v4549_v60 }
 0x19b   : > { %3690 = vmatprep.mubr.msk.bf16.mxu1 %vm1284_vm3, %v4632_v57 }
 0x1a2   : > { %3691 = vmatmul.mubr.msk.bf16.gmra.mxu1 %vm1284_vm3, %v4634_v21 }
 0x1a3   : > { %3694 = vmatprep.mubr.msk.bf16.mxu1 %vm1284_vm3, %v1275_v49 }
 0x1aa   : > { %3695 = vmatmul.mubr.msk.bf16.gmra.mxu1 %vm1284_vm3, %v1276_v6 }
 0x1ab   : > { %3698 = vmatprep.mubr.msk.bf16.mxu1 %vm1284_vm3, %v1277_v52 }
 0x1b2   : > { %3699 = vmatmul.mubr.msk.bf16.gmra.mxu1 %vm1284_vm3, %v1278_v61 }
 0x1dc   : > { %v3706_v62 = vpop.f32.mrf.mxu0 }
 0x1de   : > { %v1707_v41 = vpop.f32.mrf.mxu0 }
 0x1e0   : > { %v3707_v30 = vpop.f32.mrf.mxu0 }
 0x1e2   : > { %v1710_v2 = vpop.f32.mrf.mxu0 }
 0x1e4   : > { %v4715_v16 = vpop.f32.mrf.mxu0 }
 0x1e6   : > { %v4719_v35 = vpop.f32.mrf.mxu0 }
 0x1e8   : > { %v4723_v25 = vpop.f32.mrf.mxu0 }
 0x1ea   : > { %v4727_v7 = vpop.f32.mrf.mxu0 }
 0x1ec   : > { %v4733_v47 = vpop.f32.mrf.mxu0 }
 0x1ee   : > { %v4737_v0 = vpop.f32.mrf.mxu0 }
 0x1f0   : > { %v4743_v33 = vpop.f32.mrf.mxu0 }
 0x1f2   : > { %v4749_v45 = vpop.f32.mrf.mxu0 }
 0x1f3   : > { %v3638_v12 = vpop.f32.mrf.mxu1 }
 0x1f5   : > { %v1371_v15 = vpop.f32.mrf.mxu1 }
 0x1f7   : > { %v3639_v9 = vpop.f32.mrf.mxu1 }
 0x1f9   : > { %v1374_v31 = vpop.f32.mrf.mxu1 }
 0x1fb   : > { %v4695_v1 = vpop.f32.mrf.mxu1  ;;  %v4755_v46 = vpop.f32.mrf.mxu0 }
 0x1fd   : > { %v4697_v40 = vpop.f32.mrf.mxu1  ;;  %v4761_v17 = vpop.f32.mrf.mxu0 }
 0x1ff   : > { %v4699_v20 = vpop.f32.mrf.mxu1  ;;  %v4767_v26 = vpop.f32.mrf.mxu0 }
 0x201   : > { %v4701_v28 = vpop.f32.mrf.mxu1  ;;  %v4773_v24 = vpop.f32.mrf.mxu0 }
 0x203   : > { %v4703_v58 = vpop.f32.mrf.mxu1 }
 0x205   : > { %v4705_v60 = vpop.f32.mrf.mxu1 }
 0x207   : > { %v4707_v57 = vpop.f32.mrf.mxu1 }
 0x209   : > { %v4709_v21 = vpop.f32.mrf.mxu1 }
 0x20b   : > { %v4711_v55 = vpop.f32.mrf.mxu1 }
 0x20d   : > { %v4713_v44 = vpop.f32.mrf.mxu1 }
 0x20f   : > { %v4717_v32 = vpop.f32.mrf.mxu1 }
 0x211   : > { %v4721_v13 = vpop.f32.mrf.mxu1 }
 0x219   : > { %v4725_v14 = vpop.f32.mrf.mxu1 }
 0x21a   : > { %v4777_v52 = vpop.f32.mrf.mxu0 }
 0x21b   : > { %v4729_v59 = vpop.f32.mrf.mxu1 }
 0x21c   : > { %v4787_v50 = vpop.f32.mrf.mxu0 }
 0x21d   : > { %v4731_v10 = vpop.f32.mrf.mxu1 }
 0x21f   : > { %v4735_v43 = vpop.f32.mrf.mxu1 }
 0x222   : > { %v4739_v4 = vpop.f32.mrf.mxu1 }
 0x224   : > { %v4741_v56 = vpop.f32.mrf.mxu1 }
 0x226   : > { %v4745_v38 = vpop.f32.mrf.mxu1 }
 0x228   : > { %v4747_v42 = vpop.f32.mrf.mxu1 }
 0x22a   : > { %v4751_v54 = vpop.f32.mrf.mxu1 }
 0x22c   : > { %v4753_v34 = vpop.f32.mrf.mxu1 }
 0x22e   : > { %v4757_v49 = vpop.f32.mrf.mxu1 }
 0x230   : > { %v4759_v37 = vpop.f32.mrf.mxu1 }
 0x232   : > { %v4763_v53 = vpop.f32.mrf.mxu1 }
 0x234   : > { %v4765_v6 = vpop.f32.mrf.mxu1 }
 0x236   : > { %v4769_v3 = vpop.f32.mrf.mxu1 }
 0x238   : > { %v4771_v11 = vpop.f32.mrf.mxu1 }
 0x23a   : > { %v3672_v22 = vpop.f32.mrf.mxu1 }
 0x23b   : > { %v1547_v19 = vadd.f32 %v3672_v22, %v3638_v12 }
 0x23c   : > { %v1538_v63 = vpop.f32.mrf.mxu1 }
 0x23d   : > { %v4775_v8 = vadd.f32 %v3706_v62, %v1547_v19  ;;  %v1539_v51 = vadd.f32 %v1538_v63, %v1371_v15 }
 0x23e   : > { %v3673_v23 = vpop.f32.mrf.mxu1 }
 0x23f   : > { %v1550_v27 = vadd.f32 %v3673_v23, %v3639_v9  ;;  %2210 = vrot.lane.b32.xlu1 %v4775_v8, %s4078_s11  ;;  %v4783_v61 = vadd.f32 %v1707_v41, %v1539_v51  ;;  %v1912_v12 = vrot.slane %v4775_v8, 7 }
 0x240   : > { %v1541_v36 = vpop.f32.mrf.mxu1 }
 0x241   : > { %v4785_v48 = vadd.f32 %v3707_v30, %v1550_v27  ;;  %v1542_v5 = vadd.f32 %v1541_v36, %v1374_v31  ;;  %v4802_v30 = vpop.f32.mrf.mxu0  ;;  %v1911_v51 = vrot.slane %v4783_v61, 7 }
 0x242   : > { %v3676_v39 = vpop.f32.mrf.mxu1 }
 0x243   : > { %v1928_v15 = vrot.slane %v4785_v48, 7  ;;  %v4792_v9 = vadd.f32 %v1710_v2, %v1542_v5  ;;  %2212 = vrot.lane.b32.xlu0 %v4785_v48, %s4078_s11  ;;  %2206 = vrot.lane.b32.xlu1 %v4783_v61, %s4078_s11  ;;  %v1563_v62 = vadd.f32 %v3676_v39, %v4695_v1  ;;  %v4817_v27 = vpop.f32.mrf.mxu0 }
 0x244   : > { %v1554_v31 = vpop.f32.mrf.mxu1 }
 0x245   : > { %v1961_v41 = vsel %vm1943_vm4, %v1928_v15, %v1912_v12  ;;  %v1945_v18 = vsel %vm1943_vm4, %v1912_v12, %v1928_v15  ;;  %v1927_v19 = vrot.slane %v4792_v9, 7  ;;  %v4815_v23 = vadd.f32 %v4715_v16, %v1563_v62  ;;  %v4828_v15 = vpop.f32.mrf.mxu0 }
 0x246   : > { %v3677_v22 = vpop.f32.mrf.mxu1  ;;  %v1982_v2 = vsel %vm1909_vm5, %v1961_v41, 0.0  ;;  %v1555_v12 = vadd.f32 %v1554_v31, %v4697_v40 }
 0x247   : > { %v1566_v63 = vadd.f32 %v3677_v22, %v4699_v20  ;;  %2208 = vrot.lane.b32.xlu0 %v4792_v9, %s4078_s11  ;;  %2048 = vrot.lane.b32.xlu1 %v1982_v2, %s4076_s9  ;;  %v1960_v20 = vsel %vm1943_vm4, %v1927_v19, %v1911_v51  ;;  %v1914_v40 = vrot.slane %v4815_v23, 7 }
 0x248   : > { %v1557_v1 = vpop.f32.mrf.mxu1  ;;  %v1980_v62 = vsel %vm1909_vm5, %v1960_v20, 0.0  ;;  %v4840_v31 = vadd.f32 %v4719_v35, %v1555_v12 }
 0x249   : > { %v4820_v5 = vadd.f32 %v4723_v25, %v1566_v63  ;;  %v1944_v25 = vsel %vm1943_vm4, %v1911_v51, %v1927_v19  ;;  %v1558_v22 = vadd.f32 %v1557_v1, %v4701_v28 }
 0x24a   : > { %v3680_v36 = vpop.f32.mrf.mxu1  ;;  %5982 = vst [vmem:[#allocation2_spill] sm:$0xff] %v4840_v31 }
 0x24b   : > { %2050 = vrot.lane.b32.xlu0 %v1945_v18, %s4076_s9  ;;  %2218 = vrot.lane.b32.xlu1 %v4815_v23, %s4078_s11  ;;  %v1930_v41 = vrot.slane %v4820_v5, 7  ;;  %v4842_v18 = vpop.f32.mrf.mxu0  ;;  %v4845_v20 = vadd.f32 %v4727_v7, %v1558_v22  ;;  %v1579_v35 = vadd.f32 %v3680_v36, %v4703_v58 }
 0x24c   : > { %v1570_v39 = vpop.f32.mrf.mxu1 }
 0x24d   : > { %5983 = vst [vmem:[#allocation6_spill] sm:$0xff] %v4845_v20  ;;  %v1963_v28 = vsel %vm1943_vm4, %v1930_v41, %v1914_v40  ;;  %v4857_v51 = vpop.f32.mrf.mxu0  ;;  %v4868_v22 = vadd.f32 %v4733_v47, %v1579_v35 }
 0x24e   : > { %v3681_v16 = vpop.f32.mrf.mxu1  ;;  %v1986_v7 = vsel %vm1909_vm5, %v1963_v28, 0.0  ;;  %v1947_v28 = vsel %vm1943_vm4, %v1914_v40, %v1930_v41 }
 0x24f   : > { %2044 = vrot.lane.b32.xlu0 %v1980_v62, %s4076_s9  ;;  %2046 = vrot.lane.b32.xlu1 %v1944_v25, %s4076_s9  ;;  %v1582_v1 = vadd.f32 %v3681_v16, %v4707_v57  ;;  %v1929_v62 = vrot.slane %v4845_v20, 7  ;;  %v1913_v57 = vrot.slane %v4840_v31, 7  ;;  %v4874_v36 = vpop.f32.mrf.mxu0 }
 0x250   : > { %v1573_v2 = vpop.f32.mrf.mxu1 }
 0x251   : > { %v4871_v58 = vadd.f32 %v4743_v33, %v1582_v1  ;;  %v1962_v47 = vsel %vm1943_vm4, %v1929_v62, %v1913_v57  ;;  %v1571_v33 = vadd.f32 %v1570_v39, %v4705_v60  ;;  %v1946_v40 = vsel %vm1943_vm4, %v1913_v57, %v1929_v62 }
 0x252   : > { %v3684_v63 = vpop.f32.mrf.mxu1 }
 0x253   : > { %2220 = vrot.lane.b32.xlu0 %v4820_v5, %s4078_s11  ;;  %2214 = vrot.lane.b32.xlu1 %v4840_v31, %s4078_s11  ;;  %v1932_v1 = vrot.slane %v4871_v58, 7  ;;  %v4887_v31 = vpop.f32.mrf.mxu0 }
 0x254   : > { %v4853_v19 = vpop.f32.mrf.mxu1 }
 0x256   : > { %v3685_v12 = vpop.f32.mrf.mxu1 }
 0x257   : > { %2216 = vrot.lane.b32.xlu0 %v4845_v20, %s4078_s11  ;;  %2056 = vrot.lane.b32.xlu1 %v1986_v7, %s4076_s9  ;;  %v1574_v20 = vadd.f32 %v1573_v2, %v4709_v21  ;;  %v4902_v21 = vadd.f32 %v4737_v0, %v1571_v33 }
 0x258   : > { %v4865_v25 = vpop.f32.mrf.mxu1 }
 0x259   : > { %v4905_v2 = vadd.f32 %v4749_v45, %v1574_v20 }
 0x25a   : > { %v3688_v16 = vpop.f32.mrf.mxu1 }
 0x25b   : > { %v1611_v7 = vadd.f32 %v3688_v16, %v4725_v14  ;;  %2058 = vrot.lane.b32.xlu0 %v1947_v28, %s4076_s9  ;;  %2226 = vrot.lane.b32.xlu1 %v4868_v22, %s4078_s11  ;;  %v1984_v16 = vsel %vm1909_vm5, %v1962_v47, 0.0  ;;  %v1916_v28 = vrot.slane %v4868_v22, 7 }
 0x25c   : > { %v1602_v35 = vpop.f32.mrf.mxu1 }
 0x25d   : > { %v1603_v41 = vadd.f32 %v1602_v35, %v4729_v59  ;;  %v4896_v60 = vadd.f32 %v4777_v52, %v1611_v7  ;;  %v1965_v52 = vsel %vm1943_vm4, %v1932_v1, %v1916_v28  ;;  %v1598_v35 = vadd.f32 %v3685_v12, %v4717_v32 }
 0x25e   : > { %v3689_v14 = vpop.f32.mrf.mxu1  ;;  %v1990_v20 = vsel %vm1909_vm5, %v1965_v52, 0.0 }
 0x25f   : > { %v1614_v39 = vadd.f32 %v3689_v14, %v4731_v10  ;;  %2054 = vrot.lane.b32.xlu0 %v1946_v40, %s4076_s9  ;;  %2052 = vrot.lane.b32.xlu1 %v1984_v16, %s4076_s9  ;;  %v4913_v10 = vpop.f32.mrf.mxu0  ;;  %v4916_v7 = vadd.f32 %v4787_v50, %v1603_v41  ;;  %v1920_v0 = vrot.slane %v4896_v60, 7  ;;  %v1931_v41 = vrot.slane %v4905_v2, 7 }
 0x260   : > { %v1605_v59 = vpop.f32.mrf.mxu1 }
 0x261   : > { %v4908_v62 = vadd.f32 %v4802_v30, %v1614_v39  ;;  %v1606_v57 = vadd.f32 %v1605_v59, %v4735_v43  ;;  %v1595_v43 = vadd.f32 %v3684_v63, %v4711_v55  ;;  %v3731_v14 = vpop.f32.mrf.mxu0  ;;  %v1919_v63 = vrot.slane %v4916_v7, 7 }
 0x262   : > { %v3692_v47 = vpop.f32.mrf.mxu1 }
 0x263   : > { %v1936_v33 = vrot.slane %v4908_v62, 7  ;;  %v4921_v45 = vadd.f32 %v4817_v27, %v1606_v57  ;;  %v1627_v30 = vadd.f32 %v3692_v47, %v4739_v4  ;;  %2228 = vrot.lane.b32.xlu0 %v4871_v58, %s4078_s11  ;;  %2222 = vrot.lane.b32.xlu1 %v4902_v21, %s4078_s11  ;;  %v1915_v57 = vrot.slane %v4902_v21, 7 }
 0x264   : > { %v1618_v50 = vpop.f32.mrf.mxu1 }
 0x265   : > { %v1969_v27 = vsel %vm1943_vm4, %v1936_v33, %v1920_v0  ;;  %v4937_v4 = vsel %vm1943_vm4, %v1920_v0, %v1936_v33  ;;  %v1619_v40 = vadd.f32 %v1618_v50, %v4741_v56  ;;  %v1935_v32 = vrot.slane %v4921_v45, 7  ;;  %v1806_v33 = vpop.f32.mrf.mxu0 }
 0x266   : > { %v3693_v16 = vpop.f32.mrf.mxu1  ;;  %v4942_v55 = vsel %vm1909_vm5, %v1969_v27, 0.0  ;;  %v4947_v12 = vadd.f32 %v4828_v15, %v1627_v30  ;;  %v4954_v56 = vadd.f32 %v4755_v46, %v1595_v43  ;;  %v1949_v50 = vsel %vm1943_vm4, %v1916_v28, %v1932_v1 }
 0x267   : > { %v1630_v39 = vadd.f32 %v3693_v16, %v4745_v38  ;;  %2224 = vrot.lane.b32.xlu0 %v4905_v2, %s4078_s11  ;;  %2064 = vrot.lane.b32.xlu1 %v1990_v20, %s4076_s9  ;;  %v4959_v52 = vsel %vm1943_vm4, %v1919_v63, %v1935_v32  ;;  %v1968_v15 = vsel %vm1943_vm4, %v1935_v32, %v1919_v63 }
 0x268   : > { %5984 = vst [vmem:[#allocation7_spill] sm:$0xff] %v4947_v12  ;;  %v1621_v59 = vpop.f32.mrf.mxu1  ;;  %v4964_v38 = vadd.f32 %v4767_v26, %v1598_v35  ;;  %v4972_v46 = vsel %vm1909_vm5, %v1968_v15, 0.0  ;;  %v4975_v30 = vadd.f32 %v4842_v18, %v1619_v40  ;;  %v1964_v26 = vsel %vm1943_vm4, %v1931_v41, %v1915_v57  ;;  %v3734_v40 = vpop.f32.mrf.mxu0 }
 0x269   : > { %v4967_v47 = vadd.f32 %v4857_v51, %v1630_v39  ;;  %v1622_v0 = vadd.f32 %v1621_v59, %v4747_v42  ;;  %v1922_v51 = vrot.slane %v4947_v12, 7  ;;  %v1587_v18 = vadd.f32 %v4853_v19, %v4713_v44 }
 0x26a   : > { %5986 = vst [vmem:[#allocation4_spill] sm:$0xff] %v4975_v30  ;;  %v3696_v43 = vpop.f32.mrf.mxu1  ;;  %v1590_v1 = vadd.f32 %v4865_v25, %v4721_v13  ;;  %v1948_v27 = vsel %vm1943_vm4, %v1915_v57, %v1931_v41  ;;  %v1921_v25 = vrot.slane %v4975_v30, 7  ;;  %v1819_v57 = vpop.f32.mrf.mxu0 }
 0x26b   : > { %5985 = vst [vmem:[#allocation3_spill] sm:$0xff] %v4967_v47  ;;  %v1938_v20 = vrot.slane %v4967_v47, 7  ;;  %v4984_v42 = vadd.f32 %v4874_v36, %v1622_v0  ;;  %v1643_v35 = vadd.f32 %v3696_v43, %v4751_v54  ;;  %2066 = vrot.lane.b32.xlu0 %v1949_v50, %s4076_s9  ;;  %2234 = vrot.lane.b32.xlu1 %v4954_v56, %s4078_s11  ;;  %v1934_v36 = vrot.slane %v4964_v38, 7 }
 0x26c   : > { %v1634_v28 = vpop.f32.mrf.mxu1  ;;  %v1988_v54 = vsel %vm1909_vm5, %v1964_v26, 0.0  ;;  %v5036_v26 = vadd.f32 %v4773_v24, %v1590_v1 }
 0x26d   : > { %5987 = vst [vmem:[#allocation5_spill] sm:$0xff] %v4984_v42  ;;  %v1971_v16 = vsel %vm1943_vm4, %v1938_v20, %v1922_v51  ;;  %v5003_v63 = vsel %vm1943_vm4, %v1922_v51, %v1938_v20  ;;  %v1635_v44 = vadd.f32 %v1634_v28, %v4753_v34  ;;  %v1937_v41 = vrot.slane %v4984_v42, 7 }
 0x26e   : > { %v3697_v13 = vpop.f32.mrf.mxu1  ;;  %v5008_v19 = vsel %vm1909_vm5, %v1971_v16, 0.0  ;;  %v5013_v32 = vadd.f32 %v4887_v31, %v1643_v35  ;;  %v1918_v34 = vrot.slane %v4954_v56, 7  ;;  %v5026_v31 = vadd.f32 %v4761_v17, %v1587_v18 }
 0x26f   : > { %v1646_v39 = vadd.f32 %v3697_v13, %v4757_v49  ;;  %2062 = vrot.lane.b32.xlu0 %v1948_v27, %s4076_s9  ;;  %2060 = vrot.lane.b32.xlu1 %v1988_v54, %s4076_s9  ;;  %v5021_v15 = vsel %vm1943_vm4, %v1921_v25, %v1937_v41  ;;  %v1970_v0 = vsel %vm1943_vm4, %v1937_v41, %v1921_v25  ;;  %v1933_v25 = vrot.slane %v5036_v26, 7 }
 0x270   : > { %5988 = vst [vmem:[#allocation8_spill] sm:$0xff] %v5013_v32  ;;  %v1637_v59 = vpop.f32.mrf.mxu1  ;;  %v5033_v50 = vsel %vm1909_vm5, %v1970_v0, 0.0  ;;  %v5039_v51 = vadd.f32 %v4913_v10, %v1635_v44  ;;  %v1967_v35 = vsel %vm1943_vm4, %v1934_v36, %v1918_v34  ;;  %v1924_v17 = vrot.slane %v5013_v32, 7  ;;  %v3735_v10 = vpop.f32.mrf.mxu0 }
 0x271   : > { %v5028_v43 = vadd.f32 %v3731_v14, %v1646_v39  ;;  %v1638_v49 = vadd.f32 %v1637_v59, %v4759_v37  ;;  %v1917_v59 = vrot.slane %v5026_v31, 7 }
 0x272   : > { %v3700_v20 = vpop.f32.mrf.mxu1  ;;  %v1923_v16 = vrot.slane %v5039_v51, 7  ;;  %v1822_v39 = vpop.f32.mrf.mxu0 }
 0x273   : > { %5989 = vst [vmem:[#allocation9_spill] sm:$0xff] %v5028_v43  ;;  %v1940_v14 = vrot.slane %v5028_v43, 7  ;;  %v5045_v18 = vadd.f32 %v1806_v33, %v1638_v49  ;;  %v1659_v37 = vadd.f32 %v3700_v20, %v4763_v53  ;;  %2236 = vrot.lane.b32.xlu0 %v4964_v38, %s4078_s11  ;;  %2230 = vrot.lane.b32.xlu1 %v5026_v31, %s4078_s11  ;;  %v1994_v53 = vsel %vm1909_vm5, %v1967_v35, 0.0 }
 0x274   : > { %v1650_v24 = vpop.f32.mrf.mxu1 }
 0x275   : > { %v1651_v1 = vadd.f32 %v1650_v24, %v4765_v6  ;;  %v1973_v28 = vsel %vm1943_vm4, %v1940_v14, %v1924_v17  ;;  %v5057_v27 = vsel %vm1943_vm4, %v1924_v17, %v1940_v14  ;;  %v1939_v44 = vrot.slane %v5045_v18, 7 }
 0x276   : > { %v3701_v33 = vpop.f32.mrf.mxu1  ;;  %v2006_v54 = vsel %vm1909_vm5, %v1973_v28, 0.0  ;;  %v5065_v13 = vadd.f32 %v3734_v40, %v1659_v37  ;;  %v1951_v17 = vsel %vm1943_vm4, %v1918_v34, %v1934_v36 }
 0x277   : > { %v1662_v6 = vadd.f32 %v3701_v33, %v4769_v3  ;;  %2232 = vrot.lane.b32.xlu0 %v5036_v26, %s4078_s11  ;;  %2072 = vrot.lane.b32.xlu1 %v1994_v53, %s4076_s9  ;;  %v1956_v0 = vsel %vm1943_vm4, %v1923_v16, %v1939_v44  ;;  %v1972_v40 = vsel %vm1943_vm4, %v1939_v44, %v1923_v16 }
 0x278   : > { %v1653_v41 = vpop.f32.mrf.mxu1  ;;  %v5077_v49 = vadd.f32 %v1819_v57, %v1651_v1  ;;  %v2004_v35 = vsel %vm1909_vm5, %v1972_v40, 0.0  ;;  %v1926_v14 = vrot.slane %v5065_v13, 7  ;;  %v1950_v1 = vsel %vm1943_vm4, %v1917_v59, %v1933_v25 }
 0x279   : > { %v1654_v3 = vadd.f32 %v1653_v41, %v4771_v11  ;;  %v5080_v20 = vadd.f32 %v3735_v10, %v1662_v6  ;;  %v1966_v11 = vsel %vm1943_vm4, %v1933_v25, %v1917_v59 }
 0x27a   : > { %v1925_v57 = vrot.slane %v5077_v49, 7  ;;  %v1992_v28 = vsel %vm1909_vm5, %v1966_v11, 0.0 }
 0x27b   : > { %v1942_v37 = vrot.slane %v5080_v20, 7  ;;  %v5088_v24 = vadd.f32 %v1822_v39, %v1654_v3  ;;  %2074 = vrot.lane.b32.xlu0 %v1951_v17, %s4076_s9  ;;  %2242 = vrot.lane.b32.xlu1 %v4896_v60, %s4078_s11 }
 0x27d   : > { %v1941_v10 = vrot.slane %v5088_v24, 7  ;;  %v1975_v36 = vsel %vm1943_vm4, %v1942_v37, %v1926_v14  ;;  %v1959_v34 = vsel %vm1943_vm4, %v1926_v14, %v1942_v37 }
 0x27e   : > { %v2010_v33 = vsel %vm1909_vm5, %v1975_v36, 0.0 }
 0x27f   : > { %2070 = vrot.lane.b32.xlu0 %v1950_v1, %s4076_s9  ;;  %2068 = vrot.lane.b32.xlu1 %v1992_v28, %s4076_s9  ;;  %v1974_v53 = vsel %vm1943_vm4, %v1941_v10, %v1925_v57  ;;  %v1958_v16 = vsel %vm1943_vm4, %v1925_v57, %v1941_v10 }
 0x280   : > { %v2008_v44 = vsel %vm1909_vm5, %v1974_v53, 0.0 }
 0x283   : > { %2244 = vrot.lane.b32.xlu0 %v4908_v62, %s4078_s11  ;;  %2238 = vrot.lane.b32.xlu1 %v4916_v7, %s4078_s11 }
 0x287   : > { %2240 = vrot.lane.b32.xlu0 %v4921_v45, %s4078_s11  ;;  %2080 = vrot.lane.b32.xlu1 %v4942_v55, %s4076_s9  ;;  %v5141_v55 = vpop.permute.xlu1 %3011 }
 0x28b   : > { %2082 = vrot.lane.b32.xlu0 %v4937_v4, %s4076_s9  ;;  %2250 = vrot.lane.b32.xlu1 %v4947_v12, %s4078_s11  ;;  %v5139_v4 = vpop.permute.xlu0 %1874 }
 0x28f   : > { %2078 = vrot.lane.b32.xlu0 %v4959_v52, %s4076_s9  ;;  %2076 = vrot.lane.b32.xlu1 %v4972_v46, %s4076_s9  ;;  %v5147_v52 = vpop.permute.xlu0 %3013  ;;  %v5153_v46 = vpop.permute.xlu1 %3015 }
 0x293   : > { %2252 = vrot.lane.b32.xlu0 %v4967_v47, %s4078_s11  ;;  %2246 = vrot.lane.b32.xlu1 %v4975_v30, %s4078_s11 }
 0x297   : > { %2248 = vrot.lane.b32.xlu0 %v4984_v42, %s4078_s11  ;;  %2088 = vrot.lane.b32.xlu1 %v5008_v19, %s4076_s9  ;;  %v5161_v19 = vpop.permute.xlu1 %3019 }
 0x298   : > { %5990 = vst [vmem:[#allocation10_spill] sm:$0xff] %v5161_v19 }
 0x29b   : > { %2090 = vrot.lane.b32.xlu0 %v5003_v63, %s4076_s9  ;;  %2258 = vrot.lane.b32.xlu1 %v5013_v32, %s4078_s11  ;;  %v5159_v63 = vpop.permute.xlu0 %3017 }
 0x29f   : > { %2086 = vrot.lane.b32.xlu0 %v5021_v15, %s4076_s9  ;;  %2084 = vrot.lane.b32.xlu1 %v5033_v50, %s4076_s9  ;;  %v5166_v15 = vpop.permute.xlu0 %3021  ;;  %v5172_v50 = vpop.permute.xlu1 %3023 }
 0x2a0   : > { %5991 = vst [vmem:[#allocation11_spill] sm:$0xff] %v5166_v15  ;;  %5992 = vst [vmem:[#allocation12_spill] sm:$0xff] %v5172_v50 }
 0x2a3   : > { %2260 = vrot.lane.b32.xlu0 %v5028_v43, %s4078_s11  ;;  %2254 = vrot.lane.b32.xlu1 %v5039_v51, %s4078_s11  ;;  %v5176_v6 = vpop.permute.xlu0 %3025 }
 0x2a4   : > { %5993 = vst [vmem:[#allocation13_spill] sm:$0xff] %v5176_v6 }
 0x2a7   : > { %2256 = vrot.lane.b32.xlu0 %v5045_v18, %s4078_s11  ;;  %2096 = vrot.lane.b32.xlu1 %v2006_v54, %s4076_s9 }
 0x2ab   : > { %2098 = vrot.lane.b32.xlu0 %v5057_v27, %s4076_s9  ;;  %2266 = vrot.lane.b32.xlu1 %v5065_v13, %s4078_s11 }
 0x2af   : > { %2094 = vrot.lane.b32.xlu0 %v1956_v0, %s4076_s9  ;;  %2092 = vrot.lane.b32.xlu1 %v2004_v35, %s4076_s9  ;;  %v5191_v0 = vadd.s32 8, %v4779_v29 }
 0x2b1   : > { %v2211_v25 = vpop.permute.xlu1 %2210  ;;  %vm2173_vm7 = vcmp.lt.s32.totalorder %v5191_v0, 15 }
 0x2b2   : > { %v2303_v40 = vrot.slane %v2211_v25, 1 }
 0x2b3   : > { %2268 = vrot.lane.b32.xlu0 %v5080_v20, %s4078_s11  ;;  %2262 = vrot.lane.b32.xlu1 %v5077_v49, %s4078_s11 }
 0x2b5   : > { %v2213_v54 = vpop.permute.xlu0 %2212  ;;  %v2207_v27 = vpop.permute.xlu1 %2206 }
 0x2b6   : > { %v2319_v59 = vrot.slane %v2213_v54, 1  ;;  %v2302_v11 = vrot.slane %v2207_v27, 1 }
 0x2b7   : > { %2264 = vrot.lane.b32.xlu0 %v5088_v24, %s4078_s11  ;;  %2104 = vrot.lane.b32.xlu1 %v2010_v33, %s4076_s9 }
 0x2b8   : > { %v2336_v14 = vsel %vm2334_vm6, %v2303_v40, %v2319_v59  ;;  %v2352_v37 = vsel %vm2334_vm6, %v2319_v59, %v2303_v40 }
 0x2b9   : > { %v2209_v41 = vpop.permute.xlu0 %2208  ;;  %v5185_v39 = vpop.permute.xlu1 %2048  ;;  %v2374_v36 = vsel %vm2173_vm7, %v2352_v37, 0.0 }
 0x2ba   : > { %v2318_v17 = vrot.slane %v2209_v41, 1 }
 0x2bb   : > { %2106 = vrot.lane.b32.xlu0 %v1959_v34, %s4076_s9  ;;  %2100 = vrot.lane.b32.xlu1 %v2008_v44, %s4076_s9 }
 0x2bc   : > { %v2335_v34 = vsel %vm2334_vm6, %v2302_v11, %v2318_v17  ;;  %v2351_v1 = vsel %vm2334_vm6, %v2318_v17, %v2302_v11 }
 0x2bd   : > { %v5193_v3 = vpop.permute.xlu0 %2050  ;;  %v2219_v35 = vpop.permute.xlu1 %2218  ;;  %v2372_v44 = vsel %vm2173_vm7, %v2351_v1, 0.0 }
 0x2be   : > { %v2305_v53 = vrot.slane %v2219_v35, 1 }
 0x2bf   : > { %2102 = vrot.lane.b32.xlu0 %v1958_v16, %s4076_s9  ;;  %2439 = vrot.lane.b32.xlu1 %v2336_v14, %s4076_s9 }
 0x2c1   : > { %v5202_v57 = vpop.permute.xlu0 %2044  ;;  %v5204_v10 = vpop.permute.xlu1 %2046 }
 0x2c3   : > { %2441 = vrot.lane.b32.xlu0 %v2374_v36, %s4076_s9  ;;  %2435 = vrot.lane.b32.xlu1 %v2335_v34, %s4076_s9 }
 0x2c5   : > { %v2221_v28 = vpop.permute.xlu0 %2220  ;;  %v2215_v33 = vpop.permute.xlu1 %2214 }
 0x2c6   : > { %v2321_v16 = vrot.slane %v2221_v28, 1  ;;  %v2304_v40 = vrot.slane %v2215_v33, 1 }
 0x2c7   : > { %2437 = vrot.lane.b32.xlu0 %v2372_v44, %s4076_s9 }
 0x2c8   : > { %v2338_v25 = vsel %vm2334_vm6, %v2305_v53, %v2321_v16  ;;  %v2354_v54 = vsel %vm2334_vm6, %v2321_v16, %v2305_v53 }
 0x2c9   : > { %v2217_v27 = vpop.permute.xlu0 %2216  ;;  %2447 = vrot.lane.b32.xlu1 %v2338_v25, %s4076_s9  ;;  %v5222_v41 = vpop.permute.xlu1 %2056  ;;  %v2378_v59 = vsel %vm2173_vm7, %v2354_v54, 0.0 }
 0x2ca   : > { %v2320_v35 = vrot.slane %v2217_v27, 1 }
 0x2cb   : > { %2449 = vrot.lane.b32.xlu0 %v2378_v59, %s4076_s9 }
 0x2cc   : > { %v2337_v17 = vsel %vm2334_vm6, %v2304_v40, %v2320_v35  ;;  %v2353_v14 = vsel %vm2334_vm6, %v2320_v35, %v2304_v40 }
 0x2cd   : > { %v5231_v37 = vpop.permute.xlu0 %2058  ;;  %2443 = vrot.lane.b32.xlu1 %v2337_v17, %s4076_s9  ;;  %v2227_v11 = vpop.permute.xlu1 %2226  ;;  %v2376_v36 = vsel %vm2173_vm7, %v2353_v14, 0.0 }
 0x2ce   : > { %v2307_v53 = vrot.slane %v2227_v11, 1 }
 0x2cf   : > { %2445 = vrot.lane.b32.xlu0 %v2376_v36, %s4076_s9 }
 0x2d1   : > { %v5237_v34 = vpop.permute.xlu0 %2054  ;;  %v5239_v1 = vpop.permute.xlu1 %2052 }
 0x2d5   : > { %v2229_v28 = vpop.permute.xlu0 %2228  ;;  %v2223_v33 = vpop.permute.xlu1 %2222 }
 0x2d6   : > { %v2323_v16 = vrot.slane %v2229_v28, 1  ;;  %v2306_v40 = vrot.slane %v2223_v33, 1 }
 0x2d8   : > { %v2340_v44 = vsel %vm2334_vm6, %v2307_v53, %v2323_v16  ;;  %v2356_v25 = vsel %vm2334_vm6, %v2323_v16, %v2307_v53 }
 0x2d9   : > { %v2225_v54 = vpop.permute.xlu0 %2224  ;;  %2455 = vrot.lane.b32.xlu1 %v2340_v44, %s4076_s9  ;;  %v5246_v27 = vpop.permute.xlu1 %2064  ;;  %v2382_v59 = vsel %vm2173_vm7, %v2356_v25, 0.0 }
 0x2da   : > { %v2322_v35 = vrot.slane %v2225_v54, 1  ;;  %2457 = vrot.lane.b32.xlu0 %v2382_v59, %s4076_s9 }
 0x2dc   : > { %v2339_v17 = vsel %vm2334_vm6, %v2306_v40, %v2322_v35  ;;  %v2355_v14 = vsel %vm2334_vm6, %v2322_v35, %v2306_v40 }
 0x2dd   : > { %v5255_v11 = vpop.permute.xlu0 %2066  ;;  %2451 = vrot.lane.b32.xlu1 %v2339_v17, %s4076_s9  ;;  %v2235_v36 = vpop.permute.xlu1 %2234  ;;  %v2380_v28 = vsel %vm2173_vm7, %v2355_v14, 0.0 }
 0x2de   : > { %2453 = vrot.lane.b32.xlu0 %v2380_v28, %s4076_s9  ;;  %v2309_v25 = vrot.slane %v2235_v36, 1 }
 0x2e1   : > { %v5261_v33 = vpop.permute.xlu0 %2062  ;;  %v5263_v53 = vpop.permute.xlu1 %2060 }
 0x2e5   : > { %v2237_v16 = vpop.permute.xlu0 %2236  ;;  %v2231_v44 = vpop.permute.xlu1 %2230 }
 0x2e6   : > { %v2325_v54 = vrot.slane %v2237_v16, 1  ;;  %v2308_v28 = vrot.slane %v2231_v44, 1 }
 0x2e8   : > { %v2342_v59 = vsel %vm2334_vm6, %v2309_v25, %v2325_v54  ;;  %v2358_v40 = vsel %vm2334_vm6, %v2325_v54, %v2309_v25 }
 0x2e9   : > { %v2233_v35 = vpop.permute.xlu0 %2232  ;;  %2463 = vrot.lane.b32.xlu1 %v2342_v59, %s4076_s9  ;;  %v5270_v17 = vpop.permute.xlu1 %2072  ;;  %v2386_v14 = vsel %vm2173_vm7, %v2358_v40, 0.0 }
 0x2ea   : > { %v2324_v43 = vrot.slane %v2233_v35, 1  ;;  %2465 = vrot.lane.b32.xlu0 %v2386_v14, %s4076_s9 }
 0x2ec   : > { %v2341_v36 = vsel %vm2334_vm6, %v2308_v28, %v2324_v43  ;;  %v2357_v16 = vsel %vm2334_vm6, %v2324_v43, %v2308_v28 }
 0x2ed   : > { %v5279_v32 = vpop.permute.xlu0 %2074  ;;  %2459 = vrot.lane.b32.xlu1 %v2341_v36, %s4076_s9  ;;  %v2243_v25 = vpop.permute.xlu1 %2242  ;;  %v2384_v54 = vsel %vm2173_vm7, %v2357_v16, 0.0 }
 0x2ee   : > { %2461 = vrot.lane.b32.xlu0 %v2384_v54, %s4076_s9  ;;  %v2311_v14 = vrot.slane %v2243_v25, 1 }
 0x2f1   : > { %v5285_v44 = vpop.permute.xlu0 %2070  ;;  %v5287_v59 = vpop.permute.xlu1 %2068 }
 0x2f5   : > { %v2245_v40 = vpop.permute.xlu0 %2244  ;;  %v2239_v35 = vpop.permute.xlu1 %2238 }
 0x2f6   : > { %v2327_v42 = vrot.slane %v2245_v40, 1  ;;  %v2310_v47 = vrot.slane %v2239_v35, 1 }
 0x2f8   : > { %v2344_v43 = vsel %vm2334_vm6, %v2311_v14, %v2327_v42  ;;  %v2360_v28 = vsel %vm2334_vm6, %v2327_v42, %v2311_v14 }
 0x2f9   : > { %v2241_v36 = vpop.permute.xlu0 %2240  ;;  %2471 = vrot.lane.b32.xlu1 %v2344_v43, %s4076_s9  ;;  %v5294_v16 = vpop.permute.xlu1 %2080  ;;  %v2390_v54 = vsel %vm2173_vm7, %v2360_v28, 0.0 }
 0x2fa   : > { %v2326_v30 = vrot.slane %v2241_v36, 1  ;;  %2473 = vrot.lane.b32.xlu0 %v2390_v54, %s4076_s9 }
 0x2fc   : > { %v2343_v25 = vsel %vm2334_vm6, %v2310_v47, %v2326_v30  ;;  %v2359_v40 = vsel %vm2334_vm6, %v2326_v30, %v2310_v47 }
 0x2fd   : > { %v5303_v12 = vpop.permute.xlu0 %2082  ;;  %2467 = vrot.lane.b32.xlu1 %v2343_v25, %s4076_s9  ;;  %v2251_v42 = vpop.permute.xlu1 %2250  ;;  %v2388_v14 = vsel %vm2173_vm7, %v2359_v40, 0.0 }
 0x2fe   : > { %2469 = vrot.lane.b32.xlu0 %v2388_v14, %s4076_s9  ;;  %v2313_v54 = vrot.slane %v2251_v42, 1 }
 0x301   : > { %v5309_v35 = vpop.permute.xlu0 %2078  ;;  %v5311_v43 = vpop.permute.xlu1 %2076 }
 0x305   : > { %v2253_v28 = vpop.permute.xlu0 %2252  ;;  %v2247_v36 = vpop.permute.xlu1 %2246 }
 0x306   : > { %v2329_v15 = vrot.slane %v2253_v28, 1  ;;  %v2312_v19 = vrot.slane %v2247_v36, 1 }
 0x308   : > { %v2346_v47 = vsel %vm2334_vm6, %v2313_v54, %v2329_v15  ;;  %v2362_v30 = vsel %vm2334_vm6, %v2329_v15, %v2313_v54 }
 0x309   : > { %v2249_v25 = vpop.permute.xlu0 %2248  ;;  %2479 = vrot.lane.b32.xlu1 %v2346_v47, %s4076_s9  ;;  %v5318_v40 = vpop.permute.xlu1 %2088  ;;  %v2394_v14 = vsel %vm2173_vm7, %v2362_v30, 0.0 }
 0x30a   : > { %5994 = vst [vmem:[#allocation14_spill] sm:$0xff] %v5318_v40  ;;  %v2328_v6 = vrot.slane %v2249_v25, 1  ;;  %2481 = vrot.lane.b32.xlu0 %v2394_v14, %s4076_s9 }
 0x30c   : > { %v2345_v42 = vsel %vm2334_vm6, %v2312_v19, %v2328_v6  ;;  %v2361_v28 = vsel %vm2334_vm6, %v2328_v6, %v2312_v19 }
 0x30d   : > { %v5327_v50 = vpop.permute.xlu0 %2090  ;;  %2475 = vrot.lane.b32.xlu1 %v2345_v42, %s4076_s9  ;;  %v2259_v15 = vpop.permute.xlu1 %2258  ;;  %v2392_v54 = vsel %vm2173_vm7, %v2361_v28, 0.0 }
 0x30e   : > { %5995 = vst [vmem:[#allocation15_spill] sm:$0xff] %v5327_v50  ;;  %2477 = vrot.lane.b32.xlu0 %v2392_v54, %s4076_s9  ;;  %v2315_v14 = vrot.slane %v2259_v15, 1 }
 0x311   : > { %v5333_v36 = vpop.permute.xlu0 %2086  ;;  %v5335_v47 = vpop.permute.xlu1 %2084 }
 0x312   : > { %5996 = vst [vmem:[#allocation16_spill] sm:$0xff] %v5333_v36  ;;  %5997 = vst [vmem:[#allocation17_spill] sm:$0xff] %v5335_v47 }
 0x315   : > { %v2261_v30 = vpop.permute.xlu0 %2260  ;;  %v2255_v25 = vpop.permute.xlu1 %2254 }
 0x316   : > { %v2331_v40 = vrot.slane %v2261_v30, 1  ;;  %v2314_v36 = vrot.slane %v2255_v25, 1  ;;  %v1902_v25 = vadd.f32 %v5139_v4, %v5045_v18 }
 0x318   : > { %v2348_v19 = vsel %vm2334_vm6, %v2315_v14, %v2331_v40  ;;  %v2364_v6 = vsel %vm2334_vm6, %v2331_v40, %v2315_v14 }
 0x319   : > { %v2257_v42 = vpop.permute.xlu0 %2256  ;;  %2487 = vrot.lane.b32.xlu1 %v2348_v19, %s4076_s9  ;;  %v5342_v28 = vpop.permute.xlu1 %2096  ;;  %v2398_v54 = vsel %vm2173_vm7, %v2364_v6, 0.0  ;;  %v1901_v19 = vadd.f32 %v5139_v4, %v5039_v51 }
 0x31a   : > { %5998 = vst [vmem:[#allocation18_spill] sm:$0xff] %v5342_v28  ;;  %v2330_v50 = vrot.slane %v2257_v42, 1  ;;  %2489 = vrot.lane.b32.xlu0 %v2398_v54, %s4076_s9 }
 0x31c   : > { %v2347_v15 = vsel %vm2334_vm6, %v2314_v36, %v2330_v50  ;;  %v2363_v30 = vsel %vm2334_vm6, %v2330_v50, %v2314_v36 }
 0x31d   : > { %v5351_v47 = vpop.permute.xlu0 %2098  ;;  %2483 = vrot.lane.b32.xlu1 %v2347_v15, %s4076_s9  ;;  %v2267_v40 = vpop.permute.xlu1 %2266  ;;  %v2396_v14 = vsel %vm2173_vm7, %v2363_v30, 0.0 }
 0x31e   : > { %5999 = vst [vmem:[#allocation19_spill] sm:$0xff] %v5351_v47  ;;  %2485 = vrot.lane.b32.xlu0 %v2396_v14, %s4076_s9  ;;  %v2317_v47 = vrot.slane %v2267_v40, 1  ;;  %v1907_v14 = vadd.f32 %v5139_v4, %v5065_v13  ;;  %v1908_v13 = vadd.f32 %v5139_v4, %v5080_v20  ;;  %v1879_v20 = vadd.f32 %v5139_v4, %v4775_v8 }
 0x31f   : > { %v1880_v8 = vadd.f32 %v5139_v4, %v4785_v48  ;;  %v1878_v48 = vadd.f32 %v5139_v4, %v4792_v9  ;;  %v1884_v9 = vadd.f32 %v5139_v4, %v4820_v5 }
 0x320   : > { %v2142_v29 = vadd.f32 %v5185_v39, %v1879_v20  ;;  %v4029_v39 = vld [vmem:[%s4147_s10 + $0x48] sm:$0xff] }
 0x321   : > { %v2095_v6 = vpop.permute.xlu0 %2094  ;;  %v2093_v42 = vpop.permute.xlu1 %2092  ;;  %v2147_v5 = vadd.f32 %v5231_v37, %v1884_v9 }
 0x322   : > { %v5361_v54 = vadd.f32 %v2095_v6, %v1902_v25  ;;  %v5363_v50 = vadd.f32 %v2093_v42, %v1901_v19 }
 0x325   : > { %v2269_v36 = vpop.permute.xlu0 %2268  ;;  %v2263_v15 = vpop.permute.xlu1 %2262 }
 0x326   : > { %v2333_v28 = vrot.slane %v2269_v36, 1  ;;  %v2316_v6 = vrot.slane %v2263_v15, 1 }
 0x328   : > { %v2350_v30 = vsel %vm2334_vm6, %v2317_v47, %v2333_v28  ;;  %v2366_v18 = vsel %vm2334_vm6, %v2333_v28, %v2317_v47  ;;  %v1905_v28 = vadd.f32 %v5139_v4, %v5077_v49  ;;  %v1906_v49 = vadd.f32 %v5139_v4, %v5088_v24 }
 0x329   : > { %v2265_v51 = vpop.permute.xlu0 %2264  ;;  %2495 = vrot.lane.b32.xlu1 %v2350_v30, %s4076_s9  ;;  %v2105_v25 = vpop.permute.xlu1 %2104  ;;  %v2402_v19 = vsel %vm2173_vm7, %v2366_v18, 0.0  ;;  %v2143_v24 = vadd.f32 %v5193_v3, %v1880_v8  ;;  %v4031_v3 = vld [vmem:[%s4147_s10 + $0x58] sm:$0xff] }
 0x32a   : > { %v2332_v42 = vrot.slane %v2265_v51, 1  ;;  %v5374_v40 = vadd.f32 %v2105_v25, %v1907_v14  ;;  %2497 = vrot.lane.b32.xlu0 %v2402_v19, %s4076_s9  ;;  %v4028_v19 = vld [vmem:[%s4147_s10 + $0x40] sm:$0xff] }
 0x32c   : > { %v2349_v47 = vsel %vm2334_vm6, %v2316_v6, %v2332_v42  ;;  %v2365_v36 = vsel %vm2334_vm6, %v2332_v42, %v2316_v6  ;;  %v1877_v6 = vadd.f32 %v5139_v4, %v4783_v61 }
 0x32d   : > { %v2107_v30 = vpop.permute.xlu0 %2106  ;;  %2491 = vrot.lane.b32.xlu1 %v2349_v47, %s4076_s9  ;;  %v2101_v15 = vpop.permute.xlu1 %2100  ;;  %v2400_v14 = vsel %vm2173_vm7, %v2365_v36, 0.0 }
 0x32e   : > { %v5390_v18 = vadd.f32 %v2107_v30, %v1908_v13  ;;  %v5392_v51 = vadd.f32 %v2101_v15, %v1905_v28  ;;  %2493 = vrot.lane.b32.xlu0 %v2400_v14, %s4076_s9  ;;  %v2140_v47 = vadd.f32 %v5202_v57, %v1877_v6  ;;  %v4030_v30 = vld [vmem:[%s4147_s10 + $0x50] sm:$0xff]  ;;  %v1883_v57 = vadd.f32 %v5139_v4, %v4815_v23 }
 0x330   : > { %v2146_v8 = vadd.f32 %v5222_v41, %v1883_v57  ;;  %v6001_v41 = vld [vmem:[#allocation6_spill] sm:$0xff] }
 0x331   : > { %v2103_v25 = vpop.permute.xlu0 %2102  ;;  %3027 = vrot.lane.b32.xlu1 %v4028_v19, %s4076_s9  ;;  %v2440_v0 = vpop.permute.xlu1 %2439 }
 0x332   : > { %v5404_v42 = vadd.f32 %v2103_v25, %v1906_v49  ;;  %v5406_v13 = vadd.f32 %v2440_v0, %v2142_v29  ;;  %3029 = vrot.lane.b32.xlu0 %v4029_v39, %s4076_s9  ;;  %v2141_v29 = vadd.f32 %v5204_v10, %v1878_v48  ;;  %v4032_v0 = vld [vmem:[%s4147_s10 + $0x60] sm:$0xff]  ;;  %v4033_v10 = vld [vmem:[%s4147_s10 + $0x68] sm:$0xff] }
 0x334   : > { %v2565_v28 = vmin.f32 %v5406_v13, 40.0 }
 0x335   : > { %v2442_v36 = vpop.permute.xlu0 %2441  ;;  %3031 = vrot.lane.b32.xlu1 %v4030_v30, %s4076_s9  ;;  %v2436_v61 = vpop.permute.xlu1 %2435 }
 0x336   : > { %v2599_v15 = vmul.f32 1.442695, %v2565_v28  ;;  %v5417_v14 = vadd.f32 %v2442_v36, %v2143_v24  ;;  %v5419_v20 = vadd.f32 %v2436_v61, %v2140_v47  ;;  %3033 = vrot.lane.b32.xlu0 %v4031_v3, %s4076_s9  ;;  %v6000_v24 = vld [vmem:[#allocation2_spill] sm:$0xff]  ;;  %v1882_v61 = vadd.f32 %v5139_v4, %v6001_v41 }
 0x337   : > { %v1881_v47 = vadd.f32 %v5139_v4, %v6000_v24 }
 0x338   : > { %3896 = vpow2.f32 %v2599_v15  ;;  %v2566_v49 = vmin.f32 %v5417_v14, 40.0  ;;  %v2563_v25 = vmin.f32 %v5419_v20, 40.0  ;;  %v4034_v15 = vld [vmem:[%s4147_s10 + $0x70] sm:$0xff] }
 0x339   : > { %v2438_v19 = vpop.permute.xlu0 %2437  ;;  %3035 = vrot.lane.b32.xlu1 %v4032_v0, %s4076_s9  ;;  %v2144_v3 = vadd.f32 %v5239_v1, %v1881_v47 }
 0x33a   : > { %v2601_v6 = vmul.f32 1.442695, %v2566_v49  ;;  %v2595_v39 = vmul.f32 1.442695, %v2563_v25  ;;  %v5433_v23 = vadd.f32 %v2438_v19, %v2141_v29  ;;  %3037 = vrot.lane.b32.xlu0 %v4033_v10, %s4076_s9  ;;  %v4035_v49 = vld [vmem:[%s4147_s10 + $0x78] sm:$0xff]  ;;  %v2145_v25 = vadd.f32 %v5237_v34, %v1882_v61  ;;  %v4037_v34 = vld [vmem:[%s4147_s10 + $0x88] sm:$0xff] }
 0x33b   : > { %v2448_v28 = vpop.permute.xlu1 %2447 }
 0x33c   : > { %3898 = vpow2.f32 %v2601_v6  ;;  %v2564_v36 = vmin.f32 %v5433_v23, 40.0  ;;  %v5441_v30 = vadd.f32 %v2448_v28, %v2146_v8  ;;  %v4036_v6 = vld [vmem:[%s4147_s10 + $0x80] sm:$0xff] }
 0x33d   : > { %3900 = vpow2.f32 %v2595_v39  ;;  %v2450_v48 = vpop.permute.xlu0 %2449  ;;  %3039 = vrot.lane.b32.xlu1 %v4034_v15, %s4076_s9  ;;  %v1887_v15 = vadd.f32 %v5139_v4, %v4868_v22 }
 0x33e   : > { %v2597_v57 = vmul.f32 1.442695, %v2564_v36  ;;  %v2569_v29 = vmin.f32 %v5441_v30, 40.0  ;;  %v5449_v37 = vadd.f32 %v2450_v48, %v2147_v5  ;;  %3041 = vrot.lane.b32.xlu0 %v4035_v49, %s4076_s9  ;;  %v4038_v36 = vld [vmem:[%s4147_s10 + $0x90] sm:$0xff]  ;;  %v4039_v48 = vld [vmem:[%s4147_s10 + $0x98] sm:$0xff] }
 0x33f   : > { %v2444_v9 = vpop.permute.xlu1 %2443 }
 0x340   : > { %3902 = vpow2.f32 %v2597_v57  ;;  %v2607_v19 = vmul.f32 1.442695, %v2569_v29  ;;  %v2570_v0 = vmin.f32 %v5449_v37, 40.0  ;;  %v5455_v8 = vadd.f32 %v2444_v9, %v2144_v3  ;;  %v4040_v29 = vld [vmem:[%s4147_s10 + $0xa0] sm:$0xff] }
 0x341   : > { %v2446_v1 = vpop.permute.xlu0 %2445  ;;  %3043 = vrot.lane.b32.xlu1 %v4036_v6, %s4076_s9 }
 0x342   : > { %3904 = vpow2.f32 %v2607_v19  ;;  %v2609_v39 = vmul.f32 1.442695, %v2570_v0  ;;  %v2567_v10 = vmin.f32 %v5455_v8, 40.0  ;;  %v5460_v24 = vadd.f32 %v2446_v1, %v2145_v25  ;;  %3045 = vrot.lane.b32.xlu0 %v4037_v34, %s4076_s9  ;;  %v4041_v0 = vld [vmem:[%s4147_s10 + $0xa8] sm:$0xff] }
 0x343   : > { %v2150_v25 = vadd.f32 %v5246_v27, %v1887_v15  ;;  %v1885_v27 = vadd.f32 %v5139_v4, %v4902_v21 }
 0x344   : > { %3906 = vpow2.f32 %v2609_v39  ;;  %v2603_v47 = vmul.f32 1.442695, %v2567_v10  ;;  %v2568_v28 = vmin.f32 %v5460_v24, 40.0 }
 0x345   : > { %v3897_v5 = vpop.eup %3896  ;;  %3047 = vrot.lane.b32.xlu1 %v4038_v36, %s4076_s9  ;;  %v2148_v21 = vadd.f32 %v5263_v53, %v1885_v27  ;;  %v4044_v53 = vld [vmem:[%s4147_s10 + $0xc0] sm:$0xff]  ;;  %v4045_v27 = vld [vmem:[%s4147_s10 + $0xc8] sm:$0xff] }
 0x346   : > { %v2661_v41 = vadd.f32 2.0, %v3897_v5  ;;  %3908 = vpow2.f32 %v2603_v47  ;;  %v2605_v61 = vmul.f32 1.442695, %v2568_v28  ;;  %3049 = vrot.lane.b32.xlu0 %v4039_v48, %s4076_s9  ;;  %v1886_v47 = vadd.f32 %v5139_v4, %v4905_v2  ;;  %v4043_v48 = vld [vmem:[%s4147_s10 + $0xb8] sm:$0xff] }
 0x347   : > { %v1888_v2 = vadd.f32 %v5139_v4, %v4871_v58 }
 0x348   : > { %v2693_v3 = vmul.f32 %v3897_v5, %v2661_v41  ;;  %3910 = vpow2.f32 %v2605_v61  ;;  %v4042_v5 = vld [vmem:[%s4147_s10 + $0xb0] sm:$0xff] }
 0x349   : > { %v3899_v57 = vpop.eup %3898  ;;  %3051 = vrot.lane.b32.xlu1 %v4040_v29, %s4076_s9 }
 0x34a   : > { %v3901_v49 = vpop.eup %3900  ;;  %v5474_v9 = vadd.f32 2.0, %v2693_v3  ;;  %v2662_v19 = vadd.f32 2.0, %v3899_v57  ;;  %3053 = vrot.lane.b32.xlu0 %v4041_v0, %s4076_s9  ;;  %v2149_v3 = vadd.f32 %v5261_v33, %v1886_v47 }
 0x34b   : > { %v2659_v1 = vadd.f32 2.0, %v3901_v49  ;;  %v2456_v6 = vpop.permute.xlu1 %2455 }
 0x34c   : > { %3912 = vrcp.f32 %v5474_v9  ;;  %v2694_v22 = vmul.f32 %v3899_v57, %v2662_v19  ;;  %v5479_v39 = vadd.f32 %v2456_v6, %v2150_v25  ;;  %v2458_v10 = vpop.permute.xlu0 %2457  ;;  %v2151_v6 = vadd.f32 %v5255_v11, %v1888_v2 }
 0x34d   : > { %v3903_v34 = vpop.eup %3902  ;;  %v2691_v28 = vmul.f32 %v3901_v49, %v2659_v1  ;;  %3055 = vrot.lane.b32.xlu1 %v4042_v5, %s4076_s9 }
 0x34e   : > { %v5487_v36 = vadd.f32 2.0, %v2694_v22  ;;  %v2660_v41 = vadd.f32 2.0, %v3903_v34  ;;  %v2573_v61 = vmin.f32 %v5479_v39, 40.0  ;;  %3057 = vrot.lane.b32.xlu0 %v4043_v48, %s4076_s9  ;;  %v5511_v11 = vadd.f32 %v2458_v10, %v2151_v6 }
 0x34f   : > { %v3905_v15 = vpop.eup %3904  ;;  %v5496_v57 = vadd.f32 2.0, %v2691_v28  ;;  %v2452_v29 = vpop.permute.xlu1 %2451  ;;  %v1890_v6 = vadd.f32 %v5139_v4, %v5036_v26 }
 0x350   : > { %3914 = vrcp.f32 %v5487_v36  ;;  %v2692_v49 = vmul.f32 %v3903_v34, %v2660_v41  ;;  %v2665_v25 = vadd.f32 2.0, %v3905_v15  ;;  %v2615_v19 = vmul.f32 1.442695, %v2573_v61  ;;  %v2454_v0 = vpop.permute.xlu0 %2453 }
 0x351   : > { %v3907_v1 = vpop.eup %3906  ;;  %3916 = vrcp.f32 %v5496_v57  ;;  %v5501_v58 = vadd.f32 %v2452_v29, %v2148_v21  ;;  %v5503_v33 = vadd.f32 %v2454_v0, %v2149_v3  ;;  %3059 = vrot.lane.b32.xlu1 %v4044_v53, %s4076_s9  ;;  %v4046_v29 = vld [vmem:[%s4147_s10 + $0xd0] sm:$0xff]  ;;  %v1892_v0 = vadd.f32 %v5139_v4, %v4964_v38 }
 0x352   : > { %v5507_v22 = vadd.f32 2.0, %v2692_v49  ;;  %v2697_v47 = vmul.f32 %v3905_v15, %v2665_v25  ;;  %v2666_v34 = vadd.f32 2.0, %v3907_v1  ;;  %3918 = vpow2.f32 %v2615_v19  ;;  %3061 = vrot.lane.b32.xlu0 %v4045_v27, %s4076_s9  ;;  %v4047_v19 = vld [vmem:[%s4147_s10 + $0xd8] sm:$0xff] }
 0x353   : > { %v3909_v28 = vpop.eup %3908  ;;  %v2571_v5 = vmin.f32 %v5501_v58, 40.0  ;;  %v1891_v15 = vadd.f32 %v5139_v4, %v4954_v56  ;;  %v2572_v21 = vmin.f32 %v5503_v33, 40.0  ;;  %v1889_v56 = vadd.f32 %v5139_v4, %v5026_v31 }
 0x354   : > { %3920 = vrcp.f32 %v5507_v22  ;;  %v5515_v41 = vadd.f32 2.0, %v2697_v47  ;;  %v2698_v61 = vmul.f32 %v3907_v1, %v2666_v34  ;;  %v2663_v48 = vadd.f32 2.0, %v3909_v28 }
 0x355   : > { %v3911_v2 = vpop.eup %3910  ;;  %v2611_v3 = vmul.f32 1.442695, %v2571_v5  ;;  %3063 = vrot.lane.b32.xlu1 %v4046_v29, %s4076_s9  ;;  %v2574_v1 = vmin.f32 %v5511_v11, 40.0  ;;  %v1895_v27 = vadd.f32 %v5139_v4, %v4896_v60  ;;  %v1896_v38 = vadd.f32 %v5139_v4, %v4908_v62  ;;  %v4048_v5 = vld [vmem:[%s4147_s10 + $0xe0] sm:$0xff] }
 0x356   : > { %3922 = vrcp.f32 %v5515_v41  ;;  %v5523_v10 = vadd.f32 2.0, %v2698_v61  ;;  %v2695_v49 = vmul.f32 %v3909_v28, %v2663_v48  ;;  %v2664_v25 = vadd.f32 2.0, %v3911_v2  ;;  %3065 = vrot.lane.b32.xlu0 %v4047_v19, %s4076_s9 }
 0x357   : > { %3924 = vpow2.f32 %v2611_v3  ;;  %v1893_v31 = vadd.f32 %v5139_v4, %v4916_v7  ;;  %v2613_v28 = vmul.f32 1.442695, %v2572_v21  ;;  %v2154_v26 = vadd.f32 %v5270_v17, %v1891_v15 }
 0x358   : > { %3926 = vrcp.f32 %v5523_v10  ;;  %v5535_v53 = vadd.f32 2.0, %v2695_v49  ;;  %v2696_v47 = vmul.f32 %v3911_v2, %v2664_v25  ;;  %v4049_v2 = vld [vmem:[%s4147_s10 + $0xe8] sm:$0xff]  ;;  %v2155_v60 = vadd.f32 %v5279_v32, %v1892_v0 }
 0x359   : > { %v3913_v34 = vpop.eup %3912  ;;  %3067 = vrot.lane.b32.xlu1 %v4048_v5, %s4076_s9  ;;  %v2153_v62 = vadd.f32 %v5285_v44, %v1890_v6  ;;  %v1894_v7 = vadd.f32 %v5139_v4, %v4921_v45  ;;  %v2617_v3 = vmul.f32 1.442695, %v2574_v1  ;;  %v2152_v17 = vadd.f32 %v5287_v59, %v1889_v56  ;;  %v4050_v44 = vld [vmem:[%s4147_s10 + $0xf0] sm:$0xff] }
 0x35a   : > { %v2789_v61 = vmul.f32 %v3913_v34, %v5474_v9  ;;  %3928 = vrcp.f32 %v5535_v53  ;;  %v5548_v48 = vadd.f32 2.0, %v2696_v47  ;;  %3069 = vrot.lane.b32.xlu0 %v4049_v2, %s4076_s9  ;;  %v5561_v25 = vadd.f32 %v5294_v16, %v1895_v27  ;;  %v4051_v16 = vld [vmem:[%s4147_s10 + $0xf8] sm:$0xff]  ;;  %s4079_s10 = smov 124  }
 0x35b   : > { %v2464_v21 = vpop.permute.xlu1 %2463  ;;  %v5564_v32 = vadd.f32 %v5303_v12, %v1896_v38  ;;  %v5571_v19 = vadd.f32 %v5309_v35, %v1894_v7  ;;  %v5580_v6 = vadd.f32 %v5311_v43, %v1893_v31 }
 0x35c   : > { %v2821_v9 = vsub.f32 2.0, %v2789_v61  ;;  %3930 = vrcp.f32 %v5548_v48  ;;  %v5558_v15 = vadd.f32 %v2464_v21, %v2154_v26  ;;  %v2466_v29 = vpop.permute.xlu0 %2465 }
 0x35d   : > { %v3915_v49 = vpop.eup %3914  ;;  %3932 = vpow2.f32 %v2613_v28  ;;  %v5566_v45 = vadd.f32 %v2466_v29, %v2155_v60  ;;  %3071 = vrot.lane.b32.xlu1 %v4050_v44, %s4076_s9 }
 0x35e   : > { %v3917_v59 = vpop.eup %3916  ;;  %v2853_v0 = vmul.f32 %v3913_v34, %v2821_v9  ;;  %v2790_v56 = vmul.f32 %v3915_v49, %v5487_v36  ;;  %v2577_v1 = vmin.f32 %v5558_v15, 40.0  ;;  %3073 = vrot.lane.b32.xlu0 %v4051_v16, %s4076_s9  ;;  %3934 = vpow2.f32 %v2617_v3 }
 0x35f   : > { %v5577_v12 = vpop.eup %3918  ;;  %v2787_v47 = vmul.f32 %v3917_v59, %v5496_v57  ;;  %v2578_v27 = vmin.f32 %v5566_v45, 40.0  ;;  %v2460_v35 = vpop.permute.xlu1 %2459 }
 0x360   : > { %v2885_v38 = vmul.f32 2.0, %v2853_v0  ;;  %v2822_v34 = vsub.f32 2.0, %v2790_v56  ;;  %v2623_v28 = vmul.f32 1.442695, %v2577_v1  ;;  %v5584_v36 = vadd.f32 %v2460_v35, %v2152_v17  ;;  %v2462_v5 = vpop.permute.xlu0 %2461 }
 0x361   : > { %v3921_v26 = vpop.eup %3920  ;;  %v2819_v61 = vsub.f32 2.0, %v2787_v47  ;;  %v2625_v2 = vmul.f32 1.442695, %v2578_v27  ;;  %v5586_v60 = vadd.f32 %v2462_v5, %v2153_v62  ;;  %v5589_v43 = vadd.f32 2.0, %v5577_v12 }
 0x362   : > { %v2917_v31 = vsub.f32 1.0, %v2885_v38  ;;  %v2854_v57 = vmul.f32 %v3915_v49, %v2822_v34  ;;  %v2788_v7 = vmul.f32 %v3921_v26, %v5507_v22  ;;  %3936 = vpow2.f32 %v2623_v28 }
 0x363   : > { %v3923_v3 = vpop.eup %3922  ;;  %v2851_v21 = vmul.f32 %v3917_v59, %v2819_v61  ;;  %3938 = vpow2.f32 %v2625_v2  ;;  %v2575_v17 = vmin.f32 %v5584_v36, 40.0  ;;  %v2576_v9 = vmin.f32 %v5586_v60, 40.0 }
 0x364   : > { %v3925_v29 = vpop.eup %3924  ;;  %v2949_v44 = vmul.f32 %v2917_v31, %v5406_v13  ;;  %v2886_v62 = vmul.f32 2.0, %v2854_v57  ;;  %v2820_v0 = vsub.f32 2.0, %v2788_v7  ;;  %v2793_v56 = vmul.f32 %v3923_v3, %v5515_v41 }
 0x365   : > { %v3927_v1 = vpop.eup %3926  ;;  %v2883_v16 = vmul.f32 2.0, %v2851_v21  ;;  %v2619_v49 = vmul.f32 1.442695, %v2575_v17  ;;  %v2621_v47 = vmul.f32 1.442695, %v2576_v9  ;;  %v2667_v22 = vadd.f32 2.0, %v3925_v29 }
 0x366   : > { %v3109_v27 = vadd.f32 %v5153_v46, %v2949_v44  ;;  %v2918_v59 = vsub.f32 1.0, %v2886_v62  ;;  %v2852_v35 = vmul.f32 %v3921_v26, %v2820_v0  ;;  %v2825_v38 = vsub.f32 2.0, %v2793_v56 }
 0x367   : > { %v3929_v34 = vpop.eup %3928  ;;  %v2915_v28 = vsub.f32 1.0, %v2883_v16  ;;  %v2794_v5 = vmul.f32 %v3927_v1, %v5523_v10  ;;  %3940 = vpow2.f32 %v2619_v49  ;;  %v2699_v13 = vmul.f32 %v3925_v29, %v2667_v22 }
 0x368   : > { %v2950_v61 = vmul.f32 %v2918_v59, %v5417_v14  ;;  %v2884_v2 = vmul.f32 2.0, %v2852_v35  ;;  %v2857_v41 = vmul.f32 %v3923_v3, %v2825_v38  ;;  %v2791_v31 = vmul.f32 %v3929_v34, %v5535_v53  ;;  %3175 = vrot.lane.b32.xlu1 %v3109_v27, %s4079_s10 }
 0x369   : > { %v3931_v57 = vpop.eup %3930  ;;  %v2947_v46 = vmul.f32 %v2915_v28, %v5419_v20  ;;  %v2826_v26 = vsub.f32 2.0, %v2794_v5  ;;  %3942 = vpow2.f32 %v2621_v47  ;;  %v5602_v7 = vadd.f32 2.0, %v2699_v13 }
 0x36a   : > { %v3933_v21 = vpop.eup %3932  ;;  %v3110_v10 = vadd.f32 %v5159_v63, %v2950_v61  ;;  %v2916_v17 = vsub.f32 1.0, %v2884_v2  ;;  %v2889_v9 = vmul.f32 2.0, %v2857_v41  ;;  %v2823_v14 = vsub.f32 2.0, %v2791_v31 }
 0x36b   : > { %v3107_v3 = vadd.f32 %v5141_v55, %v2947_v46  ;;  %v2858_v29 = vmul.f32 %v3927_v1, %v2826_v26  ;;  %v2792_v53 = vmul.f32 %v3931_v57, %v5548_v48  ;;  %v2472_v44 = vpop.permute.xlu1 %2471  ;;  %3944 = vrcp.f32 %v5602_v7  ;;  %v3935_v62 = vpop.eup %3934 }
 0x36c   : > { %v2948_v20 = vmul.f32 %v2916_v17, %v5433_v23  ;;  %v2921_v0 = vsub.f32 1.0, %v2889_v9  ;;  %v2855_v56 = vmul.f32 %v3929_v34, %v2823_v14  ;;  %v5610_v16 = vadd.f32 %v2472_v44, %v5561_v25  ;;  %v2474_v63 = vpop.permute.xlu0 %2473  ;;  %3177 = vrot.lane.b32.xlu0 %v3110_v10, %s4079_s10 }
 0x36d   : > { %v2890_v49 = vmul.f32 2.0, %v2858_v29  ;;  %v2824_v47 = vsub.f32 2.0, %v2792_v53  ;;  %v5614_v55 = vadd.f32 %v2474_v63, %v5564_v32  ;;  %3171 = vrot.lane.b32.xlu1 %v3107_v3, %s4079_s10  ;;  %v2668_v48 = vadd.f32 2.0, %v3933_v21  ;;  %v6002_v32 = vld [vmem:[#allocation12_spill] sm:$0xff]  ;;  %v6004_v3 = vld [vmem:[#allocation10_spill] sm:$0xff] }
 0x36e   : > { %v3108_v1 = vadd.f32 %v5147_v52, %v2948_v20  ;;  %v2953_v23 = vmul.f32 %v2921_v0, %v5441_v30  ;;  %v2887_v22 = vmul.f32 2.0, %v2855_v56  ;;  %v2581_v27 = vmin.f32 %v5610_v16, 40.0 }
 0x36f   : > { %v3937_v25 = vpop.eup %3936  ;;  %v2922_v59 = vsub.f32 1.0, %v2890_v49  ;;  %v2856_v35 = vmul.f32 %v3931_v57, %v2824_v47  ;;  %v2582_v38 = vmin.f32 %v5614_v55, 40.0  ;;  %v2468_v34 = vpop.permute.xlu1 %2467  ;;  %v2700_v28 = vmul.f32 %v3933_v21, %v2668_v48  ;;  %v6005_v47 = vld [vmem:[#allocation11_spill] sm:$0xff] }
 0x370   : > { %v3939_v5 = vpop.eup %3938  ;;  %v3113_v13 = vadd.f32 %v6002_v32, %v2953_v23  ;;  %v2919_v61 = vsub.f32 1.0, %v2887_v22  ;;  %v2631_v2 = vmul.f32 1.442695, %v2581_v27  ;;  %v5623_v41 = vadd.f32 %v2468_v34, %v5580_v6  ;;  %v2470_v52 = vpop.permute.xlu0 %2469  ;;  %3173 = vrot.lane.b32.xlu0 %v3108_v1, %s4079_s10  ;;  %v6003_v6 = vld [vmem:[#allocation13_spill] sm:$0xff]  ;;  %v6006_v27 = vld [vmem:[#allocation7_spill] sm:$0xff] }
 0x371   : > { %v2954_v30 = vmul.f32 %v2922_v59, %v5449_v37  ;;  %v2888_v31 = vmul.f32 2.0, %v2856_v35  ;;  %v2633_v46 = vmul.f32 1.442695, %v2582_v38  ;;  %v5628_v57 = vadd.f32 %v2470_v52, %v5571_v19 }
 0x372   : > { %v2951_v26 = vmul.f32 %v2919_v61, %v5455_v8  ;;  %3946 = vpow2.f32 %v2631_v2  ;;  %v2579_v21 = vmin.f32 %v5623_v41, 40.0  ;;  %3183 = vrot.lane.b32.xlu1 %v3113_v13, %s4079_s10  ;;  %v5633_v10 = vadd.f32 2.0, %v2700_v28  ;;  %v6007_v28 = vld [vmem:[#allocation14_spill] sm:$0xff]  ;;  %v6008_v13 = vld [vmem:[#allocation4_spill] sm:$0xff] }
 0x373   : > { %v3114_v17 = vadd.f32 %v6003_v6, %v2954_v30  ;;  %v2920_v9 = vsub.f32 1.0, %v2888_v31  ;;  %3948 = vpow2.f32 %v2633_v46  ;;  %v2580_v37 = vmin.f32 %v5628_v57, 40.0  ;;  %v6009_v30 = vld [vmem:[#allocation3_spill] sm:$0xff]  ;;  %v6010_v46 = vld [vmem:[#allocation5_spill] sm:$0xff] }
 0x374   : > { %v3941_v14 = vpop.eup %3940  ;;  %v3111_v29 = vadd.f32 %v6004_v3, %v2951_v26  ;;  %v2627_v19 = vmul.f32 1.442695, %v2579_v21  ;;  %3950 = vrcp.f32 %v5633_v10  ;;  %v2701_v8 = vmul.f32 %v5577_v12, %v5589_v43  ;;  %v6011_v6 = vld [vmem:[#allocation17_spill] sm:$0xff] }
 0x375   : > { %v2952_v53 = vmul.f32 %v2920_v9, %v5460_v24  ;;  %v2629_v44 = vmul.f32 1.442695, %v2580_v37  ;;  %3185 = vrot.lane.b32.xlu0 %v3114_v17, %s4079_s10  ;;  %v2670_v20 = vadd.f32 2.0, %v3935_v62  ;;  %v2671_v0 = vadd.f32 2.0, %v3941_v14 }
 0x376   : > { %v3943_v56 = vpop.eup %3942  ;;  %3952 = vpow2.f32 %v2627_v19  ;;  %3179 = vrot.lane.b32.xlu1 %v3111_v29, %s4079_s10  ;;  %v5644_v63 = vadd.f32 2.0, %v2701_v8  ;;  %v2673_v49 = vadd.f32 2.0, %v3937_v25  ;;  %v2674_v23 = vadd.f32 2.0, %v3939_v5  ;;  %v6013_v29 = vld [vmem:[#allocation16_spill] sm:$0xff] }
 0x377   : > { %v3112_v48 = vadd.f32 %v6005_v47, %v2952_v53  ;;  %3954 = vpow2.f32 %v2629_v44  ;;  %v2702_v1 = vmul.f32 %v3935_v62, %v2670_v20  ;;  %v2703_v24 = vmul.f32 %v3941_v14, %v2671_v0  ;;  %v6012_v14 = vld [vmem:[#allocation15_spill] sm:$0xff] }
 0x378   : > { %v5647_v12 = vpop.eup %3944  ;;  %3956 = vrcp.f32 %v5644_v63  ;;  %v2672_v43 = vadd.f32 2.0, %v3943_v56  ;;  %v2705_v22 = vmul.f32 %v3937_v25, %v2673_v49  ;;  %v1899_v59 = vadd.f32 %v5139_v4, %v6006_v27 }
 0x379   : > { %3181 = vrot.lane.b32.xlu0 %v3112_v48, %s4079_s10  ;;  %v2734_v35 = vadd.f32 2.0, %v2702_v1  ;;  %v1897_v61 = vadd.f32 %v5139_v4, %v6008_v13  ;;  %v5658_v52 = vadd.f32 2.0, %v2703_v24  ;;  %v2706_v25 = vmul.f32 %v3939_v5, %v2674_v23 }
 0x37a   : > { %v2704_v38 = vmul.f32 %v3943_v56, %v2672_v43  ;;  %v5653_v34 = vadd.f32 2.0, %v2705_v22  ;;  %v2162_v32 = vadd.f32 %v6007_v28, %v1899_v59  ;;  %v1900_v31 = vadd.f32 %v5139_v4, %v6009_v30 }
 0x37b   : > { %v2480_v62 = vpop.permute.xlu1 %2479  ;;  %3958 = vrcp.f32 %v2734_v35  ;;  %v1898_v26 = vadd.f32 %v5139_v4, %v6010_v46  ;;  %v2160_v17 = vadd.f32 %v6011_v6, %v1897_v61  ;;  %v5675_v20 = vadd.f32 2.0, %v2706_v25  ;;  %v6014_v6 = vld [vmem:[#allocation8_spill] sm:$0xff] }
 0x37c   : > { %v2482_v2 = vpop.permute.xlu0 %2481  ;;  %v5664_v21 = vadd.f32 %v2480_v62, %v2162_v32  ;;  %v5667_v9 = vadd.f32 2.0, %v2704_v38  ;;  %3960 = vrcp.f32 %v5653_v34  ;;  %v2163_v3 = vadd.f32 %v6012_v14, %v1900_v31 }
 0x37d   : > { %v2161_v19 = vadd.f32 %v6013_v29, %v1898_v26  ;;  %3962 = vrcp.f32 %v5658_v52 }
 0x37e   : > { %v2585_v49 = vmin.f32 %v5664_v21, 40.0  ;;  %v5678_v47 = vadd.f32 %v2482_v2, %v2163_v3  ;;  %3964 = vrcp.f32 %v5667_v9  ;;  %v2795_v2 = vmul.f32 %v5647_v12, %v5602_v7 }
 0x37f   : > { %v3947_v37 = vpop.eup %3946  ;;  %v2476_v5 = vpop.permute.xlu1 %2475  ;;  %3966 = vrcp.f32 %v5675_v20 }
 0x380   : > { %v3949_v8 = vpop.eup %3948  ;;  %v5672_v53 = vadd.f32 %v2476_v5, %v2160_v17  ;;  %v2478_v44 = vpop.permute.xlu0 %2477  ;;  %v2677_v0 = vadd.f32 2.0, %v3947_v37  ;;  %v2639_v32 = vmul.f32 1.442695, %v2585_v49  ;;  %v2586_v62 = vmin.f32 %v5678_v47, 40.0  ;;  %v6016_v5 = vld [vmem:[#allocation18_spill] sm:$0xff] }
 0x381   : > { %v3951_v56 = vpop.eup %3950  ;;  %v5680_v48 = vadd.f32 %v2478_v44, %v2161_v19  ;;  %v2678_v23 = vadd.f32 2.0, %v3949_v8  ;;  %v1903_v17 = vadd.f32 %v5139_v4, %v6014_v6  ;;  %v2827_v44 = vsub.f32 2.0, %v2795_v2 }
 0x382   : > { %v2583_v1 = vmin.f32 %v5672_v53, 40.0  ;;  %v2709_v38 = vmul.f32 %v3947_v37, %v2677_v0  ;;  %v2796_v30 = vmul.f32 %v3951_v56, %v5633_v10  ;;  %v6015_v37 = vld [vmem:[#allocation9_spill] sm:$0xff]  ;;  %v2641_v29 = vmul.f32 1.442695, %v2586_v62  ;;  %v6017_v0 = vld [vmem:[#allocation19_spill] sm:$0xff] }
 0x383   : > { %v3953_v24 = vpop.eup %3952  ;;  %v2584_v43 = vmin.f32 %v5680_v48, 40.0  ;;  %v2710_v25 = vmul.f32 %v3949_v8, %v2678_v23  ;;  %v1904_v14 = vadd.f32 %v5139_v4, %v6015_v37  ;;  %v2166_v8 = vadd.f32 %v6016_v5, %v1903_v17 }
 0x384   : > { %v3955_v22 = vpop.eup %3954  ;;  %v2635_v27 = vmul.f32 1.442695, %v2583_v1  ;;  %v2675_v59 = vadd.f32 2.0, %v3953_v24  ;;  %v5695_v3 = vadd.f32 2.0, %v2709_v38  ;;  %v2828_v23 = vsub.f32 2.0, %v2796_v30 }
 0x385   : > { %v3957_v28 = vpop.eup %3956  ;;  %v2637_v13 = vmul.f32 1.442695, %v2584_v43  ;;  %v2676_v61 = vadd.f32 2.0, %v3955_v22  ;;  %v5698_v10 = vadd.f32 2.0, %v2710_v25  ;;  %v2167_v49 = vadd.f32 %v6017_v0, %v1904_v14 }
 0x386   : > { %3968 = vpow2.f32 %v2635_v27  ;;  %v2797_v31 = vmul.f32 %v3957_v28, %v5644_v63  ;;  %v2707_v46 = vmul.f32 %v3953_v24, %v2675_v59  ;;  %v2859_v62 = vmul.f32 %v5647_v12, %v2827_v44 }
 0x387   : > { %3970 = vpow2.f32 %v2637_v13  ;;  %v2708_v7 = vmul.f32 %v3955_v22, %v2676_v61  ;;  %v2860_v30 = vmul.f32 %v3951_v56, %v2828_v23 }
 0x388   : > { %v3959_v26 = vpop.eup %3958  ;;  %3972 = vpow2.f32 %v2639_v32  ;;  %v2829_v24 = vsub.f32 2.0, %v2797_v31  ;;  %v5701_v43 = vadd.f32 2.0, %v2707_v46 }
 0x389   : > { %v2798_v19 = vmul.f32 %v3959_v26, %v2734_v35  ;;  %v3961_v63 = vpop.eup %3960  ;;  %3974 = vrcp.f32 %v5695_v3  ;;  %v5708_v38 = vadd.f32 2.0, %v2708_v7 }
 0x38a   : > { %v3963_v35 = vpop.eup %3962  ;;  %3976 = vpow2.f32 %v2641_v29  ;;  %v2801_v13 = vmul.f32 %v3961_v63, %v5653_v34  ;;  %v2861_v31 = vmul.f32 %v3957_v28, %v2829_v24  ;;  %v2891_v28 = vmul.f32 2.0, %v2859_v62 }
 0x38b   : > { %v2488_v1 = vpop.permute.xlu1 %2487  ;;  %v2830_v59 = vsub.f32 2.0, %v2798_v19  ;;  %3978 = vrcp.f32 %v5698_v10  ;;  %v3965_v61 = vpop.eup %3964  ;;  %v2799_v12 = vmul.f32 %v3963_v35, %v5658_v52 }
 0x38c   : > { %v5703_v4 = vadd.f32 %v2488_v1, %v2166_v8  ;;  %v2490_v27 = vpop.permute.xlu0 %2489  ;;  %3980 = vrcp.f32 %v5701_v43  ;;  %v3967_v14 = vpop.eup %3966  ;;  %v2800_v19 = vmul.f32 %v3965_v61, %v5667_v9  ;;  %v2833_v7 = vsub.f32 2.0, %v2801_v13 }
 0x38d   : > { %v5706_v22 = vadd.f32 %v2490_v27, %v2167_v49  ;;  %v2862_v37 = vmul.f32 %v3959_v26, %v2830_v59  ;;  %3982 = vrcp.f32 %v5708_v38  ;;  %v2892_v26 = vmul.f32 2.0, %v2860_v30 }
 0x38e   : > { %v2589_v32 = vmin.f32 %v5703_v4, 40.0  ;;  %v2893_v8 = vmul.f32 2.0, %v2861_v31  ;;  %v2831_v49 = vsub.f32 2.0, %v2799_v12  ;;  %v2832_v9 = vsub.f32 2.0, %v2800_v19 }
 0x38f   : > { %v2590_v2 = vmin.f32 %v5706_v22, 40.0  ;;  %v2484_v25 = vpop.permute.xlu1 %2483  ;;  %v2894_v0 = vmul.f32 2.0, %v2862_v37  ;;  %v2865_v59 = vmul.f32 %v3961_v63, %v2833_v7  ;;  %v2924_v62 = vsub.f32 1.0, %v2892_v26 }
 0x390   : > { %v2647_v46 = vmul.f32 1.442695, %v2589_v32  ;;  %v5717_v6 = vadd.f32 %v2484_v25, %v5363_v50  ;;  %v2486_v17 = vpop.permute.xlu0 %2485  ;;  %v2923_v32 = vsub.f32 1.0, %v2891_v28  ;;  %v2863_v25 = vmul.f32 %v3963_v35, %v2831_v49 }
 0x391   : > { %v2649_v34 = vmul.f32 1.442695, %v2590_v2  ;;  %v5721_v29 = vadd.f32 %v2486_v17, %v5361_v54  ;;  %v2802_v54 = vmul.f32 %v3967_v14, %v5675_v20  ;;  %v2925_v2 = vsub.f32 1.0, %v2893_v8 }
 0x392   : > { %v2587_v56 = vmin.f32 %v5717_v6, 40.0  ;;  %3984 = vpow2.f32 %v2647_v46  ;;  %v2926_v46 = vsub.f32 1.0, %v2894_v0  ;;  %v5733_v63 = vmul.f32 %v2923_v32, %v5501_v58 }
 0x393   : > { %v3969_v5 = vpop.eup %3968  ;;  %v2588_v50 = vmin.f32 %v5721_v29, 40.0  ;;  %3986 = vpow2.f32 %v2649_v34  ;;  %v2834_v17 = vsub.f32 2.0, %v2802_v54  ;;  %v2864_v34 = vmul.f32 %v3965_v61, %v2832_v9 }
 0x394   : > { %v3971_v52 = vpop.eup %3970  ;;  %v2643_v44 = vmul.f32 1.442695, %v2587_v56  ;;  %v2679_v23 = vadd.f32 2.0, %v3969_v5  ;;  %v5730_v56 = vmul.f32 2.0, %v2865_v59  ;;  %v5736_v28 = vmul.f32 %v2924_v62, %v5503_v33 }
 0x395   : > { %v2645_v1 = vmul.f32 1.442695, %v2588_v50  ;;  %v2680_v24 = vadd.f32 2.0, %v3971_v52  ;;  %v3973_v27 = vpop.eup %3972  ;;  %v2957_v61 = vmul.f32 %v2925_v2, %v5479_v39  ;;  %v2958_v33 = vmul.f32 %v2926_v46, %v5511_v11 }
 0x396   : > { %3988 = vpow2.f32 %v2643_v44  ;;  %v2711_v13 = vmul.f32 %v3969_v5, %v2679_v23  ;;  %v3975_v31 = vpop.eup %3974  ;;  %v2681_v20 = vadd.f32 2.0, %v3973_v27  ;;  %v5750_v44 = vmul.f32 2.0, %v2863_v25 }
 0x397   : > { %3990 = vpow2.f32 %v2645_v1  ;;  %v2712_v30 = vmul.f32 %v3971_v52, %v2680_v24  ;;  %v3977_v12 = vpop.eup %3976  ;;  %v2805_v8 = vmul.f32 %v3975_v31, %v5695_v3  ;;  %v2866_v0 = vmul.f32 %v3967_v14, %v2834_v17 }
 0x398   : > { %v5728_v37 = vadd.f32 2.0, %v2711_v13  ;;  %v3979_v50 = vpop.eup %3978  ;;  %v2713_v52 = vmul.f32 %v3973_v27, %v2681_v20  ;;  %v5753_v1 = vmul.f32 2.0, %v2864_v34  ;;  %v2682_v11 = vadd.f32 2.0, %v3977_v12 }
 0x399   : > { %v5739_v35 = vadd.f32 2.0, %v2712_v30  ;;  %v3981_v7 = vpop.eup %3980  ;;  %v2806_v39 = vmul.f32 %v3979_v50, %v5698_v10  ;;  %v2837_v59 = vsub.f32 2.0, %v2805_v8  ;;  %v5768_v13 = vmul.f32 2.0, %v2866_v0 }
 0x39a   : > { %3992 = vrcp.f32 %v5728_v37  ;;  %v3983_v49 = vpop.eup %3982  ;;  %v5763_v32 = vadd.f32 2.0, %v2713_v52  ;;  %v2714_v46 = vmul.f32 %v3977_v12, %v2682_v11 }
 0x39b   : > { %v2496_v19 = vpop.permute.xlu1 %2495  ;;  %3994 = vrcp.f32 %v5739_v35  ;;  %v2838_v30 = vsub.f32 2.0, %v2806_v39  ;;  %v2869_v52 = vmul.f32 %v3975_v31, %v2837_v59 }
 0x39c   : > { %v5742_v5 = vadd.f32 %v2496_v19, %v5374_v40  ;;  %v2498_v26 = vpop.permute.xlu0 %2497 }
 0x39d   : > { %v5747_v58 = vadd.f32 %v2498_v26, %v5390_v18  ;;  %v2803_v18 = vmul.f32 %v3981_v7, %v5701_v43  ;;  %v2804_v43 = vmul.f32 %v3983_v49, %v5708_v38  ;;  %v5774_v38 = vadd.f32 2.0, %v2714_v46 }
 0x39e   : > { %v2593_v54 = vmin.f32 %v5742_v5, 40.0  ;;  %v2870_v12 = vmul.f32 %v3979_v50, %v2838_v30 }
 0x39f   : > { %6018 = vst [vmem:[#allocation2_spill] sm:$0xff] %v5747_v58  ;;  %v2594_v3 = vmin.f32 %v5747_v58, 40.0  ;;  %v2492_v23 = vpop.permute.xlu1 %2491  ;;  %v3985_v24 = vpop.eup %3984  ;;  %v2835_v34 = vsub.f32 2.0, %v2803_v18 }
 0x3a0   : > { %v2655_v27 = vmul.f32 1.442695, %v2593_v54  ;;  %v5761_v14 = vadd.f32 %v2492_v23, %v5392_v51  ;;  %v2494_v9 = vpop.permute.xlu0 %2493  ;;  %v3987_v2 = vpop.eup %3986  ;;  %v2685_v19 = vadd.f32 2.0, %v3985_v24  ;;  %v2836_v54 = vsub.f32 2.0, %v2804_v43 }
 0x3a1   : > { %v2657_v62 = vmul.f32 1.442695, %v2594_v3  ;;  %v5766_v10 = vadd.f32 %v2494_v9, %v5404_v42  ;;  %v2686_v11 = vadd.f32 2.0, %v3987_v2  ;;  %v2867_v18 = vmul.f32 %v3981_v7, %v2835_v34 }
 0x3a2   : > { %3996 = vpow2.f32 %v2655_v27  ;;  %v2591_v25 = vmin.f32 %v5761_v14, 40.0  ;;  %v2717_v23 = vmul.f32 %v3985_v24, %v2685_v19  ;;  %v2901_v24 = vmul.f32 2.0, %v2869_v52 }
 0x3a3   : > { %v3989_v51 = vpop.eup %3988  ;;  %3998 = vpow2.f32 %v2657_v62  ;;  %v2592_v17 = vmin.f32 %v5766_v10, 40.0  ;;  %v3028_v20 = vpop.permute.xlu1 %3027  ;;  %v2718_v46 = vmul.f32 %v3987_v2, %v2686_v11  ;;  %v2902_v7 = vmul.f32 2.0, %v2870_v12 }
 0x3a4   : > { %v3991_v26 = vpop.eup %3990  ;;  %v2651_v42 = vmul.f32 1.442695, %v2591_v25  ;;  %v3030_v8 = vpop.permute.xlu0 %3029  ;;  %4000 = vrcp.f32 %v5763_v32  ;;  %v2683_v3 = vadd.f32 2.0, %v3989_v51  ;;  %v5777_v59 = vadd.f32 2.0, %v2717_v23 }
 0x3a5   : > { %v2653_v0 = vmul.f32 1.442695, %v2592_v17  ;;  %v2684_v39 = vadd.f32 2.0, %v3991_v26  ;;  %v2868_v17 = vmul.f32 %v3983_v49, %v2836_v54  ;;  %v5785_v30 = vadd.f32 2.0, %v2718_v46 }
 0x3a6   : > { %4002 = vpow2.f32 %v2651_v42  ;;  %v2715_v9 = vmul.f32 %v3989_v51, %v2683_v3  ;;  %v2930_v51 = vsub.f32 1.0, %v5768_v13  ;;  %v2899_v2 = vmul.f32 2.0, %v2867_v18 }
 0x3a7   : > { %4004 = vpow2.f32 %v2653_v0  ;;  %v3032_v27 = vpop.permute.xlu1 %3031  ;;  %v2716_v62 = vmul.f32 %v3991_v26, %v2684_v39  ;;  %v3993_v25 = vpop.eup %3992  ;;  %v3115_v34 = vadd.f32 %v3028_v20, %v5733_v63  ;;  %v3116_v26 = vadd.f32 %v3030_v8, %v5736_v28 }
 0x3a8   : > { %v3117_v40 = vadd.f32 %v3032_v27, %v2957_v61  ;;  %v3034_v31 = vpop.permute.xlu0 %3033  ;;  %4006 = vrcp.f32 %v5774_v38  ;;  %v5779_v58 = vadd.f32 2.0, %v2715_v9  ;;  %v3995_v49 = vpop.eup %3994  ;;  %v2928_v42 = vsub.f32 1.0, %v5753_v1 }
 0x3a9   : > { %v3118_v43 = vadd.f32 %v3034_v31, %v2958_v33  ;;  %v5781_v50 = vadd.f32 2.0, %v2716_v62  ;;  %4008 = vrcp.f32 %v5777_v59  ;;  %v2807_v33 = vmul.f32 %v3993_v25, %v5728_v37 }
 0x3aa   : > { %3191 = vrot.lane.b32.xlu1 %v3117_v40, %s4079_s10  ;;  %4010 = vrcp.f32 %v5779_v58  ;;  %v2927_v40 = vsub.f32 1.0, %v5750_v44  ;;  %v2900_v52 = vmul.f32 2.0, %v2868_v17  ;;  %v6019_v37 = vsub.f32 1.0, %v5730_v56 }
 0x3ab   : > { %3193 = vrot.lane.b32.xlu0 %v3118_v43, %s4079_s10  ;;  %v3036_v61 = vpop.permute.xlu1 %3035  ;;  %4012 = vrcp.f32 %v5781_v50  ;;  %v2933_v0 = vsub.f32 1.0, %v2901_v24  ;;  %v2934_v63 = vsub.f32 1.0, %v2902_v7  ;;  %v2962_v54 = vmul.f32 %v2930_v51, %v5566_v45 }
 0x3ac   : > { %v3038_v19 = vpop.permute.xlu0 %3037  ;;  %4014 = vrcp.f32 %v5785_v30  ;;  %v2961_v13 = vmul.f32 %v6019_v37, %v5558_v15  ;;  %v2931_v28 = vsub.f32 1.0, %v2899_v2  ;;  %v2839_v8 = vsub.f32 2.0, %v2807_v33 }
 0x3ad   : > { %v2808_v1 = vmul.f32 %v3995_v49, %v5739_v35  ;;  %v2959_v39 = vmul.f32 %v2927_v40, %v5584_v36  ;;  %v2960_v15 = vmul.f32 %v2928_v42, %v5586_v60  ;;  %v2932_v18 = vsub.f32 1.0, %v2900_v52 }
 0x3ae   : > { %3187 = vrot.lane.b32.xlu1 %v3115_v34, %s4079_s10  ;;  %v2965_v45 = vmul.f32 %v2933_v0, %v5610_v16  ;;  %v2966_v62 = vmul.f32 %v2934_v63, %v5614_v55  ;;  %v2963_v36 = vmul.f32 %v2931_v28, %v5623_v41  ;;  %v2871_v17 = vmul.f32 %v3993_v25, %v2839_v8 }
 0x3af   : > { %v3997_v20 = vpop.eup %3996  ;;  %3189 = vrot.lane.b32.xlu0 %v3116_v26, %s4079_s10  ;;  %v3040_v44 = vpop.permute.xlu1 %3039  ;;  %v2840_v60 = vsub.f32 2.0, %v2808_v1  ;;  %v3119_v51 = vadd.f32 %v3036_v61, %v2959_v39  ;;  %v3120_v40 = vadd.f32 %v3038_v19, %v2960_v15 }
 0x3b0   : > { %v3999_v3 = vpop.eup %3998  ;;  %v3121_v12 = vadd.f32 %v3040_v44, %v2961_v13  ;;  %v3042_v23 = vpop.permute.xlu0 %3041  ;;  %v2689_v11 = vadd.f32 2.0, %v3997_v20  ;;  %v2903_v13 = vmul.f32 2.0, %v2871_v17 }
 0x3b1   : > { %v4001_v56 = vpop.eup %4000  ;;  %v3122_v27 = vadd.f32 %v3042_v23, %v2962_v54  ;;  %v2690_v9 = vadd.f32 2.0, %v3999_v3  ;;  %v2872_v0 = vmul.f32 %v3995_v49, %v2840_v60 }
 0x3b2   : > { %3199 = vrot.lane.b32.xlu1 %v3121_v12, %s4079_s10  ;;  %v2809_v35 = vmul.f32 %v4001_v56, %v5763_v32  ;;  %v2721_v31 = vmul.f32 %v3997_v20, %v2689_v11  ;;  %v2964_v32 = vmul.f32 %v2932_v18, %v5628_v57  ;;  %v2935_v15 = vsub.f32 1.0, %v2903_v13 }
 0x3b3   : > { %v4003_v46 = vpop.eup %4002  ;;  %3201 = vrot.lane.b32.xlu0 %v3122_v27, %s4079_s10  ;;  %v3044_v43 = vpop.permute.xlu1 %3043  ;;  %v2722_v24 = vmul.f32 %v3999_v3, %v2690_v9  ;;  %v2904_v9 = vmul.f32 2.0, %v2872_v0 }
 0x3b4   : > { %v4005_v7 = vpop.eup %4004  ;;  %v3046_v2 = vpop.permute.xlu0 %3045  ;;  %v2841_v33 = vsub.f32 2.0, %v2809_v35  ;;  %v2687_v34 = vadd.f32 2.0, %v4003_v46  ;;  %v5812_v16 = vadd.f32 2.0, %v2721_v31 }
 0x3b5   : > { %v4007_v55 = vpop.eup %4006  ;;  %v2688_v26 = vadd.f32 2.0, %v4005_v7  ;;  %v5815_v42 = vadd.f32 2.0, %v2722_v24  ;;  %v3124_v31 = vadd.f32 %v3046_v2, %v2964_v32  ;;  %v2967_v32 = vmul.f32 %v2935_v15, %v5672_v53 }
 0x3b6   : > { %3195 = vrot.lane.b32.xlu1 %v3119_v51, %s4079_s10  ;;  %v2873_v41 = vmul.f32 %v4001_v56, %v2841_v33  ;;  %v2810_v25 = vmul.f32 %v4007_v55, %v5774_v38  ;;  %v2719_v52 = vmul.f32 %v4003_v46, %v2687_v34  ;;  %4016 = vrcp.f32 %v5812_v16  ;;  %v4009_v61 = vpop.eup %4008 }
 0x3b7   : > { %3197 = vrot.lane.b32.xlu0 %v3120_v40, %s4079_s10  ;;  %v3048_v37 = vpop.permute.xlu1 %3047  ;;  %v2720_v19 = vmul.f32 %v4005_v7, %v2688_v26  ;;  %4018 = vrcp.f32 %v5815_v42  ;;  %v4011_v57 = vpop.eup %4010  ;;  %v2813_v28 = vmul.f32 %v4009_v61, %v5777_v59  ;;  %v2936_v51 = vsub.f32 1.0, %v2904_v9 }
 0x3b8   : > { %v3125_v63 = vadd.f32 %v3048_v37, %v2965_v45  ;;  %v3050_v20 = vpop.permute.xlu0 %3049  ;;  %v2905_v44 = vmul.f32 2.0, %v2873_v41  ;;  %v2842_v54 = vsub.f32 2.0, %v2810_v25  ;;  %v4013_v38 = vpop.eup %4012  ;;  %v2811_v1 = vmul.f32 %v4011_v57, %v5779_v58 }
 0x3b9   : > { %v3126_v8 = vadd.f32 %v3050_v20, %v2966_v62  ;;  %v5824_v3 = vadd.f32 2.0, %v2719_v52  ;;  %v5826_v39 = vadd.f32 2.0, %v2720_v19  ;;  %v4015_v12 = vpop.eup %4014  ;;  %v2812_v11 = vmul.f32 %v4013_v38, %v5781_v50 }
 0x3ba   : > { %3207 = vrot.lane.b32.xlu1 %v3125_v63, %s4079_s10  ;;  %v2937_v49 = vsub.f32 1.0, %v2905_v44  ;;  %v2874_v23 = vmul.f32 %v4007_v55, %v2842_v54  ;;  %v2845_v56 = vsub.f32 2.0, %v2813_v28  ;;  %v2843_v27 = vsub.f32 2.0, %v2811_v1 }
 0x3bb   : > { %3209 = vrot.lane.b32.xlu0 %v3126_v8, %s4079_s10  ;;  %v3052_v59 = vpop.permute.xlu1 %3051  ;;  %v2814_v18 = vmul.f32 %v4015_v12, %v5785_v30  ;;  %4020 = vrcp.f32 %v5824_v3  ;;  %v3123_v58 = vadd.f32 %v3044_v43, %v2963_v36  ;;  %v2844_v35 = vsub.f32 2.0, %v2812_v11 }
 0x3bc   : > { %v3054_v45 = vpop.permute.xlu0 %3053  ;;  %v2906_v62 = vmul.f32 2.0, %v2874_v23  ;;  %v2875_v46 = vmul.f32 %v4011_v57, %v2843_v27  ;;  %v2877_v17 = vmul.f32 %v4009_v61, %v2845_v56  ;;  %v2969_v50 = vmul.f32 %v2937_v49, %v5664_v21 }
 0x3bd   : > { %v2846_v60 = vsub.f32 2.0, %v2814_v18  ;;  %v2876_v7 = vmul.f32 %v4013_v38, %v2844_v35  ;;  %4022 = vrcp.f32 %v5826_v39  ;;  %v3127_v13 = vadd.f32 %v3052_v59, %v2967_v32 }
 0x3be   : > { %3203 = vrot.lane.b32.xlu1 %v3123_v58, %s4079_s10  ;;  %v2938_v24 = vsub.f32 1.0, %v2906_v62  ;;  %v2909_v36 = vmul.f32 2.0, %v2877_v17  ;;  %v2907_v55 = vmul.f32 2.0, %v2875_v46  ;;  %v2968_v0 = vmul.f32 %v2936_v51, %v5680_v48 }
 0x3bf   : > { %3205 = vrot.lane.b32.xlu0 %v3124_v31, %s4079_s10  ;;  %v3056_v30 = vpop.permute.xlu1 %3055  ;;  %v2878_v43 = vmul.f32 %v4015_v12, %v2846_v60  ;;  %v2908_v21 = vmul.f32 2.0, %v2876_v7 }
 0x3c0   : > { %v3129_v33 = vadd.f32 %v3056_v30, %v2969_v50  ;;  %v2970_v2 = vmul.f32 %v2938_v24, %v5678_v47  ;;  %v3058_v34 = vpop.permute.xlu0 %3057  ;;  %v2941_v41 = vsub.f32 1.0, %v2909_v36  ;;  %v2939_v47 = vsub.f32 1.0, %v2907_v55  ;;  %v6020_v36 = vld [vmem:[#allocation2_spill] sm:$0xff] }
 0x3c1   : > { %v2910_v40 = vmul.f32 2.0, %v2878_v43  ;;  %v3128_v63 = vadd.f32 %v3054_v45, %v2968_v0  ;;  %v2940_v20 = vsub.f32 1.0, %v2908_v21 }
 0x3c2   : > { %v3130_v26 = vadd.f32 %v3058_v34, %v2970_v2  ;;  %3215 = vrot.lane.b32.xlu1 %v3129_v33, %s4079_s10  ;;  %v2973_v44 = vmul.f32 %v2941_v41, %v5703_v4  ;;  %v2971_v48 = vmul.f32 %v2939_v47, %v5717_v6 }
 0x3c3   : > { %v4017_v25 = vpop.eup %4016  ;;  %v3060_v52 = vpop.permute.xlu1 %3059  ;;  %v2942_v61 = vsub.f32 1.0, %v2910_v40  ;;  %v2972_v11 = vmul.f32 %v2940_v20, %v5721_v29 }
 0x3c4   : > { %v4019_v37 = vpop.eup %4018  ;;  %3217 = vrot.lane.b32.xlu0 %v3130_v26, %s4079_s10  ;;  %v3062_v19 = vpop.permute.xlu0 %3061  ;;  %v2817_v57 = vmul.f32 %v4017_v25, %v5812_v16  ;;  %v3131_v15 = vadd.f32 %v3060_v52, %v2971_v48 }
 0x3c5   : > { %v2818_v53 = vmul.f32 %v4019_v37, %v5815_v42  ;;  %v2974_v38 = vmul.f32 %v2942_v61, %v5706_v22  ;;  %v3132_v18 = vadd.f32 %v3062_v19, %v2972_v11 }
 0x3c6   : > { %3211 = vrot.lane.b32.xlu1 %v3127_v13, %s4079_s10  ;;  %v2849_v54 = vsub.f32 2.0, %v2817_v57 }
 0x3c7   : > { %v3064_v28 = vpop.permute.xlu1 %3063  ;;  %v2850_v16 = vsub.f32 2.0, %v2818_v53 }
 0x3c8   : > { %v4021_v8 = vpop.eup %4020  ;;  %3213 = vrot.lane.b32.xlu0 %v3128_v63, %s4079_s10  ;;  %v3133_v1 = vadd.f32 %v3064_v28, %v2973_v44  ;;  %v3066_v12 = vpop.permute.xlu0 %3065  ;;  %v2881_v23 = vmul.f32 %v4017_v25, %v2849_v54 }
 0x3c9   : > { %v3134_v49 = vadd.f32 %v3066_v12, %v2974_v38  ;;  %v2815_v42 = vmul.f32 %v4021_v8, %v5824_v3  ;;  %v2882_v6 = vmul.f32 %v4019_v37, %v2850_v16 }
 0x3ca   : > { %3223 = vrot.lane.b32.xlu1 %v3133_v1, %s4079_s10  ;;  %v4023_v4 = vpop.eup %4022  ;;  %v2913_v27 = vmul.f32 2.0, %v2881_v23 }
 0x3cb   : > { %v2847_v56 = vsub.f32 2.0, %v2815_v42  ;;  %v2816_v22 = vmul.f32 %v4023_v4, %v5826_v39  ;;  %v3068_v9 = vpop.permute.xlu1 %3067  ;;  %v2914_v45 = vmul.f32 2.0, %v2882_v6 }
 0x3cc   : > { %3225 = vrot.lane.b32.xlu0 %v3134_v49, %s4079_s10  ;;  %v2945_v35 = vsub.f32 1.0, %v2913_v27  ;;  %v3070_v39 = vpop.permute.xlu0 %3069 }
 0x3cd   : > { %v2879_v59 = vmul.f32 %v4021_v8, %v2847_v56  ;;  %v2848_v58 = vsub.f32 2.0, %v2816_v22  ;;  %v2946_v60 = vsub.f32 1.0, %v2914_v45 }
 0x3ce   : > { %3219 = vrot.lane.b32.xlu1 %v3131_v15, %s4079_s10  ;;  %v2977_v24 = vmul.f32 %v2945_v35, %v5742_v5 }
 0x3cf   : > { %v2911_v3 = vmul.f32 2.0, %v2879_v59  ;;  %v2880_v29 = vmul.f32 %v4023_v4, %v2848_v58  ;;  %v3072_v30 = vpop.permute.xlu1 %3071  ;;  %v2978_v43 = vmul.f32 %v2946_v60, %v6020_v36 }
 0x3d0   : > { %3221 = vrot.lane.b32.xlu0 %v3132_v18, %s4079_s10  ;;  %v3137_v51 = vadd.f32 %v3072_v30, %v2977_v24  ;;  %v3074_v5 = vpop.permute.xlu0 %3073 }
 0x3d1   : > { %v2943_v62 = vsub.f32 1.0, %v2911_v3  ;;  %v2912_v31 = vmul.f32 2.0, %v2880_v29  ;;  %v3138_v33 = vadd.f32 %v3074_v5, %v2978_v43 }
 0x3d3   : > { %v2975_v46 = vmul.f32 %v2943_v62, %v5761_v14  ;;  %v2944_v17 = vsub.f32 1.0, %v2912_v31 }
 0x3d5   : > { %v3135_v50 = vadd.f32 %v3068_v9, %v2975_v46  ;;  %v2976_v7 = vmul.f32 %v2944_v17, %v5766_v10 }
 0x3d7   : > { %3227 = vrot.lane.b32.xlu1 %v3135_v50, %s4079_s10  ;;  %v3136_v14 = vadd.f32 %v3070_v39, %v2976_v7 }
 0x3d9   : > { %3229 = vrot.lane.b32.xlu0 %v3136_v14, %s4079_s10 }
 0x3da   : > { %v3176_v10 = vpop.permute.xlu1 %3175 }
 0x3db   : > { %3269 = vst.msk [vmem:[%s5864_s14 + $0x10] sm:$0xff] %vm511_vm1, %v3176_v10  ;;  %3231 = vrot.lane.b32.xlu1 %v3137_v51, %s4079_s10 }
 0x3dd   : > { %3233 = vrot.lane.b32.xlu0 %v3138_v33, %s4079_s10 }
 0x3de   : > { %v3178_v2 = vpop.permute.xlu0 %3177 }
 0x3df   : > { %3270 = vst.msk [vmem:[%s5864_s14 + $0x18] sm:$0xff] %vm511_vm1, %v3178_v2  ;;  %v3172_v34 = vpop.permute.xlu1 %3171 }
 0x3e0   : > { %3267 = vst.msk [vmem:[%s5864_s14] sm:$0xff] %vm511_vm1, %v3172_v34 }
 0x3e2   : > { %v3174_v55 = vpop.permute.xlu0 %3173 }
 0x3e3   : > { %3268 = vst.msk [vmem:[%s5864_s14 + $0x8] sm:$0xff] %vm511_vm1, %v3174_v55 }
 0x3e4   : > { %v3184_v40 = vpop.permute.xlu1 %3183 }
 0x3e5   : > { %3273 = vst.msk [vmem:[%s5864_s14 + $0x30] sm:$0xff] %vm511_vm1, %v3184_v40 }
 0x3e7   : > { %v3186_v32 = vpop.permute.xlu0 %3185 }
 0x3e8   : > { %3274 = vst.msk [vmem:[%s5864_s14 + $0x38] sm:$0xff] %vm511_vm1, %v3186_v32  ;;  %v3180_v26 = vpop.permute.xlu1 %3179 }
 0x3e9   : > { %3271 = vst.msk [vmem:[%s5864_s14 + $0x20] sm:$0xff] %vm511_vm1, %v3180_v26 }
 0x3eb   : > { %v3182_v21 = vpop.permute.xlu0 %3181 }
 0x3ec   : > { %3272 = vst.msk [vmem:[%s5864_s14 + $0x28] sm:$0xff] %vm511_vm1, %v3182_v21 }
 0x41c   : > { %v3192_v41 = vpop.permute.xlu1 %3191 }
 0x41d   : > { %3277 = vst.msk [vmem:[%s5864_s14 + $0x50] sm:$0xff] %vm511_vm1, %v3192_v41  ;;  %v3194_v25 = vpop.permute.xlu0 %3193 }
 0x41e   : > { %3278 = vst.msk [vmem:[%s5864_s14 + $0x58] sm:$0xff] %vm511_vm1, %v3194_v25 }
 0x420   : > { %v3188_v52 = vpop.permute.xlu1 %3187 }
 0x421   : > { %3275 = vst.msk [vmem:[%s5864_s14 + $0x40] sm:$0xff] %vm511_vm1, %v3188_v52  ;;  %v3190_v61 = vpop.permute.xlu0 %3189 }
 0x422   : > { %3276 = vst.msk [vmem:[%s5864_s14 + $0x48] sm:$0xff] %vm511_vm1, %v3190_v61 }
 0x424   : > { %v3200_v37 = vpop.permute.xlu1 %3199 }
 0x425   : > { %3281 = vst.msk [vmem:[%s5864_s14 + $0x70] sm:$0xff] %vm511_vm1, %v3200_v37  ;;  %v3202_v13 = vpop.permute.xlu0 %3201 }
 0x426   : > { %3282 = vst.msk [vmem:[%s5864_s14 + $0x78] sm:$0xff] %vm511_vm1, %v3202_v13 }
 0x428   : > { %v3196_v0 = vpop.permute.xlu1 %3195 }
 0x429   : > { %3279 = vst.msk [vmem:[%s5864_s14 + $0x60] sm:$0xff] %vm511_vm1, %v3196_v0  ;;  %v3198_v47 = vpop.permute.xlu0 %3197 }
 0x42a   : > { %3280 = vst.msk [vmem:[%s5864_s14 + $0x68] sm:$0xff] %vm511_vm1, %v3198_v47 }
 0x42c   : > { %v3208_v19 = vpop.permute.xlu1 %3207 }
 0x42d   : > { %3285 = vst.msk [vmem:[%s5864_s14 + $0x90] sm:$0xff] %vm511_vm1, %v3208_v19  ;;  %v3210_v57 = vpop.permute.xlu0 %3209 }
 0x42e   : > { %3286 = vst.msk [vmem:[%s5864_s14 + $0x98] sm:$0xff] %vm511_vm1, %v3210_v57 }
 0x430   : > { %v3204_v53 = vpop.permute.xlu1 %3203 }
 0x431   : > { %3283 = vst.msk [vmem:[%s5864_s14 + $0x80] sm:$0xff] %vm511_vm1, %v3204_v53  ;;  %v3206_v63 = vpop.permute.xlu0 %3205 }
 0x432   : > { %3284 = vst.msk [vmem:[%s5864_s14 + $0x88] sm:$0xff] %vm511_vm1, %v3206_v63 }
 0x434   : > { %v3216_v20 = vpop.permute.xlu1 %3215 }
 0x435   : > { %3289 = vst.msk [vmem:[%s5864_s14 + $0xb0] sm:$0xff] %vm511_vm1, %v3216_v20 }
 0x436   : > { %v3218_v44 = vpop.permute.xlu0 %3217 }
 0x437   : > { %3290 = vst.msk [vmem:[%s5864_s14 + $0xb8] sm:$0xff] %vm511_vm1, %v3218_v44 }
 0x438   : > { %v3212_v54 = vpop.permute.xlu1 %3211 }
 0x439   : > { %3287 = vst.msk [vmem:[%s5864_s14 + $0xa0] sm:$0xff] %vm511_vm1, %v3212_v54 }
 0x43a   : > { %v3214_v28 = vpop.permute.xlu0 %3213 }
 0x43b   : > { %3288 = vst.msk [vmem:[%s5864_s14 + $0xa8] sm:$0xff] %vm511_vm1, %v3214_v28 }
 0x43c   : > { %v3224_v38 = vpop.permute.xlu1 %3223 }
 0x43d   : > { %3293 = vst.msk [vmem:[%s5864_s14 + $0xd0] sm:$0xff] %vm511_vm1, %v3224_v38 }
 0x43e   : > { %v3226_v8 = vpop.permute.xlu0 %3225 }
 0x43f   : > { %3294 = vst.msk [vmem:[%s5864_s14 + $0xd8] sm:$0xff] %vm511_vm1, %v3226_v8 }
 0x440   : > { %v3220_v48 = vpop.permute.xlu1 %3219 }
 0x441   : > { %3291 = vst.msk [vmem:[%s5864_s14 + $0xc0] sm:$0xff] %vm511_vm1, %v3220_v48 }
 0x442   : > { %v3222_v1 = vpop.permute.xlu0 %3221 }
 0x443   : > { %3292 = vst.msk [vmem:[%s5864_s14 + $0xc8] sm:$0xff] %vm511_vm1, %v3222_v1 }
 0x449   : > { %v3228_v12 = vpop.permute.xlu1 %3227 }
 0x44a   : > { %3295 = vst.msk [vmem:[%s5864_s14 + $0xe0] sm:$0xff] %vm511_vm1, %v3228_v12 }
 0x44b   : > { %v3230_v16 = vpop.permute.xlu0 %3229 }
 0x44c   : > { %3296 = vst.msk [vmem:[%s5864_s14 + $0xe8] sm:$0xff] %vm511_vm1, %v3230_v16 }
 0x44d   : > { %v3232_v49 = vpop.permute.xlu1 %3231 }
 0x44e   : > { %3297 = vst.msk [vmem:[%s5864_s14 + $0xf0] sm:$0xff] %vm511_vm1, %v3232_v49 }
 0x44f   : > { %v3234_v42 = vpop.permute.xlu0 %3233 }
 0x450   : > { %3298 = vst.msk [vmem:[%s5864_s14 + $0xf8] sm:$0xff] %vm511_vm1, %v3234_v42 }
 0x451 PF: > { %s17_s26 = sadd.s32 1, %s4074_s26   ;;  %s6021_s24 = smov %s4070_s25 }
 0x452   : > { %p14_p5 = scmp.ge.s32.totalorder %s17_s26, 4   ;;  %s6022_s25 = smov %s6024_s27 }
 0x454   :  { %16 = sbr.rel (!%p14_p5) target bundleno = 2 (0x2), region = 86 }

</bundles_post_ra>
